<compile_context>
chip_gen: v7x
topology: tpu7x:2x2x1
jax: 0.10.0
libtpu: 0.0.40
codegen_flags: <defaults>
</compile_context>

<pallas_src>
import functools
import math

import jax
import jax.numpy as jnp
from jax.experimental import pallas as pl
from jax.experimental.pallas import tpu as pltpu

BN_EPS = 1e-5


def _round_up(x, m):
    return ((x + m - 1) // m) * m


# ---------------------------------------------------------------------------
# Pallas kernel: one 3x3 / stride-1 / pad-1 conv output tile.
#   9 shifted-window matmuls (bf16 MXU, f32 acc) + fused bias/BN-shift + act.
# ---------------------------------------------------------------------------
def _conv3x3_kernel(x_ref, w_ref, shift_ref, o_ref, *, tm, th, cin_p,
                    offsets, act):
    # x_ref     : (M_in_p, cin_p) bf16 -- whole padded/flattened input, resident
    # w_ref     : (9, cin_p, tn)  bf16 -- BN-folded weights for this Cout tile
    # shift_ref : (1, tn)         f32  -- folded conv-bias / BN shift
    # o_ref     : (tm, tn)
    base = pl.multiple_of(pl.program_id(0) * tm, tm)     # aligned dynamic start
    # Load tile + halo rows once; unpack to f32 so the 9 odd-offset sublane
    # slices are on an unpacked layout (robust), then cast back for bf16 MXU.
    xb = x_ref[pl.ds(base, th), :].astype(jnp.float32)   # (th, cin_p)

    acc = jnp.zeros((tm, o_ref.shape[1]), jnp.float32)
    for k, off in enumerate(offsets):                    # 9 static taps, unrolled
        a = jax.lax.slice(xb, (off, 0), (off + tm, cin_p)).astype(jnp.bfloat16)
        acc = acc + jnp.dot(a, w_ref[k], preferred_element_type=jnp.float32)

    y = acc + shift_ref[...]                             # folded bias + BN shift
    if act == "leaky_relu":
        y = jnp.where(y >= 0, y, 0.01 * y)               # PyTorch default slope
    elif act == "sigmoid":
        y = jax.nn.sigmoid(y)
    o_ref[...] = y.astype(o_ref.dtype)


# ---------------------------------------------------------------------------
# Wrapper: 3x3 conv + BatchNorm(eval) + activation, all in ONE pallas_call.
# ---------------------------------------------------------------------------
def conv3x3_bn_act(x_nhwc, w, bias, bn_scale, bn_shift, *, act="leaky_relu",
                   out_dtype=jnp.float32):
    N, H, W, Cin = x_nhwc.shape
    KH, KW, _, Cout = w.shape
    assert (KH, KW) == (3, 3)
    Hp, Wp = H + 2, W + 2

    Cin_p = _round_up(Cin, 16)        # bf16-friendly K padding (sublane pack)
    Cout_p = _round_up(Cout, 128)     # lane-dense N padding

    # Fold BN (eval) into weights / shift:  (x*w + b)*s + t == x*(w*s) + (b*s+t)
    w_f = w.astype(jnp.float32) * bn_scale[None, None, None, :]
    shift = (bias * bn_scale + bn_shift).astype(jnp.float32)
    w_f = jnp.pad(w_f, ((0, 0), (0, 0), (0, Cin_p - Cin), (0, Cout_p - Cout)))
    w_k = w_f.reshape(9, Cin_p, Cout_p).astype(jnp.bfloat16)
    shift = jnp.pad(shift, (0, Cout_p - Cout)).reshape(1, Cout_p)

    # Zero-pad spatially + channel-pad, then flatten rows.  No im2col blow-up:
    # row count grows only (Hp*Wp)/(H*W) (~1.3x here).
    xp = jnp.pad(x_nhwc.astype(jnp.bfloat16),
                 ((0, 0), (1, 1), (1, 1), (0, Cin_p - Cin)))
    M = N * Hp * Wp
    x_flat = xp.reshape(M, Cin_p)

    # Output-row tiling: pad UP to the tile size (never shrink tiles).
    tm = 256 if M > 256 else _round_up(M, 8)
    Mo_p = _round_up(M, tm)
    halo = _round_up(2 * Wp + 2, 16)          # max tap offset, rounded
    th = tm + halo                            # rows loaded per output tile
    M_in_p = Mo_p + halo
    x_flat = jnp.pad(x_flat, ((0, M_in_p - M), (0, 0)))

    tn = min(Cout_p, 256)
    # Tap offsets in flattened padded-row space: out row j reads rows j+kh*Wp+kw.
    offsets = tuple(kh * Wp + kw for kh in range(3) for kw in range(3))

    kernel = functools.partial(_conv3x3_kernel, tm=tm, th=th, cin_p=Cin_p,
                               offsets=offsets, act=act)
    out_flat = pl.pallas_call(
        kernel,
        out_shape=jax.ShapeDtypeStruct((Mo_p, Cout_p), out_dtype),
        grid_spec=pltpu.PrefetchScalarGridSpec(
            num_scalar_prefetch=0,
            grid=(Mo_p // tm, Cout_p // tn),
            in_specs=[
                # Whole flattened input, constant block index -> fetched once.
                pl.BlockSpec((M_in_p, Cin_p), lambda i, j: (0, 0)),
                pl.BlockSpec((9, Cin_p, tn), lambda i, j: (0, 0, j)),
                pl.BlockSpec((1, tn), lambda i, j: (0, j)),
            ],
            out_specs=pl.BlockSpec((tm, tn), lambda i, j: (i, j)),
        ),
        compiler_params=pltpu.CompilerParams(
            dimension_semantics=("parallel", "parallel")),
    )(x_flat, w_k, shift)

    # Rows are indexed by the top-left padded position; keep the valid window.
    out = out_flat[:M].reshape(N, Hp, Wp, Cout_p)[:, :H, :W, :Cout]
    return out


# ---------------------------------------------------------------------------
# Conv block forward (matches the PyTorch `Conv` module, eval semantics).
# ---------------------------------------------------------------------------
def conv_block_forward(x_nchw, params):
    x = jnp.transpose(x_nchw, (0, 2, 3, 1))               # NCHW -> NHWC
    # Conv -> BN(eval) -> Dropout(eval: identity) -> LeakyReLU
    x = conv3x3_bn_act(x, params['w1'], params['b1'], params['s1'], params['t1'],
                       act="leaky_relu", out_dtype=jnp.bfloat16)
    x = conv3x3_bn_act(x, params['w2'], params['b2'], params['s2'], params['t2'],
                       act="leaky_relu", out_dtype=jnp.float32)
    return jnp.transpose(x, (0, 3, 1, 2))                 # NHWC -> NCHW


def _reference_forward(x_nchw, params):
    """Plain-JAX (XLA) reference for correctness checking."""
    x = jnp.transpose(x_nchw, (0, 2, 3, 1))

    def one(h, w, b, s, t):
        y = jax.lax.conv_general_dilated(
            h, w, window_strides=(1, 1), padding=((1, 1), (1, 1)),
            dimension_numbers=("NHWC", "HWIO", "NHWC"))
        y = (y + b) * s + t
        return jnp.where(y >= 0, y, 0.01 * y)

    x = one(x, params['w1'], params['b1'], params['s1'], params['t1'])
    x = one(x, params['w2'], params['b2'], params['s2'], params['t2'])
    return jnp.transpose(x, (0, 3, 1, 2))


# ---------------------------------------------------------------------------
# Deterministic synthetic parameters.
# ---------------------------------------------------------------------------
def init_conv_params(key, c_in, c_out):
    k1, k2 = jax.random.split(key)

    def conv_init(k, cin, cout):
        kw_, kb_ = jax.random.split(k)
        bound = 1.0 / math.sqrt(cin * 9)
        w = jax.random.uniform(kw_, (3, 3, cin, cout), jnp.float32, -bound, bound)
        b = jax.random.uniform(kb_, (cout,), jnp.float32, -bound, bound)
        return w, b

    w1, b1 = conv_init(k1, c_in, c_out)
    w2, b2 = conv_init(k2, c_out, c_out)
    # eval-mode BN: gamma=1, beta=0, running_mean=0, running_var=1
    s = jnp.full((c_out,), 1.0 / math.sqrt(1.0 + BN_EPS), jnp.float32)
    t = jnp.zeros((c_out,), jnp.float32)
    return dict(w1=w1, b1=b1, s1=s, t1=t, w2=w2, b2=b2, s2=s, t2=t)


if __name__ == "__main__":
    key = jax.random.PRNGKey(0)
    kx, kp = jax.random.split(key)
    C_in, C_out = 4, 8
    x = jax.random.normal(kx, (2, C_in, 16, 16), jnp.float32)   # NCHW
    params = init_conv_params(kp, C_in, C_out)

    fwd = jax.jit(conv_block_forward)
    out = fwd(x, params)
    jax.block_until_ready(out)

    assert out.shape == (2, C_out, 16, 16), out.shape
    assert bool(jnp.all(jnp.isfinite(out)))

    # Correctness vs. XLA reference (loose tolerance: bf16 operands, f32 acc).
    ref = _reference_forward(x, params)
    err = float(jnp.max(jnp.abs(out - ref)))
    assert err < 0.05, f"max abs error vs reference conv: {err}"

    print("KERNEL_OK")
</pallas_src>

<mosaic_0001>
module attributes {stable_mosaic.version = 11 : i64} {
  func.func @_conv3x3_kernel(%arg0: i32, %arg1: i32, %arg2: memref<816x16xbf16, #tpu.memory_space<vmem>>, %arg3: memref<9x16x128xbf16, #tpu.memory_space<vmem>>, %arg4: memref<1x128xf32, #tpu.memory_space<vmem>>, %arg5: memref<256x128xbf16, #tpu.memory_space<vmem>>) attributes {dimension_semantics = [#tpu.dimension_semantics<parallel>, #tpu.dimension_semantics<parallel>], iteration_bounds = array<i64: 3, 1>, scalar_prefetch = 0 : i64, scratch_operands = 0 : i64, tpu.core_type = #tpu.core_type<tc>, window_params = [{pipeline_mode = #tpu.pipeline_mode<synchronous>, transform_indices = @transform_0, window_bounds = array<i64: 816, 16>}, {transform_indices = @transform_1, window_bounds = array<i64: 9, 16, 128>}, {transform_indices = @transform_2, window_bounds = array<i64: 1, 128>}, {transform_indices = @transform_3, window_bounds = array<i64: 256, 128>}]} {
    %c256_i32 = arith.constant 256 : i32
    %0 = arith.muli %arg0, %c256_i32 : i32
    %1 = tpu.assume_multiple %0, 256 : i32
    %2 = arith.index_cast %1 : i32 to index
    %c0 = arith.constant 0 : index
    %3 = vector.load %arg2[%2, %c0] : memref<816x16xbf16, #tpu.memory_space<vmem>>, vector<304x16xbf16>
    %4 = arith.extf %3 : vector<304x16xbf16> to vector<304x16xf32>
    %cst = arith.constant 0.000000e+00 : f32
    %5 = vector.broadcast %cst : f32 to vector<256x128xf32>
    %6 = vector.extract_strided_slice %4 {offsets = [0, 0], sizes = [256, 16], strides = [1, 1]} : vector<304x16xf32> to vector<256x16xf32>
    %7 = arith.truncf %6 : vector<256x16xf32> to vector<256x16xbf16>
    %c0_0 = arith.constant 0 : index
    %c0_1 = arith.constant 0 : index
    %c0_2 = arith.constant 0 : index
    %8 = vector.load %arg3[%c0_0, %c0_1, %c0_2] : memref<9x16x128xbf16, #tpu.memory_space<vmem>>, vector<1x16x128xbf16>
    %9 = vector.shape_cast %8 : vector<1x16x128xbf16> to vector<16x128xbf16>
    %cst_3 = arith.constant dense<0.000000e+00> : vector<256x128xf32>
    %10 = tpu.matmul %7, %9, %cst_3 {dimension_numbers = #tpu.dot_dimension_numbers<[1], [0], [0], [1], [0, 0, 1, 1], [], []>} : vector<256x16xbf16>, vector<16x128xbf16>, vector<256x128xf32> -> vector<256x128xf32>
    %11 = arith.addf %5, %10 : vector<256x128xf32>
    %12 = vector.extract_strided_slice %4 {offsets = [1, 0], sizes = [256, 16], strides = [1, 1]} : vector<304x16xf32> to vector<256x16xf32>
    %13 = arith.truncf %12 : vector<256x16xf32> to vector<256x16xbf16>
    %c1 = arith.constant 1 : index
    %c0_4 = arith.constant 0 : index
    %c0_5 = arith.constant 0 : index
    %14 = vector.load %arg3[%c1, %c0_4, %c0_5] : memref<9x16x128xbf16, #tpu.memory_space<vmem>>, vector<1x16x128xbf16>
    %15 = vector.shape_cast %14 : vector<1x16x128xbf16> to vector<16x128xbf16>
    %cst_6 = arith.constant dense<0.000000e+00> : vector<256x128xf32>
    %16 = tpu.matmul %13, %15, %cst_6 {dimension_numbers = #tpu.dot_dimension_numbers<[1], [0], [0], [1], [0, 0, 1, 1], [], []>} : vector<256x16xbf16>, vector<16x128xbf16>, vector<256x128xf32> -> vector<256x128xf32>
    %17 = arith.addf %11, %16 : vector<256x128xf32>
    %18 = vector.extract_strided_slice %4 {offsets = [2, 0], sizes = [256, 16], strides = [1, 1]} : vector<304x16xf32> to vector<256x16xf32>
    %19 = arith.truncf %18 : vector<256x16xf32> to vector<256x16xbf16>
    %c2 = arith.constant 2 : index
    %c0_7 = arith.constant 0 : index
    %c0_8 = arith.constant 0 : index
    %20 = vector.load %arg3[%c2, %c0_7, %c0_8] : memref<9x16x128xbf16, #tpu.memory_space<vmem>>, vector<1x16x128xbf16>
    %21 = vector.shape_cast %20 : vector<1x16x128xbf16> to vector<16x128xbf16>
    %cst_9 = arith.constant dense<0.000000e+00> : vector<256x128xf32>
    %22 = tpu.matmul %19, %21, %cst_9 {dimension_numbers = #tpu.dot_dimension_numbers<[1], [0], [0], [1], [0, 0, 1, 1], [], []>} : vector<256x16xbf16>, vector<16x128xbf16>, vector<256x128xf32> -> vector<256x128xf32>
    %23 = arith.addf %17, %22 : vector<256x128xf32>
    %24 = vector.extract_strided_slice %4 {offsets = [18, 0], sizes = [256, 16], strides = [1, 1]} : vector<304x16xf32> to vector<256x16xf32>
    %25 = arith.truncf %24 : vector<256x16xf32> to vector<256x16xbf16>
    %c3 = arith.constant 3 : index
    %c0_10 = arith.constant 0 : index
    %c0_11 = arith.constant 0 : index
    %26 = vector.load %arg3[%c3, %c0_10, %c0_11] : memref<9x16x128xbf16, #tpu.memory_space<vmem>>, vector<1x16x128xbf16>
    %27 = vector.shape_cast %26 : vector<1x16x128xbf16> to vector<16x128xbf16>
    %cst_12 = arith.constant dense<0.000000e+00> : vector<256x128xf32>
    %28 = tpu.matmul %25, %27, %cst_12 {dimension_numbers = #tpu.dot_dimension_numbers<[1], [0], [0], [1], [0, 0, 1, 1], [], []>} : vector<256x16xbf16>, vector<16x128xbf16>, vector<256x128xf32> -> vector<256x128xf32>
    %29 = arith.addf %23, %28 : vector<256x128xf32>
    %30 = vector.extract_strided_slice %4 {offsets = [19, 0], sizes = [256, 16], strides = [1, 1]} : vector<304x16xf32> to vector<256x16xf32>
    %31 = arith.truncf %30 : vector<256x16xf32> to vector<256x16xbf16>
    %c4 = arith.constant 4 : index
    %c0_13 = arith.constant 0 : index
    %c0_14 = arith.constant 0 : index
    %32 = vector.load %arg3[%c4, %c0_13, %c0_14] : memref<9x16x128xbf16, #tpu.memory_space<vmem>>, vector<1x16x128xbf16>
    %33 = vector.shape_cast %32 : vector<1x16x128xbf16> to vector<16x128xbf16>
    %cst_15 = arith.constant dense<0.000000e+00> : vector<256x128xf32>
    %34 = tpu.matmul %31, %33, %cst_15 {dimension_numbers = #tpu.dot_dimension_numbers<[1], [0], [0], [1], [0, 0, 1, 1], [], []>} : vector<256x16xbf16>, vector<16x128xbf16>, vector<256x128xf32> -> vector<256x128xf32>
    %35 = arith.addf %29, %34 : vector<256x128xf32>
    %36 = vector.extract_strided_slice %4 {offsets = [20, 0], sizes = [256, 16], strides = [1, 1]} : vector<304x16xf32> to vector<256x16xf32>
    %37 = arith.truncf %36 : vector<256x16xf32> to vector<256x16xbf16>
    %c5 = arith.constant 5 : index
    %c0_16 = arith.constant 0 : index
    %c0_17 = arith.constant 0 : index
    %38 = vector.load %arg3[%c5, %c0_16, %c0_17] : memref<9x16x128xbf16, #tpu.memory_space<vmem>>, vector<1x16x128xbf16>
    %39 = vector.shape_cast %38 : vector<1x16x128xbf16> to vector<16x128xbf16>
    %cst_18 = arith.constant dense<0.000000e+00> : vector<256x128xf32>
    %40 = tpu.matmul %37, %39, %cst_18 {dimension_numbers = #tpu.dot_dimension_numbers<[1], [0], [0], [1], [0, 0, 1, 1], [], []>} : vector<256x16xbf16>, vector<16x128xbf16>, vector<256x128xf32> -> vector<256x128xf32>
    %41 = arith.addf %35, %40 : vector<256x128xf32>
    %42 = vector.extract_strided_slice %4 {offsets = [36, 0], sizes = [256, 16], strides = [1, 1]} : vector<304x16xf32> to vector<256x16xf32>
    %43 = arith.truncf %42 : vector<256x16xf32> to vector<256x16xbf16>
    %c6 = arith.constant 6 : index
    %c0_19 = arith.constant 0 : index
    %c0_20 = arith.constant 0 : index
    %44 = vector.load %arg3[%c6, %c0_19, %c0_20] : memref<9x16x128xbf16, #tpu.memory_space<vmem>>, vector<1x16x128xbf16>
    %45 = vector.shape_cast %44 : vector<1x16x128xbf16> to vector<16x128xbf16>
    %cst_21 = arith.constant dense<0.000000e+00> : vector<256x128xf32>
    %46 = tpu.matmul %43, %45, %cst_21 {dimension_numbers = #tpu.dot_dimension_numbers<[1], [0], [0], [1], [0, 0, 1, 1], [], []>} : vector<256x16xbf16>, vector<16x128xbf16>, vector<256x128xf32> -> vector<256x128xf32>
    %47 = arith.addf %41, %46 : vector<256x128xf32>
    %48 = vector.extract_strided_slice %4 {offsets = [37, 0], sizes = [256, 16], strides = [1, 1]} : vector<304x16xf32> to vector<256x16xf32>
    %49 = arith.truncf %48 : vector<256x16xf32> to vector<256x16xbf16>
    %c7 = arith.constant 7 : index
    %c0_22 = arith.constant 0 : index
    %c0_23 = arith.constant 0 : index
    %50 = vector.load %arg3[%c7, %c0_22, %c0_23] : memref<9x16x128xbf16, #tpu.memory_space<vmem>>, vector<1x16x128xbf16>
    %51 = vector.shape_cast %50 : vector<1x16x128xbf16> to vector<16x128xbf16>
    %cst_24 = arith.constant dense<0.000000e+00> : vector<256x128xf32>
    %52 = tpu.matmul %49, %51, %cst_24 {dimension_numbers = #tpu.dot_dimension_numbers<[1], [0], [0], [1], [0, 0, 1, 1], [], []>} : vector<256x16xbf16>, vector<16x128xbf16>, vector<256x128xf32> -> vector<256x128xf32>
    %53 = arith.addf %47, %52 : vector<256x128xf32>
    %54 = vector.extract_strided_slice %4 {offsets = [38, 0], sizes = [256, 16], strides = [1, 1]} : vector<304x16xf32> to vector<256x16xf32>
    %55 = arith.truncf %54 : vector<256x16xf32> to vector<256x16xbf16>
    %c8 = arith.constant 8 : index
    %c0_25 = arith.constant 0 : index
    %c0_26 = arith.constant 0 : index
    %56 = vector.load %arg3[%c8, %c0_25, %c0_26] : memref<9x16x128xbf16, #tpu.memory_space<vmem>>, vector<1x16x128xbf16>
    %57 = vector.shape_cast %56 : vector<1x16x128xbf16> to vector<16x128xbf16>
    %cst_27 = arith.constant dense<0.000000e+00> : vector<256x128xf32>
    %58 = tpu.matmul %55, %57, %cst_27 {dimension_numbers = #tpu.dot_dimension_numbers<[1], [0], [0], [1], [0, 0, 1, 1], [], []>} : vector<256x16xbf16>, vector<16x128xbf16>, vector<256x128xf32> -> vector<256x128xf32>
    %59 = arith.addf %53, %58 : vector<256x128xf32>
    %c0_28 = arith.constant 0 : index
    %c0_29 = arith.constant 0 : index
    %60 = vector.load %arg4[%c0_28, %c0_29] : memref<1x128xf32, #tpu.memory_space<vmem>>, vector<1x128xf32>
    %61 = vector.broadcast %60 : vector<1x128xf32> to vector<256x128xf32>
    %62 = arith.addf %59, %61 : vector<256x128xf32>
    %cst_30 = arith.constant 0.000000e+00 : f32
    %63 = vector.broadcast %cst_30 : f32 to vector<256x128xf32>
    %64 = arith.cmpf oge, %62, %63 : vector<256x128xf32>
    %cst_31 = arith.constant 0.00999999977 : f32
    %65 = vector.broadcast %cst_31 : f32 to vector<256x128xf32>
    %66 = arith.mulf %65, %62 : vector<256x128xf32>
    %67 = arith.select %64, %62, %66 : vector<256x128xi1>, vector<256x128xf32>
    %68 = arith.truncf %67 : vector<256x128xf32> to vector<256x128xbf16>
    %c0_32 = arith.constant 0 : index
    %c0_33 = arith.constant 0 : index
    %69 = vector.load %arg5[%c0_32, %c0_33] : memref<256x128xbf16, #tpu.memory_space<vmem>>, vector<256x128xbf16>
    tpu.vector_store %arg5[%c0_32, %c0_33], %68 {strides = array<i32>} : memref<256x128xbf16, #tpu.memory_space<vmem>>, vector<256x128xbf16>,
    return
  }
  func.func @transform_0(%arg0: i32, %arg1: i32) -> (i32, i32) {
    %c0_i32 = arith.constant 0 : i32
    %c0_i32_0 = arith.constant 0 : i32
    %c0_i32_1 = arith.constant 0 : i32
    return %c0_i32, %c0_i32_0 : i32, i32
  }
  func.func @transform_1(%arg0: i32, %arg1: i32) -> (i32, i32, i32) {
    %c0_i32 = arith.constant 0 : i32
    %c0_i32_0 = arith.constant 0 : i32
    %c0_i32_1 = arith.constant 0 : i32
    return %c0_i32, %c0_i32_0, %arg1 : i32, i32, i32
  }
  func.func @transform_2(%arg0: i32, %arg1: i32) -> (i32, i32) {
    %c0_i32 = arith.constant 0 : i32
    %c0_i32_0 = arith.constant 0 : i32
    return %c0_i32, %arg1 : i32, i32
  }
  func.func @transform_3(%arg0: i32, %arg1: i32) -> (i32, i32) {
    %c0_i32 = arith.constant 0 : i32
    return %arg0, %arg1 : i32, i32
  }
}

module attributes {stable_mosaic.version = 11 : i64} {
  func.func @_conv3x3_kernel(%arg0: i32, %arg1: i32, %arg2: memref<816x16xbf16, #tpu.memory_space<vmem>>, %arg3: memref<9x16x128xbf16, #tpu.memory_space<vmem>>, %arg4: memref<1x128xf32, #tpu.memory_space<vmem>>, %arg5: memref<256x128xf32, #tpu.memory_space<vmem>>) attributes {dimension_semantics = [#tpu.dimension_semantics<parallel>, #tpu.dimension_semantics<parallel>], iteration_bounds = array<i64: 3, 1>, scalar_prefetch = 0 : i64, scratch_operands = 0 : i64, tpu.core_type = #tpu.core_type<tc>, window_params = [{pipeline_mode = #tpu.pipeline_mode<synchronous>, transform_indices = @transform_0, window_bounds = array<i64: 816, 16>}, {transform_indices = @transform_1, window_bounds = array<i64: 9, 16, 128>}, {transform_indices = @transform_2, window_bounds = array<i64: 1, 128>}, {transform_indices = @transform_3, window_bounds = array<i64: 256, 128>}]} {
    %c256_i32 = arith.constant 256 : i32
    %0 = arith.muli %arg0, %c256_i32 : i32
    %1 = tpu.assume_multiple %0, 256 : i32
    %2 = arith.index_cast %1 : i32 to index
    %c0 = arith.constant 0 : index
    %3 = vector.load %arg2[%2, %c0] : memref<816x16xbf16, #tpu.memory_space<vmem>>, vector<304x16xbf16>
    %4 = arith.extf %3 : vector<304x16xbf16> to vector<304x16xf32>
    %cst = arith.constant 0.000000e+00 : f32
    %5 = vector.broadcast %cst : f32 to vector<256x128xf32>
    %6 = vector.extract_strided_slice %4 {offsets = [0, 0], sizes = [256, 16], strides = [1, 1]} : vector<304x16xf32> to vector<256x16xf32>
    %7 = arith.truncf %6 : vector<256x16xf32> to vector<256x16xbf16>
    %c0_0 = arith.constant 0 : index
    %c0_1 = arith.constant 0 : index
    %c0_2 = arith.constant 0 : index
    %8 = vector.load %arg3[%c0_0, %c0_1, %c0_2] : memref<9x16x128xbf16, #tpu.memory_space<vmem>>, vector<1x16x128xbf16>
    %9 = vector.shape_cast %8 : vector<1x16x128xbf16> to vector<16x128xbf16>
    %cst_3 = arith.constant dense<0.000000e+00> : vector<256x128xf32>
    %10 = tpu.matmul %7, %9, %cst_3 {dimension_numbers = #tpu.dot_dimension_numbers<[1], [0], [0], [1], [0, 0, 1, 1], [], []>} : vector<256x16xbf16>, vector<16x128xbf16>, vector<256x128xf32> -> vector<256x128xf32>
    %11 = arith.addf %5, %10 : vector<256x128xf32>
    %12 = vector.extract_strided_slice %4 {offsets = [1, 0], sizes = [256, 16], strides = [1, 1]} : vector<304x16xf32> to vector<256x16xf32>
    %13 = arith.truncf %12 : vector<256x16xf32> to vector<256x16xbf16>
    %c1 = arith.constant 1 : index
    %c0_4 = arith.constant 0 : index
    %c0_5 = arith.constant 0 : index
    %14 = vector.load %arg3[%c1, %c0_4, %c0_5] : memref<9x16x128xbf16, #tpu.memory_space<vmem>>, vector<1x16x128xbf16>
    %15 = vector.shape_cast %14 : vector<1x16x128xbf16> to vector<16x128xbf16>
    %cst_6 = arith.constant dense<0.000000e+00> : vector<256x128xf32>
    %16 = tpu.matmul %13, %15, %cst_6 {dimension_numbers = #tpu.dot_dimension_numbers<[1], [0], [0], [1], [0, 0, 1, 1], [], []>} : vector<256x16xbf16>, vector<16x128xbf16>, vector<256x128xf32> -> vector<256x128xf32>
    %17 = arith.addf %11, %16 : vector<256x128xf32>
    %18 = vector.extract_strided_slice %4 {offsets = [2, 0], sizes = [256, 16], strides = [1, 1]} : vector<304x16xf32> to vector<256x16xf32>
    %19 = arith.truncf %18 : vector<256x16xf32> to vector<256x16xbf16>
    %c2 = arith.constant 2 : index
    %c0_7 = arith.constant 0 : index
    %c0_8 = arith.constant 0 : index
    %20 = vector.load %arg3[%c2, %c0_7, %c0_8] : memref<9x16x128xbf16, #tpu.memory_space<vmem>>, vector<1x16x128xbf16>
    %21 = vector.shape_cast %20 : vector<1x16x128xbf16> to vector<16x128xbf16>
    %cst_9 = arith.constant dense<0.000000e+00> : vector<256x128xf32>
    %22 = tpu.matmul %19, %21, %cst_9 {dimension_numbers = #tpu.dot_dimension_numbers<[1], [0], [0], [1], [0, 0, 1, 1], [], []>} : vector<256x16xbf16>, vector<16x128xbf16>, vector<256x128xf32> -> vector<256x128xf32>
    %23 = arith.addf %17, %22 : vector<256x128xf32>
    %24 = vector.extract_strided_slice %4 {offsets = [18, 0], sizes = [256, 16], strides = [1, 1]} : vector<304x16xf32> to vector<256x16xf32>
    %25 = arith.truncf %24 : vector<256x16xf32> to vector<256x16xbf16>
    %c3 = arith.constant 3 : index
    %c0_10 = arith.constant 0 : index
    %c0_11 = arith.constant 0 : index
    %26 = vector.load %arg3[%c3, %c0_10, %c0_11] : memref<9x16x128xbf16, #tpu.memory_space<vmem>>, vector<1x16x128xbf16>
    %27 = vector.shape_cast %26 : vector<1x16x128xbf16> to vector<16x128xbf16>
    %cst_12 = arith.constant dense<0.000000e+00> : vector<256x128xf32>
    %28 = tpu.matmul %25, %27, %cst_12 {dimension_numbers = #tpu.dot_dimension_numbers<[1], [0], [0], [1], [0, 0, 1, 1], [], []>} : vector<256x16xbf16>, vector<16x128xbf16>, vector<256x128xf32> -> vector<256x128xf32>
    %29 = arith.addf %23, %28 : vector<256x128xf32>
    %30 = vector.extract_strided_slice %4 {offsets = [19, 0], sizes = [256, 16], strides = [1, 1]} : vector<304x16xf32> to vector<256x16xf32>
    %31 = arith.truncf %30 : vector<256x16xf32> to vector<256x16xbf16>
    %c4 = arith.constant 4 : index
    %c0_13 = arith.constant 0 : index
    %c0_14 = arith.constant 0 : index
    %32 = vector.load %arg3[%c4, %c0_13, %c0_14] : memref<9x16x128xbf16, #tpu.memory_space<vmem>>, vector<1x16x128xbf16>
    %33 = vector.shape_cast %32 : vector<1x16x128xbf16> to vector<16x128xbf16>
    %cst_15 = arith.constant dense<0.000000e+00> : vector<256x128xf32>
    %34 = tpu.matmul %31, %33, %cst_15 {dimension_numbers = #tpu.dot_dimension_numbers<[1], [0], [0], [1], [0, 0, 1, 1], [], []>} : vector<256x16xbf16>, vector<16x128xbf16>, vector<256x128xf32> -> vector<256x128xf32>
    %35 = arith.addf %29, %34 : vector<256x128xf32>
    %36 = vector.extract_strided_slice %4 {offsets = [20, 0], sizes = [256, 16], strides = [1, 1]} : vector<304x16xf32> to vector<256x16xf32>
    %37 = arith.truncf %36 : vector<256x16xf32> to vector<256x16xbf16>
    %c5 = arith.constant 5 : index
    %c0_16 = arith.constant 0 : index
    %c0_17 = arith.constant 0 : index
    %38 = vector.load %arg3[%c5, %c0_16, %c0_17] : memref<9x16x128xbf16, #tpu.memory_space<vmem>>, vector<1x16x128xbf16>
    %39 = vector.shape_cast %38 : vector<1x16x128xbf16> to vector<16x128xbf16>
    %cst_18 = arith.constant dense<0.000000e+00> : vector<256x128xf32>
    %40 = tpu.matmul %37, %39, %cst_18 {dimension_numbers = #tpu.dot_dimension_numbers<[1], [0], [0], [1], [0, 0, 1, 1], [], []>} : vector<256x16xbf16>, vector<16x128xbf16>, vector<256x128xf32> -> vector<256x128xf32>
    %41 = arith.addf %35, %40 : vector<256x128xf32>
    %42 = vector.extract_strided_slice %4 {offsets = [36, 0], sizes = [256, 16], strides = [1, 1]} : vector<304x16xf32> to vector<256x16xf32>
    %43 = arith.truncf %42 : vector<256x16xf32> to vector<256x16xbf16>
    %c6 = arith.constant 6 : index
    %c0_19 = arith.constant 0 : index
    %c0_20 = arith.constant 0 : index
    %44 = vector.load %arg3[%c6, %c0_19, %c0_20] : memref<9x16x128xbf16, #tpu.memory_space<vmem>>, vector<1x16x128xbf16>
    %45 = vector.shape_cast %44 : vector<1x16x128xbf16> to vector<16x128xbf16>
    %cst_21 = arith.constant dense<0.000000e+00> : vector<256x128xf32>
    %46 = tpu.matmul %43, %45, %cst_21 {dimension_numbers = #tpu.dot_dimension_numbers<[1], [0], [0], [1], [0, 0, 1, 1], [], []>} : vector<256x16xbf16>, vector<16x128xbf16>, vector<256x128xf32> -> vector<256x128xf32>
    %47 = arith.addf %41, %46 : vector<256x128xf32>
    %48 = vector.extract_strided_slice %4 {offsets = [37, 0], sizes = [256, 16], strides = [1, 1]} : vector<304x16xf32> to vector<256x16xf32>
    %49 = arith.truncf %48 : vector<256x16xf32> to vector<256x16xbf16>
    %c7 = arith.constant 7 : index
    %c0_22 = arith.constant 0 : index
    %c0_23 = arith.constant 0 : index
    %50 = vector.load %arg3[%c7, %c0_22, %c0_23] : memref<9x16x128xbf16, #tpu.memory_space<vmem>>, vector<1x16x128xbf16>
    %51 = vector.shape_cast %50 : vector<1x16x128xbf16> to vector<16x128xbf16>
    %cst_24 = arith.constant dense<0.000000e+00> : vector<256x128xf32>
    %52 = tpu.matmul %49, %51, %cst_24 {dimension_numbers = #tpu.dot_dimension_numbers<[1], [0], [0], [1], [0, 0, 1, 1], [], []>} : vector<256x16xbf16>, vector<16x128xbf16>, vector<256x128xf32> -> vector<256x128xf32>
    %53 = arith.addf %47, %52 : vector<256x128xf32>
    %54 = vector.extract_strided_slice %4 {offsets = [38, 0], sizes = [256, 16], strides = [1, 1]} : vector<304x16xf32> to vector<256x16xf32>
    %55 = arith.truncf %54 : vector<256x16xf32> to vector<256x16xbf16>
    %c8 = arith.constant 8 : index
    %c0_25 = arith.constant 0 : index
    %c0_26 = arith.constant 0 : index
    %56 = vector.load %arg3[%c8, %c0_25, %c0_26] : memref<9x16x128xbf16, #tpu.memory_space<vmem>>, vector<1x16x128xbf16>
    %57 = vector.shape_cast %56 : vector<1x16x128xbf16> to vector<16x128xbf16>
    %cst_27 = arith.constant dense<0.000000e+00> : vector<256x128xf32>
    %58 = tpu.matmul %55, %57, %cst_27 {dimension_numbers = #tpu.dot_dimension_numbers<[1], [0], [0], [1], [0, 0, 1, 1], [], []>} : vector<256x16xbf16>, vector<16x128xbf16>, vector<256x128xf32> -> vector<256x128xf32>
    %59 = arith.addf %53, %58 : vector<256x128xf32>
    %c0_28 = arith.constant 0 : index
    %c0_29 = arith.constant 0 : index
    %60 = vector.load %arg4[%c0_28, %c0_29] : memref<1x128xf32, #tpu.memory_space<vmem>>, vector<1x128xf32>
    %61 = vector.broadcast %60 : vector<1x128xf32> to vector<256x128xf32>
    %62 = arith.addf %59, %61 : vector<256x128xf32>
    %cst_30 = arith.constant 0.000000e+00 : f32
    %63 = vector.broadcast %cst_30 : f32 to vector<256x128xf32>
    %64 = arith.cmpf oge, %62, %63 : vector<256x128xf32>
    %cst_31 = arith.constant 0.00999999977 : f32
    %65 = vector.broadcast %cst_31 : f32 to vector<256x128xf32>
    %66 = arith.mulf %65, %62 : vector<256x128xf32>
    %67 = arith.select %64, %62, %66 : vector<256x128xi1>, vector<256x128xf32>
    %c0_32 = arith.constant 0 : index
    %c0_33 = arith.constant 0 : index
    %68 = vector.load %arg5[%c0_32, %c0_33] : memref<256x128xf32, #tpu.memory_space<vmem>>, vector<256x128xf32>
    tpu.vector_store %arg5[%c0_32, %c0_33], %67 {strides = array<i32>} : memref<256x128xf32, #tpu.memory_space<vmem>>, vector<256x128xf32>,
    return
  }
  func.func @transform_0(%arg0: i32, %arg1: i32) -> (i32, i32) {
    %c0_i32 = arith.constant 0 : i32
    %c0_i32_0 = arith.constant 0 : i32
    %c0_i32_1 = arith.constant 0 : i32
    return %c0_i32, %c0_i32_0 : i32, i32
  }
  func.func @transform_1(%arg0: i32, %arg1: i32) -> (i32, i32, i32) {
    %c0_i32 = arith.constant 0 : i32
    %c0_i32_0 = arith.constant 0 : i32
    %c0_i32_1 = arith.constant 0 : i32
    return %c0_i32, %c0_i32_0, %arg1 : i32, i32, i32
  }
  func.func @transform_2(%arg0: i32, %arg1: i32) -> (i32, i32) {
    %c0_i32 = arith.constant 0 : i32
    %c0_i32_0 = arith.constant 0 : i32
    return %c0_i32, %arg1 : i32, i32
  }
  func.func @transform_3(%arg0: i32, %arg1: i32) -> (i32, i32) {
    %c0_i32 = arith.constant 0 : i32
    return %arg0, %arg1 : i32, i32
  }
}

</mosaic_0001>

<bundles_post_ra>
// kernel: conv_block_forward.3
= control target key start
LH: loop header
LB: loop body
LE: loop exit
PB: predicated region body
PF: predicated region fallthrough
CT: control target
= control target key end

     0   :  { %s4087_s12 = smov 0   ;;  %s4089_s13 = smov 0   ;;  %s4972_s0 = inlined_call_operand.vmem [shape: bf16[816,16], index: 0, kind: input, shape index: {}]   ;;  %s4973_s1 = inlined_call_operand.vmem [shape: bf16[9,16,128], index: 1, kind: input, shape index: {}]   ;;  %s4974_s2 = inlined_call_operand.vmem [shape: f32[1,128], index: 2, kind: input, shape index: {}]   ;;  %s4975_s3 = inlined_call_operand.vmem [shape: f32[768,128], index: 3, kind: output, shape index: {}]  }
   0x1   :  { %s4091_s14 = smov 0  }
   0x2 LB: > { %s25_s15 = sadd.s32 1, %s4061_s13  ;;  %p3074_p0 = scmp.ge.s32.totalorder %s4065_s14, 1  ;;  %s4065_s14 = sphi %s4091_s14, %s13_s14   ;;  %s4061_s13 = sphi %s4089_s13, %s4996_s13   ;;  %s4057_s12 = sphi %s4087_s12, %s4995_s12  }
   0x3   : > { %p27_p1 = scmp.ge.s32.totalorder %s25_s15, 3  ;;  %p158_p2 = scmp.lt.s32.totalorder %s4065_s14, 4 }
   0x5   : > { %s4998_s15 = smov (%p27_p1, %s25_s15), 0  ;;  %p159_p3 = pnand %p3074_p0, %p158_p2 }
   0x7   : > { %162 = sbr.rel (%p159_p3) target bundleno = 533 (0x215), region = 32 }
   0xe   : > { %v4013_v0 = vld [vmem:[%s4973_s1 + $0x8] sm:$0xff]   ;;  %s3077_s18 = sshll.u32 %s4057_s12, 8  ;;  %v4114_v1 = vld [vmem:[%s4973_s1 + $0x20] sm:$0xff]   ;;  %vm305_vm0 = vsmask.f32 7424  ;;  %vm444_vm2 = vcmask 130048  }
   0xf   : > { %s205_s21 = sshra.s32 %s3077_s18, 3  ;;  %3425 = vmatprep.subr.bf16.mxu1 %v4013_v0  ;;  %3561 = vmatprep.subr.bf16.mxu0 %v4114_v1  ;;  %v4017_v2 = vld [vmem:[%s4973_s1] sm:$0xff]   ;;  %v4128_v3 = vld [vmem:[%s4973_s1 + $0x28] sm:$0xff]   ;;  %vm1373_vm1 = vsmask.f32 6400  ;;  %v4217_v56 = vld [vmem:[%s4973_s1 + $0x30] sm:$0xff]  }
  0x10   : > { %s3078_s22 = sshll.u32 %s205_s21, 2  ;;  %3426 = vmatpush3.bf16.msra.mxu1 %v4013_v0  ;;  %3562 = vmatpush3.bf16.msra.mxu0 %v4114_v1  ;;  %vm1701_vm3 = vcmask 1045504   ;;  %vm2201_vm4 = vsmask.f32 5376  ;;  %vm873_vm5 = vcmask 1046528   ;;  %vm2529_vm6 = vcmask 1044480  }
  0x11   : > { %s4120_s25 = scalar_lea.vmem %s4972_s0, %s3078_s22  ;;  %3459 = vmatprep.subr.bf16.mxu1 %v4017_v2  ;;  %3595 = vmatprep.subr.bf16.mxu0 %v4128_v3  ;;  %s3075_s17 = sshll.u32 %s4057_s12, 5 }
  0x12   : > { %v4132_v4 = vld [vmem:[%s4120_s25] sm:$0xff]   ;;  %v4135_v5 = vld [vmem:[%s4120_s25 + $0x8] sm:$0xff]   ;;  %v4139_v6 = vld [vmem:[%s4120_s25 + $0x10] sm:$0xff]   ;;  %p195_p4 = scmp.lt.s32.totalorder %s3075_s17, 95 }
  0x13   : > { %v307_v7 = vshrl.u32 %v4132_v4, 16  ;;  %v309_v8 = vshll.u32 %v4132_v4, 16  ;;  %v314_v9 = vshll.u32 %v4135_v5, 16  ;;  %v318_v10 = vshrl.u32 %v4135_v5, 16  ;;  %v4155_v20 = vld [vmem:[%s4120_s25 + $0x18] sm:$0xff]   ;;  %v4158_v24 = vld [vmem:[%s4120_s25 + $0x20] sm:$0xff]  }
  0x14   : > { %v4146_v11 = vshll.u32 %v4139_v6, 16  ;;  %v4149_v12 = vshrl.u32 %v4139_v6, 16  ;;  %v4161_v26 = vshll.u32 %v4155_v20, 16  ;;  %v4164_v27 = vshrl.u32 %v4155_v20, 16  ;;  %v4168_v29 = vld [vmem:[%s4120_s25 + $0x28] sm:$0xff]   ;;  %v4171_v30 = vld [vmem:[%s4120_s25 + $0x30] sm:$0xff]  }
  0x15   : > { %v311_v13 = vrot.slane %v309_v8, 1  ;;  %v316_v14 = vrot.slane %v314_v9, 1  ;;  %v1374_v15 = vrot.slane %v318_v10, 1  ;;  %v1375_v16 = vrot.slane %v314_v9, 2  ;;  %v4187_v39 = vld [vmem:[%s4120_s25 + $0x38] sm:$0xff]   ;;  %v4203_v48 = vld [vmem:[%s4120_s25 + $0x40] sm:$0xff]  }
  0x16   : > { %v1377_v17 = vrot.slane %v4149_v12, 1  ;;  %v1378_v18 = vrot.slane %v4146_v11, 2  ;;  %v324_v19 = vrot.slane %v4146_v11, 1  ;;  %v4176_v33 = vshll.u32 %v4158_v24, 16  ;;  %s5000_s17 = smov (!%p195_p4, %s3075_s17), 95 }
  0x17   : > { %v312_v21 = vor.u32 %v311_v13, %v307_v7  ;;  %v320_v22 = vor.u32 %v318_v10, %v316_v14  ;;  %v1376_v23 = vor.u32 %v1375_v16, %v1374_v15  ;;  %v4179_v34 = vshrl.u32 %v4158_v24, 16  ;;  %v4249_v15 = vld [vmem:[%s4120_s25 + $0x48] sm:$0xff]   ;;  %s3076_s20 = sshll.u32 %s5000_s17, 3 }
  0x18   : > { %v1379_v25 = vor.u32 %v1378_v18, %v1377_v17  ;;  %v328_v28 = vor.u32 %v4149_v12, %v324_v19  ;;  %v1381_v36 = vrot.slane %v4164_v27, 1  ;;  %v1382_v37 = vrot.slane %v4161_v26, 2  ;;  %s4891_s22 = scalar_lea.vmem %s4975_s3, %s3076_s20 }
  0x19   : > { %v317_v31 = vsel %vm305_vm0, %v312_v21, %v316_v14  ;;  %v325_v32 = vsel %vm305_vm0, %v320_v22, %v324_v19  ;;  %v332_v38 = vrot.slane %v4161_v26, 1  ;;  %v1385_v40 = vrot.slane %v4179_v34, 1 }
  0x1a   : > { %3427 = vmatprep.mubr.msk.bf16.mxu1 %vm444_vm2, %v317_v31  ;;  %v1380_v35 = vsel %vm1373_vm1, %v1376_v23, %v1379_v25  ;;  %v1386_v41 = vrot.slane %v4176_v33, 2  ;;  %v340_v42 = vrot.slane %v4176_v33, 1  ;;  %v4195_v43 = vshll.u32 %v4168_v29, 16 }
  0x1b   : > { %3563 = vmatprep.mubr.msk.bf16.mxu0 %vm444_vm2, %v1380_v35  ;;  %3428 = vmatmul.mubr.msk.bf16.vlgmr.msra.gmra.mrb[0].mxu1 %vm444_vm2, %v325_v32  ;;  %v1383_v44 = vor.u32 %v1382_v37, %v1381_v36  ;;  %v333_v45 = vsel %vm305_vm0, %v328_v28, %v332_v38  ;;  %v336_v46 = vor.u32 %v4164_v27, %v332_v38  ;;  %v4200_v47 = vshrl.u32 %v4168_v29, 16  ;;  %v4271_v36 = vld [vmem:[%s4973_s1 + $0x10] sm:$0xff]  }
  0x1c   : > { %3460 = vmatpush3.bf16.msra.mxu1 %v4017_v2  ;;  %3431 = vmatprep.mubr.msk.bf16.mxu1 %vm444_vm2, %v333_v45  ;;  %v1387_v49 = vor.u32 %v1386_v41, %v1385_v40  ;;  %v1390_v50 = vrot.slane %v4195_v43, 2  ;;  %v344_v51 = vor.u32 %v4179_v34, %v340_v42  ;;  %v348_v52 = vrot.slane %v4195_v43, 1  ;;  %v4276_v38 = vld [vmem:[%s4120_s25 + $0x50] sm:$0xff]  }
  0x1d   : > { %v1384_v53 = vsel %vm1373_vm1, %v1379_v25, %v1383_v44  ;;  %v1389_v54 = vrot.slane %v4200_v47, 1  ;;  %v4212_v55 = vshll.u32 %v4171_v30, 16  ;;  %v341_v58 = vsel %vm305_vm0, %v336_v46, %v340_v42  ;;  %3493 = vmatprep.subr.bf16.mxu1 %v4271_v36 }
  0x1e   : > { %3564 = vmatmul.mubr.msk.bf16.vlgmr.msra.gmra.mrb[0].mxu0 %vm444_vm2, %v1384_v53  ;;  %v1388_v57 = vsel %vm1373_vm1, %v1383_v44, %v1387_v49  ;;  %v4223_v59 = vshrl.u32 %v4171_v30, 16  ;;  %v349_v61 = vsel %vm305_vm0, %v344_v51, %v348_v52  ;;  %v4230_v63 = vshll.u32 %v4187_v39, 16 }
  0x1f   : > { %3596 = vmatpush3.bf16.msra.mxu0 %v4128_v3  ;;  %3567 = vmatprep.mubr.msk.bf16.mxu0 %vm444_vm2, %v1388_v57  ;;  %v1391_v60 = vor.u32 %v1390_v50, %v1389_v54  ;;  %v1394_v62 = vrot.slane %v4212_v55, 2  ;;  %v4234_v2 = vshrl.u32 %v4187_v39, 16  ;;  %v4237_v7 = vshll.u32 %v4203_v48, 16  ;;  %v4288_v50 = vld [vmem:[%s4120_s25 + $0x58] sm:$0xff]  }
  0x20   : > { %v1393_v0 = vrot.slane %v4223_v59, 1  ;;  %v4240_v3 = vshrl.u32 %v4203_v48, 16  ;;  %3629 = vmatprep.subr.bf16.mxu0 %v4217_v56  ;;  %v352_v8 = vor.u32 %v4200_v47, %v348_v52  ;;  %v356_v13 = vrot.slane %v4212_v55, 1 }
  0x21   : > { %v1392_v9 = vsel %vm1373_vm1, %v1387_v49, %v1391_v60  ;;  %v1398_v14 = vrot.slane %v4230_v63, 2  ;;  %v1397_v16 = vrot.slane %v4234_v2, 1  ;;  %v364_v17 = vrot.slane %v4230_v63, 1 }
  0x22   : > { %v1395_v10 = vor.u32 %v1394_v62, %v1393_v0  ;;  %v1401_v18 = vrot.slane %v4240_v3, 1  ;;  %v1402_v19 = vrot.slane %v4237_v7, 2  ;;  %v360_v22 = vor.u32 %v4223_v59, %v356_v13  ;;  %v4308_v62 = vld [vmem:[%s4120_s25 + $0x60] sm:$0xff]  }
  0x23   : > { %3432 = vmatmul.mubr.msk.bf16.gmra.mrb[4].mxu1 %vm444_vm2, %v341_v58  ;;  %v357_v23 = vsel %vm305_vm0, %v352_v8, %v356_v13  ;;  %v1399_v25 = vor.u32 %v1398_v14, %v1397_v16  ;;  %v4262_v28 = vshll.u32 %v4249_v15, 16  ;;  %v4265_v31 = vshrl.u32 %v4249_v15, 16 }
  0x24   : > { %3435 = vmatprep.mubr.msk.bf16.mxu1 %vm444_vm2, %v349_v61  ;;  %v1396_v21 = vsel %vm1373_vm1, %v1391_v60, %v1395_v10  ;;  %v365_v32 = vsel %vm305_vm0, %v360_v22, %v364_v17  ;;  %v1403_v35 = vor.u32 %v1402_v19, %v1401_v18  ;;  %v372_v37 = vrot.slane %v4237_v7, 1 }
  0x25   : > { %v1400_v40 = vsel %vm1373_vm1, %v1395_v10, %v1399_v25  ;;  %v368_v41 = vor.u32 %v4234_v2, %v364_v17  ;;  %v1405_v42 = vrot.slane %v4265_v31, 1  ;;  %v1406_v44 = vrot.slane %v4262_v28, 2  ;;  %v4317_v10 = vld [vmem:[%s4120_s25 + $0x68] sm:$0xff]  }
  0x26   : > { %3568 = vmatmul.mubr.msk.bf16.gmra.mrb[4].mxu0 %vm444_vm2, %v1392_v9  ;;  %v1404_v45 = vsel %vm1373_vm1, %v1399_v25, %v1403_v35  ;;  %v376_v46 = vor.u32 %v4240_v3, %v372_v37  ;;  %v380_v49 = vrot.slane %v4262_v28, 1  ;;  %v4292_v51 = vshll.u32 %v4276_v38, 16 }
  0x27   : > { %3571 = vmatprep.mubr.msk.bf16.mxu0 %vm444_vm2, %v1396_v21  ;;  %v373_v52 = vsel %vm305_vm0, %v368_v41, %v372_v37  ;;  %v4296_v53 = vor.u32 %v1406_v44, %v1405_v42  ;;  %v1702_v54 = vrot.slane %v4135_v5, 2  ;;  %v1703_v58 = vrot.slane %v4139_v6, 2  ;;  %v242_v37 = vld [vmem:[%s4120_s25 + $0x84] sm:$0xf]  ;;  %v4345_v42 = vld [vmem:[%s4120_s25 + $0x70] sm:$0xff]   ;;  %v4349_v44 = vld [vmem:[%s4120_s25 + $0x78] sm:$0xff]  }
  0x28   : > { %v381_v57 = vsel %vm305_vm0, %v376_v46, %v380_v49  ;;  %v4302_v60 = vshrl.u32 %v4276_v38, 16  ;;  %v4305_v61 = vshll.u32 %v4288_v50, 16  ;;  %v388_v0 = vrot.slane %v4292_v51, 1  ;;  %v244_v46 = vld [vmem:[%s4120_s25 + $0x8c] sm:$0xf] }
  0x29   : > { %4985 = vst [vmem:[#allocation2_spill] sm:$0xff] %v4296_v53  ;;  %v1408_v8 = vsel %vm1373_vm1, %v1403_v35, %v4296_v53  ;;  %v384_v9 = vor.u32 %v4265_v31, %v380_v49  ;;  %v1704_v13 = vsel %vm1701_vm3, %v1702_v54, %v1703_v58  ;;  %v4323_v17 = vshrl.u32 %v4288_v50, 16 }
  0x2a   : > { %v392_v14 = vor.u32 %v4302_v60, %v388_v0  ;;  %v396_v16 = vrot.slane %v4305_v61, 1  ;;  %v4326_v18 = vshll.u32 %v4308_v62, 16  ;;  %v1705_v21 = vrot.slane %v4155_v20, 2 }
  0x2b   : > { %3436 = vmatmul.mubr.msk.bf16.gmra.mrb[8].mxu1 %vm444_vm2, %v357_v23  ;;  %v389_v19 = vsel %vm305_vm0, %v384_v9, %v388_v0  ;;  %v4333_v22 = vshrl.u32 %v4308_v62, 16  ;;  %v4336_v23 = vshll.u32 %v4317_v10, 16  ;;  %v1709_v35 = vrot.slane %v4168_v29, 2 }
  0x2c   : > { %3439 = vmatprep.mubr.msk.bf16.mxu1 %vm444_vm2, %v365_v32  ;;  %4986 = vst [vmem:[#allocation3_spill] sm:$0xff] %v4326_v18  ;;  %v397_v25 = vsel %vm305_vm0, %v392_v14, %v396_v16  ;;  %v1707_v32 = vrot.slane %v4158_v24, 2  ;;  %v404_v41 = vrot.slane %v4326_v18, 1  ;;  %v4354_v49 = vsel %vm1701_vm3, %v1703_v58, %v1705_v21  ;;  %v4372_v58 = vld [vmem:[%s4120_s25 + $0x88] sm:$0xf]  ;;  %v4377_v14 = vld [vmem:[%s4973_s1 + $0x38] sm:$0xff]  }
  0x2d   : > { %4987 = vst [vmem:[#allocation4_spill] sm:$0xff] %v4336_v23  ;;  %v412_v54 = vrot.slane %v4336_v23, 1  ;;  %v1711_v9 = vrot.slane %v4171_v30, 2  ;;  %v2203_v53 = vrot.slane %v4146_v11, 3  ;;  %v2206_v18 = vrot.slane %v4161_v26, 3 }
  0x2e   : > { %3572 = vmatmul.mubr.msk.bf16.gmra.mrb[8].mxu0 %vm444_vm2, %v1400_v40  ;;  %v400_v40 = vor.u32 %v4323_v17, %v396_v16  ;;  %v4362_v0 = vsel %vm1701_vm3, %v1705_v21, %v1707_v32  ;;  %v4384_v21 = vshrl.u32 %v4345_v42, 16 }
  0x2f   : > { %3575 = vmatprep.mubr.msk.bf16.mxu0 %vm444_vm2, %v1404_v45  ;;  %v241_v45 = vld [vmem:[%s4120_s25 + $0x80] sm:$0xf] }
  0x30   : > { %v405_v16 = vsel %vm305_vm0, %v400_v40, %v404_v41  ;;  %v2205_v40 = vrot.slane %v4164_v27, 2  ;;  %v2210_v27 = vrot.slane %v4176_v33, 3  ;;  %v2214_v33 = vrot.slane %v4195_v43, 3 }
  0x31   : > { %v1713_v43 = vrot.slane %v4187_v39, 2 }
  0x32   : > { %v2207_v26 = vor.u32 %v2206_v18, %v2205_v40  ;;  %v2217_v18 = vrot.slane %v4223_v59, 2 }
  0x33   : > { %3440 = vmatmul.mubr.msk.bf16.gmra.mrb[12].mxu1 %vm444_vm2, %v373_v52  ;;  %v408_v52 = vor.u32 %v4333_v22, %v404_v41 }
  0x34   : > { %3443 = vmatprep.mubr.msk.bf16.mxu1 %vm444_vm2, %v381_v57  ;;  %v4359_v57 = vcombine.low %v241_v45, %v242_v37  ;;  %v2202_v37 = vrot.slane %v4149_v12, 2  ;;  %v2209_v12 = vrot.slane %v4179_v34, 2  ;;  %v2213_v34 = vrot.slane %v4200_v47, 2 }
  0x35   : > { %v413_v41 = vsel %vm305_vm0, %v408_v52, %v412_v54  ;;  %v2218_v47 = vrot.slane %v4212_v55, 3 }
  0x36   : > { %3576 = vmatmul.mubr.msk.bf16.gmra.mrb[12].mxu0 %vm444_vm2, %v1408_v8  ;;  %4988 = vst [vmem:[#allocation5_spill] sm:$0xff] %v4359_v57  ;;  %v4365_v8 = vsel %vm1701_vm3, %v1707_v32, %v1709_v35  ;;  %v4392_v32 = vshll.u32 %v4349_v44, 16  ;;  %v2204_v11 = vor.u32 %v2203_v53, %v2202_v37  ;;  %v2211_v37 = vor.u32 %v2210_v27, %v2209_v12 }
  0x37   : > { %3597 = vmatprep.mubr.msk.bf16.mxu0 %vm444_vm2, %v1704_v13  ;;  %v4369_v13 = vshrl.u32 %v4317_v10, 16  ;;  %v2215_v12 = vor.u32 %v2214_v33, %v2213_v34  ;;  %v4447_v27 = vshrl.u32 %v4349_v44, 16 }
  0x38   : > { %v4433_v40 = vsel %vm2201_vm4, %v2207_v26, %v2211_v37 }
  0x39   : > { %4989 = vst [vmem:[#allocation6_spill] sm:$0xff] %v4369_v13  ;;  %v416_v52 = vor.u32 %v4369_v13, %v412_v54  ;;  %v4425_v54 = vcombine.low %v241_v45, %v241_v45  ;;  %v4428_v13 = vsel %vm2201_vm4, %v2204_v11, %v2207_v26  ;;  %v4440_v45 = vsel %vm2201_vm4, %v2211_v37, %v2215_v12 }
  0x3a   : > { %v2221_v11 = vrot.slane %v4234_v2, 2  ;;  %v2222_v26 = vrot.slane %v4230_v63, 3  ;;  %v1715_v37 = vrot.slane %v4203_v48, 2 }
  0x3b   : > { %3444 = vmatmul.mubr.msk.bf16.gmra.mrb[16].mxu1 %vm444_vm2, %v389_v19  ;;  %v4381_v19 = vshll.u32 %v4345_v42, 16  ;;  %v434_v55 = vshll.u32 %v4425_v54, 16 }
  0x3c   : > { %3447 = vmatprep.mubr.msk.bf16.mxu1 %vm444_vm2, %v397_v25  ;;  %v4387_v25 = vcombine.low %v4372_v58, %v244_v46  ;;  %v4402_v46 = vrot.slane %v4359_v57, 2  ;;  %v2223_v2 = vor.u32 %v2222_v26, %v2221_v11  ;;  %v4468_v11 = vsel %vm1701_vm3, %v1713_v43, %v1715_v37 }
  0x3d   : > { %v420_v53 = vrot.slane %v4381_v19, 1  ;;  %v1721_v26 = vrot.slane %v4288_v50, 2 }
  0x3e   : > { %3598 = vmatmul.mubr.msk.bf16.vlgmr.msra.gmra.mrb[0].mxu0 %vm444_vm2, %v4354_v49  ;;  %v1989_v23 = vrot.slane %v4387_v25, 2 }
  0x3f   : > { %3630 = vmatpush3.bf16.msra.mxu0 %v4217_v56  ;;  %3601 = vmatprep.mubr.msk.bf16.mxu0 %vm444_vm2, %v4362_v0  ;;  %v4410_v56 = vsel %vm1701_vm3, %v1709_v35, %v1711_v9  ;;  %v428_v35 = vrot.slane %v4392_v32, 1  ;;  %v421_v59 = vsel %vm305_vm0, %v416_v52, %v420_v53  ;;  %v4460_v52 = vsel %vm1701_vm3, %v1711_v9, %v1713_v43 }
  0x40   : > { %3663 = vmatprep.subr.bf16.mxu0 %v4377_v14  ;;  %v4417_v57 = vsel %vm1701_vm3, %v4402_v46, %v1989_v23  ;;  %v2230_v9 = vrot.slane %v4262_v28, 3  ;;  %v1719_v43 = vrot.slane %v4276_v38, 2 }
  0x41   : > { %v432_v63 = vor.u32 %v4447_v27, %v428_v35 }
  0x43   : > { %3448 = vmatmul.mubr.msk.bf16.gmra.mrb[20].mxu1 %vm444_vm2, %v405_v16  ;;  %v424_v16 = vor.u32 %v4384_v21, %v420_v53  ;;  %v436_v53 = vrot.slane %v434_v55, 1 }
  0x44   : > { %3451 = vmatprep.mubr.msk.bf16.mxu1 %vm444_vm2, %v413_v41  ;;  %v2219_v41 = vor.u32 %v2218_v47, %v2217_v18  ;;  %v2225_v18 = vrot.slane %v4240_v3, 2  ;;  %v2226_v47 = vrot.slane %v4237_v7, 3  ;;  %v2229_v7 = vrot.slane %v4265_v31, 2 }
  0x45   : > { %v429_v34 = vsel %vm305_vm0, %v424_v16, %v428_v35  ;;  %v437_v35 = vsel %vm305_vm0, %v432_v63, %v436_v53  ;;  %v1727_v63 = vrot.slane %v4345_v42, 2 }
  0x46   : > { %3602 = vmatmul.mubr.msk.bf16.gmra.mrb[4].mxu0 %vm444_vm2, %v4365_v8  ;;  %v4454_v33 = vsel %vm2201_vm4, %v2215_v12, %v2219_v41  ;;  %v4465_v16 = vsel %vm2201_vm4, %v2219_v41, %v2223_v2  ;;  %v2227_v12 = vor.u32 %v2226_v47, %v2225_v18  ;;  %v1717_v41 = vrot.slane %v4249_v15, 2 }
  0x47   : > { %3605 = vmatprep.mubr.msk.bf16.mxu0 %vm444_vm2, %v4410_v56  ;;  %v1725_v47 = vrot.slane %v4317_v10, 2 }
  0x48   : > { %v4471_v3 = vsel %vm2201_vm4, %v2223_v2, %v2227_v12  ;;  %v1718_v31 = vsel %vm1701_vm3, %v1715_v37, %v1717_v41  ;;  %v1720_v28 = vsel %vm1701_vm3, %v1717_v41, %v1719_v43  ;;  %v4039_v2 = vld [vmem:[%s4973_s1 + $0x18] sm:$0xff]   ;;  %v1722_v37 = vsel %vm1701_vm3, %v1719_v43, %v1721_v26 }
  0x49   : > { %v1728_v53 = vsel %vm1701_vm3, %v1725_v47, %v1727_v63 }
  0x4b   : > { %3452 = vmatmul.mubr.msk.bf16.gmra.mrb[24].mxu1 %vm444_vm2, %v421_v59  ;;  %v4482_v59 = vor.u32 %v2230_v9, %v2229_v7  ;;  %v4527_v9 = vcombine.low %v4372_v58, %v4372_v58  ;;  %v4550_v58 = vld [vmem:[%s4973_s1 + $0x40] sm:$0xff]  }
  0x4c   : > { %3455 = vmatprep.mubr.msk.bf16.mxu1 %vm444_vm2, %v429_v34  ;;  %v1723_v34 = vrot.slane %v4308_v62, 2 }
  0x4d   : > { %v4487_v55 = vsel %vm2201_vm4, %v2227_v12, %v4482_v59  ;;  %v1729_v12 = vrot.slane %v4349_v44, 2  ;;  %v1733_v41 = vrot.slane %v4527_v9, 2 }
  0x4e   : > { %3606 = vmatmul.mubr.msk.bf16.gmra.mrb[8].mxu0 %vm444_vm2, %v4460_v52  ;;  %v1724_v18 = vsel %vm1701_vm3, %v1721_v26, %v1723_v34  ;;  %v887_v26 = vrot.slane %v4187_v39, 1 }
  0x4f   : > { %3609 = vmatprep.mubr.msk.bf16.mxu0 %vm444_vm2, %v4468_v11  ;;  %v1730_v7 = vsel %vm1701_vm3, %v1727_v63, %v1729_v12  ;;  %v1734_v43 = vsel %vm1701_vm3, %v4402_v46, %v1733_v41 }
  0x53   : > { %3456 = vmatmul.mubr.msk.bf16.gmra.mrb[28].mxu1 %vm444_vm2, %v437_v35  ;;  %v1732_v35 = vsel %vm1701_vm3, %v1729_v12, %v4402_v46  ;;  %v879_v46 = vrot.slane %v4155_v20, 1 }
  0x54   : > { %3461 = vmatprep.mubr.msk.bf16.mxu1 %vm444_vm2, %v4132_v4 }
  0x56   : > { %3610 = vmatmul.mubr.msk.bf16.gmra.mrb[12].mxu0 %vm444_vm2, %v1718_v31 }
  0x57   : > { %3613 = vmatprep.mubr.msk.bf16.mxu0 %vm444_vm2, %v1720_v28 }
  0x5b   : > { %3462 = vmatmul.mubr.msk.bf16.vlgmr.msra.gmra.mrb[0].mxu1 %vm444_vm2, %v4135_v5 }
  0x5c   : > { %3494 = vmatpush3.bf16.msra.mxu1 %v4271_v36  ;;  %3465 = vmatprep.mubr.msk.bf16.mxu1 %vm444_vm2, %v4139_v6  ;;  %v1726_v36 = vsel %vm1701_vm3, %v1723_v34, %v1725_v47  ;;  %v891_v47 = vrot.slane %v4249_v15, 1 }
  0x5d   : > { %3527 = vmatprep.subr.bf16.mxu1 %v4039_v2 }
  0x5e   : > { %3614 = vmatmul.mubr.msk.bf16.gmra.mrb[16].mxu0 %vm444_vm2, %v1722_v37 }
  0x5f   : > { %3617 = vmatprep.mubr.msk.bf16.mxu0 %vm444_vm2, %v1724_v18 }
  0x63   : > { %3466 = vmatmul.mubr.msk.bf16.gmra.mrb[4].mxu1 %vm444_vm2, %v4155_v20 }
  0x64   : > { %3469 = vmatprep.mubr.msk.bf16.mxu1 %vm444_vm2, %v4158_v24 }
  0x66   : > { %3618 = vmatmul.mubr.msk.bf16.gmra.mrb[20].mxu0 %vm444_vm2, %v1726_v36 }
  0x67   : > { %3621 = vmatprep.mubr.msk.bf16.mxu0 %vm444_vm2, %v1728_v53 }
  0x6b   : > { %3470 = vmatmul.mubr.msk.bf16.gmra.mrb[8].mxu1 %vm444_vm2, %v4168_v29 }
  0x6c   : > { %3473 = vmatprep.mubr.msk.bf16.mxu1 %vm444_vm2, %v4171_v30 }
  0x6e   : > { %3622 = vmatmul.mubr.msk.bf16.gmra.mrb[24].mxu0 %vm444_vm2, %v1730_v7 }
  0x6f   : > { %3625 = vmatprep.mubr.msk.bf16.mxu0 %vm444_vm2, %v1732_v35 }
  0x73   : > { %3474 = vmatmul.mubr.msk.bf16.gmra.mrb[12].mxu1 %vm444_vm2, %v4187_v39 }
  0x74   : > { %3477 = vmatprep.mubr.msk.bf16.mxu1 %vm444_vm2, %v4203_v48 }
  0x76   : > { %3626 = vmatmul.mubr.msk.bf16.gmra.mrb[28].mxu0 %vm444_vm2, %v1734_v43  ;;  %v899_v43 = vrot.slane %v4317_v10, 1 }
  0x77   : > { %3631 = vmatprep.mubr.msk.bf16.mxu0 %vm444_vm2, %v4354_v49  ;;  %v874_v49 = vrot.slane %v4132_v4, 1 }
  0x7b   : > { %3478 = vmatmul.mubr.msk.bf16.gmra.mrb[16].mxu1 %vm444_vm2, %v4249_v15 }
  0x7c   : > { %3481 = vmatprep.mubr.msk.bf16.mxu1 %vm444_vm2, %v4276_v38 }
  0x7e   : > { %3632 = vmatmul.mubr.msk.bf16.vlgmr.msra.gmra.mrb[0].mxu0 %vm444_vm2, %v4362_v0  ;;  %v875_v0 = vrot.slane %v4135_v5, 1 }
  0x7f   : > { %3664 = vmatpush3.bf16.msra.mxu0 %v4377_v14  ;;  %3635 = vmatprep.mubr.msk.bf16.mxu0 %vm444_vm2, %v4365_v8  ;;  %v877_v14 = vrot.slane %v4139_v6, 1 }
  0x80   : > { %3697 = vmatprep.subr.bf16.mxu0 %v4550_v58  ;;  %v876_v8 = vsel %vm873_vm5, %v874_v49, %v875_v0 }
  0x81   : > { %v4584_v4 = vsel %vm873_vm5, %v875_v0, %v877_v14  ;;  %v4587_v5 = vsel %vm873_vm5, %v877_v14, %v879_v46  ;;  %v901_v0 = vrot.slane %v4345_v42, 1  ;;  %v2234_v14 = vrot.slane %v4292_v51, 3 }
  0x83   : > { %3482 = vmatmul.mubr.msk.bf16.gmra.mrb[20].mxu1 %vm444_vm2, %v4288_v50 }
  0x84   : > { %3485 = vmatprep.mubr.msk.bf16.mxu1 %vm444_vm2, %v4308_v62 }
  0x86   : > { %3636 = vmatmul.mubr.msk.bf16.gmra.mrb[4].mxu0 %vm444_vm2, %v4410_v56  ;;  %v881_v56 = vrot.slane %v4158_v24, 1 }
  0x87   : > { %3639 = vmatprep.mubr.msk.bf16.mxu0 %vm444_vm2, %v4460_v52  ;;  %v883_v52 = vrot.slane %v4168_v29, 1 }
  0x8b   : > { %3486 = vmatmul.mubr.msk.bf16.gmra.mrb[24].mxu1 %vm444_vm2, %v4317_v10 }
  0x8c   : > { %3489 = vmatprep.mubr.msk.bf16.mxu1 %vm444_vm2, %v4345_v42 }
  0x8e   : > { %3640 = vmatmul.mubr.msk.bf16.gmra.mrb[8].mxu0 %vm444_vm2, %v4468_v11  ;;  %v4599_v11 = vsel %vm873_vm5, %v879_v46, %v881_v56  ;;  %v2238_v46 = vrot.slane %v4305_v61, 3 }
  0x8f   : > { %3643 = vmatprep.mubr.msk.bf16.mxu0 %vm444_vm2, %v1718_v31  ;;  %v4602_v31 = vsel %vm873_vm5, %v881_v56, %v883_v52 }
  0x93   : > { %3490 = vmatmul.mubr.msk.bf16.gmra.mrb[28].mxu1 %vm444_vm2, %v4349_v44 }
  0x94   : > { %3495 = vmatprep.mubr.msk.bf16.mxu1 %vm444_vm2, %v876_v8  ;;  %v905_v8 = vrot.slane %v4425_v54, 1 }
  0x96   : > { %3644 = vmatmul.mubr.msk.bf16.gmra.mrb[12].mxu0 %vm444_vm2, %v1720_v28  ;;  %v885_v28 = vrot.slane %v4171_v30, 1 }
  0x97   : > { %3647 = vmatprep.mubr.msk.bf16.mxu0 %vm444_vm2, %v1722_v37  ;;  %v889_v37 = vrot.slane %v4203_v48, 1 }
  0x98   : > { %v4613_v34 = vsel %vm873_vm5, %v883_v52, %v885_v28 }
  0x99   : > { %v4631_v63 = vsel %vm873_vm5, %v887_v26, %v889_v37 }
  0x9b   : > { %3496 = vmatmul.mubr.msk.bf16.vlgmr.msra.gmra.mrb[0].mxu1 %vm444_vm2, %v4584_v4 }
  0x9c   : > { %3528 = vmatpush3.bf16.msra.mxu1 %v4039_v2  ;;  %3499 = vmatprep.mubr.msk.bf16.mxu1 %vm444_vm2, %v4587_v5  ;;  %v4616_v2 = vsel %vm873_vm5, %v885_v28, %v887_v26  ;;  %v2241_v26 = vrot.slane %v4333_v22, 2 }
  0x9d   : > { %3731 = vmatprep.subr.bf16.mxu1 %v4114_v1 }
  0x9e   : > { %3648 = vmatmul.mubr.msk.bf16.gmra.mrb[16].mxu0 %vm444_vm2, %v1724_v18  ;;  %v4624_v18 = vld [vmem:[%s4120_s25 + $0x90] ss:$0 sps:$4 sm:$0xff]  }
  0x9f   : > { %3651 = vmatprep.mubr.msk.bf16.mxu0 %vm444_vm2, %v1726_v36  ;;  %v1991_v36 = vrot.slane %v4624_v18, 2 }
  0xa1   : > { %v1992_v12 = vsel %vm1701_vm3, %v1989_v23, %v1991_v36  ;;  %v897_v23 = vrot.slane %v4308_v62, 1 }
  0xa3   : > { %3500 = vmatmul.mubr.msk.bf16.gmra.mrb[4].mxu1 %vm444_vm2, %v4599_v11  ;;  %v4670_v49 = vsel %vm873_vm5, %v897_v23, %v899_v43 }
  0xa4   : > { %3503 = vmatprep.mubr.msk.bf16.mxu1 %vm444_vm2, %v4602_v31 }
  0xa6   : > { %3652 = vmatmul.mubr.msk.bf16.gmra.mrb[20].mxu0 %vm444_vm2, %v1728_v53  ;;  %v4635_v53 = vsel %vm873_vm5, %v889_v37, %v891_v47  ;;  %v4990_v37 = vld [vmem:[#allocation3_spill] sm:$0xff] }
  0xa7   : > { %3655 = vmatprep.mubr.msk.bf16.mxu0 %vm444_vm2, %v1730_v7  ;;  %v895_v7 = vrot.slane %v4288_v50, 1 }
  0xab   : > { %3504 = vmatmul.mubr.msk.bf16.gmra.mrb[8].mxu1 %vm444_vm2, %v4613_v34 }
  0xac   : > { %3507 = vmatprep.mubr.msk.bf16.mxu1 %vm444_vm2, %v4616_v2 }
  0xae   : > { %3656 = vmatmul.mubr.msk.bf16.gmra.mrb[24].mxu0 %vm444_vm2, %v1732_v35 }
  0xaf   : > { %3659 = vmatprep.mubr.msk.bf16.mxu0 %vm444_vm2, %v4417_v57  ;;  %v893_v57 = vrot.slane %v4276_v38, 1 }
  0xb1   : > { %v4650_v35 = vsel %vm873_vm5, %v891_v47, %v893_v57  ;;  %v4653_v41 = vsel %vm873_vm5, %v893_v57, %v895_v7 }
  0xb3   : > { %3508 = vmatmul.mubr.msk.bf16.gmra.mrb[12].mxu1 %vm444_vm2, %v4631_v63 }
  0xb4   : > { %3511 = vmatprep.mubr.msk.bf16.mxu1 %vm444_vm2, %v4635_v53 }
  0xb6   : > { %3660 = vmatmul.mubr.msk.bf16.gmra.mrb[28].mxu0 %vm444_vm2, %v1992_v12  ;;  %v4992_v12 = vld [vmem:[#allocation4_spill] sm:$0xff] }
  0xb7   : > { %3665 = vmatprep.mubr.msk.bf16.mxu0 %vm444_vm2, %v4428_v13  ;;  %v4667_v13 = vsel %vm873_vm5, %v895_v7, %v897_v23  ;;  %v2246_v57 = vrot.slane %v4992_v12, 3 }
  0xbb   : > { %3512 = vmatmul.mubr.msk.bf16.gmra.mrb[16].mxu1 %vm444_vm2, %v4650_v35 }
  0xbc   : > { %3515 = vmatprep.mubr.msk.bf16.mxu1 %vm444_vm2, %v4653_v41 }
  0xbe   : > { %3666 = vmatmul.mubr.msk.bf16.vlgmr.msra.gmra.mrb[0].mxu0 %vm444_vm2, %v4433_v40  ;;  %v4678_v40 = vrot.slane %v4349_v44, 1 }
  0xbf   : > { %3698 = vmatpush3.bf16.msra.mxu0 %v4550_v58  ;;  %3669 = vmatprep.mubr.msk.bf16.mxu0 %vm444_vm2, %v4440_v45  ;;  %v4685_v45 = vsel %vm873_vm5, %v899_v43, %v901_v0  ;;  %v2250_v43 = vrot.slane %v4381_v19, 3 }
  0xc0   : > { %v4689_v58 = vsel %vm873_vm5, %v901_v0, %v4678_v40  ;;  %v906_v56 = vsel %vm873_vm5, %v4678_v40, %v905_v8  ;;  %v2253_v8 = vrot.slane %v4447_v27, 2 }
  0xc3   : > { %3516 = vmatmul.mubr.msk.bf16.gmra.mrb[20].mxu1 %vm444_vm2, %v4667_v13 }
  0xc4   : > { %3519 = vmatprep.mubr.msk.bf16.mxu1 %vm444_vm2, %v4670_v49 }
  0xc6   : > { %3670 = vmatmul.mubr.msk.bf16.gmra.mrb[4].mxu0 %vm444_vm2, %v4454_v33  ;;  %v2233_v33 = vrot.slane %v4302_v60, 2 }
  0xc7   : > { %3673 = vmatprep.mubr.msk.bf16.mxu0 %vm444_vm2, %v4465_v16  ;;  %v2237_v16 = vrot.slane %v4323_v17, 2 }
  0xc8   : > { %v2235_v52 = vor.u32 %v2234_v14, %v2233_v33  ;;  %v2254_v33 = vrot.slane %v4392_v32, 3 }
  0xc9   : > { %v2239_v28 = vor.u32 %v2238_v46, %v2237_v16  ;;  %v2262_v46 = vshrl.u32 %v4387_v25, 16 }
  0xca   : > { %v2236_v54 = vsel %vm2201_vm4, %v4482_v59, %v2235_v52 }
  0xcb   : > { %3520 = vmatmul.mubr.msk.bf16.gmra.mrb[24].mxu1 %vm444_vm2, %v4685_v45  ;;  %v2240_v47 = vsel %vm2201_vm4, %v2235_v52, %v2239_v28 }
  0xcc   : > { %3523 = vmatprep.mubr.msk.bf16.mxu1 %vm444_vm2, %v4689_v58 }
  0xce   : > { %3674 = vmatmul.mubr.msk.bf16.gmra.mrb[8].mxu0 %vm444_vm2, %v4471_v3  ;;  %v2242_v3 = vrot.slane %v4990_v37, 3 }
  0xcf   : > { %3677 = vmatprep.mubr.msk.bf16.mxu0 %vm444_vm2, %v4487_v55  ;;  %v4991_v55 = vld [vmem:[#allocation6_spill] sm:$0xff] }
  0xd0   : > { %v2245_v36 = vrot.slane %v4991_v55, 2  ;;  %v2243_v7 = vor.u32 %v2242_v3, %v2241_v26  ;;  %v2264_v3 = vrot.slane %v2262_v46, 2  ;;  %v1163_v46 = vrot.slane %v4527_v9, 1 }
  0xd2   : > { %v2247_v23 = vor.u32 %v2246_v57, %v2245_v36  ;;  %v2244_v59 = vsel %vm2201_vm4, %v2239_v28, %v2243_v7  ;;  %v2271_v36 = vshrl.u32 %v4624_v18, 16  ;;  %v2274_v57 = vshll.u32 %v4624_v18, 16 }
  0xd3   : > { %3524 = vmatmul.mubr.msk.bf16.gmra.mrb[28].mxu1 %vm444_vm2, %v906_v56  ;;  %v2265_v56 = vshll.u32 %v4387_v25, 16 }
  0xd4   : > { %3529 = vmatprep.mubr.msk.bf16.mxu1 %vm444_vm2, %v4584_v4  ;;  %v2249_v4 = vrot.slane %v4384_v21, 2  ;;  %v2248_v0 = vsel %vm2201_vm4, %v2243_v7, %v2247_v23 }
  0xd6   : > { %3678 = vmatmul.mubr.msk.bf16.gmra.mrb[12].mxu0 %vm444_vm2, %v2236_v54 }
  0xd7   : > { %3681 = vmatprep.mubr.msk.bf16.mxu0 %vm444_vm2, %v2240_v47  ;;  %v2267_v47 = vrot.slane %v2265_v56, 3 }
  0xdb   : > { %3530 = vmatmul.mubr.msk.bf16.vlgmr.msra.gmra.mrb[0].mxu1 %vm444_vm2, %v4587_v5  ;;  %v4993_v5 = vld [vmem:[#allocation5_spill] sm:$0xff] }
  0xdc   : > { %3732 = vmatpush3.bf16.msra.mxu1 %v4114_v1  ;;  %3533 = vmatprep.mubr.msk.bf16.mxu1 %vm444_vm2, %v4599_v11  ;;  %v2251_v1 = vor.u32 %v2250_v43, %v2249_v4  ;;  %v1434_v14 = vshrl.u32 %v4993_v5, 16  ;;  %v1437_v16 = vshll.u32 %v4993_v5, 16  ;;  %v2255_v11 = vor.u32 %v2254_v33, %v2253_v8 }
  0xdd   : > { %v2531_v8 = vrot.slane %v4155_v20, 3  ;;  %v2533_v33 = vrot.slane %v4158_v24, 3  ;;  %v2539_v24 = vrot.slane %v4187_v39, 3 }
  0xde   : > { %3682 = vmatmul.mubr.msk.bf16.gmra.mrb[16].mxu0 %vm444_vm2, %v2244_v59  ;;  %v2252_v52 = vsel %vm2201_vm4, %v2247_v23, %v2251_v1  ;;  %v2257_v28 = vrot.slane %v1434_v14, 2  ;;  %v2258_v54 = vrot.slane %v1437_v16, 3  ;;  %v2256_v26 = vsel %vm2201_vm4, %v2251_v1, %v2255_v11 }
  0xdf   : > { %3685 = vmatprep.mubr.msk.bf16.mxu0 %vm444_vm2, %v2248_v0  ;;  %v2273_v23 = vrot.slane %v2271_v36, 2  ;;  %v2276_v59 = vrot.slane %v2274_v57, 3  ;;  %v2530_v0 = vrot.slane %v4139_v6, 3  ;;  %v2535_v6 = vrot.slane %v4168_v29, 3 }
  0xe0   : > { %v2534_v20 = vsel %vm2529_vm6, %v2531_v8, %v2533_v33  ;;  %v1409_v1 = vrot.slane %v4302_v60, 1  ;;  %v1413_v60 = vrot.slane %v4323_v17, 1  ;;  %v2551_v36 = vrot.slane %v4317_v10, 3 }
  0xe1   : > { %v2277_v43 = vor.u32 %v2276_v59, %v2273_v23  ;;  %v1425_v57 = vrot.slane %v4384_v21, 1  ;;  %v2553_v21 = vrot.slane %v4345_v42, 3 }
  0xe3   : > { %3534 = vmatmul.mubr.msk.bf16.gmra.mrb[4].mxu1 %vm444_vm2, %v4602_v31  ;;  %v2259_v31 = vor.u32 %v2258_v54, %v2257_v28  ;;  %v2547_v28 = vrot.slane %v4288_v50, 3  ;;  %v1417_v54 = vrot.slane %v4333_v22, 1  ;;  %v1421_v22 = vrot.slane %v4991_v55, 1 }
  0xe4   : > { %3537 = vmatprep.mubr.msk.bf16.mxu1 %vm444_vm2, %v4613_v34  ;;  %v2268_v34 = vor.u32 %v2267_v47, %v2264_v3 }
  0xe5   : > { %v2260_v7 = vsel %vm2201_vm4, %v2255_v11, %v2259_v31  ;;  %v1410_v11 = vrot.slane %v4292_v51, 2  ;;  %v2545_v51 = vrot.slane %v4276_v38, 3 }
  0xe6   : > { %3686 = vmatmul.mubr.msk.bf16.gmra.mrb[20].mxu0 %vm444_vm2, %v2252_v52  ;;  %v2269_v4 = vsel %vm2201_vm4, %v2259_v31, %v2268_v34 }
  0xe7   : > { %3689 = vmatprep.mubr.msk.bf16.mxu0 %vm444_vm2, %v2256_v26  ;;  %v1411_v56 = vor.u32 %v1410_v11, %v1409_v1  ;;  %v1418_v26 = vrot.slane %v4990_v37, 2  ;;  %v2548_v17 = vsel %vm2529_vm6, %v2545_v51, %v2547_v28  ;;  %v1422_v37 = vrot.slane %v4992_v12, 2 }
  0xe8   : > { %v1430_v12 = vrot.slane %v4392_v32, 2  ;;  %v1446_v32 = vshll.u32 %v4527_v9, 16 }
  0xe9   : > { %v1419_v47 = vor.u32 %v1418_v26, %v1417_v54  ;;  %v1423_v23 = vor.u32 %v1422_v37, %v1421_v22 }
  0xeb   : > { %3538 = vmatmul.mubr.msk.bf16.gmra.mrb[8].mxu1 %vm444_vm2, %v4616_v2  ;;  %v2278_v2 = vsel %vm2201_vm4, %v2268_v34, %v2277_v43  ;;  %v1426_v34 = vrot.slane %v4381_v19, 2  ;;  %v1424_v10 = vsel %vm1373_vm1, %v1419_v47, %v1423_v23  ;;  %v1429_v19 = vrot.slane %v4447_v27, 1 }
  0xec   : > { %3541 = vmatprep.mubr.msk.bf16.mxu1 %vm444_vm2, %v4631_v63  ;;  %v2532_v63 = vsel %vm2529_vm6, %v2530_v0, %v2531_v8  ;;  %v1436_v43 = vrot.slane %v1434_v14, 1  ;;  %v1439_v0 = vrot.slane %v1437_v16, 2  ;;  %v2554_v8 = vsel %vm2529_vm6, %v2551_v36, %v2553_v21 }
  0xed   : > { %v1427_v55 = vor.u32 %v1426_v34, %v1425_v57  ;;  %v1431_v42 = vor.u32 %v1430_v12, %v1429_v19  ;;  %v1443_v27 = vshrl.u32 %v4527_v9, 16  ;;  %v2557_v16 = vrot.slane %v4993_v5, 3 }
  0xee   : > { %3690 = vmatmul.mubr.msk.bf16.gmra.mrb[24].mxu0 %vm444_vm2, %v2260_v7 }
  0xef   : > { %3693 = vmatprep.mubr.msk.bf16.mxu0 %vm444_vm2, %v2269_v4  ;;  %v1428_v59 = vsel %vm1373_vm1, %v1423_v23, %v1427_v55  ;;  %v2555_v4 = vrot.slane %v4349_v44, 3  ;;  %v1440_v44 = vor.u32 %v1439_v0, %v1436_v43  ;;  %v1432_v14 = vsel %vm1373_vm1, %v1427_v55, %v1431_v42 }
  0xf1   : > { %v2558_v9 = vsel %vm2529_vm6, %v2555_v4, %v2557_v16 }
  0xf3   : > { %3542 = vmatmul.mubr.msk.bf16.gmra.mrb[12].mxu1 %vm444_vm2, %v4635_v53  ;;  %v2536_v53 = vsel %vm2529_vm6, %v2533_v33, %v2535_v6  ;;  %v1448_v33 = vrot.slane %v1446_v32, 2 }
  0xf4   : > { %3545 = vmatprep.mubr.msk.bf16.mxu1 %vm444_vm2, %v4650_v35  ;;  %v2537_v35 = vrot.slane %v4171_v30, 3  ;;  %v2541_v30 = vrot.slane %v4203_v48, 3 }
  0xf6   : > { %3694 = vmatmul.mubr.msk.bf16.gmra.mrb[28].mxu0 %vm444_vm2, %v2278_v2  ;;  %v2538_v29 = vsel %vm2529_vm6, %v2535_v6, %v2537_v35  ;;  %v2556_v2 = vsel %vm2529_vm6, %v2553_v21, %v2555_v4  ;;  %v1441_v6 = vsel %vm1373_vm1, %v1431_v42, %v1440_v44 }
  0xf7   : > { %3699 = vmatprep.mubr.msk.bf16.mxu0 %vm444_vm2, %v2532_v63  ;;  %v1445_v63 = vrot.slane %v1443_v27, 1 }
  0xfb   : > { %3546 = vmatmul.mubr.msk.bf16.gmra.mrb[16].mxu1 %vm444_vm2, %v4653_v41  ;;  %v2540_v41 = vsel %vm2529_vm6, %v2537_v35, %v2539_v24 }
  0xfc   : > { %3549 = vmatprep.mubr.msk.bf16.mxu1 %vm444_vm2, %v4667_v13  ;;  %v1161_v13 = vrot.slane %v4993_v5, 1 }
  0xfe   : > { %3700 = vmatmul.mubr.msk.bf16.vlgmr.msra.gmra.mrb[0].mxu0 %vm444_vm2, %v2534_v20  ;;  %v1162_v39 = vsel %vm873_vm5, %v4678_v40, %v1161_v13  ;;  %v1414_v40 = vrot.slane %v4305_v61, 2  ;;  %v2549_v61 = vrot.slane %v4308_v62, 3  ;;  %v2559_v20 = vrot.slane %v4387_v25, 3 }
  0xff   : > { %3703 = vmatprep.mubr.msk.bf16.mxu0 %vm444_vm2, %v2536_v53  ;;  %v1449_v53 = vor.u32 %v1448_v33, %v1445_v63 }
 0x100   : > { %v1415_v38 = vor.u32 %v1414_v40, %v1413_v60  ;;  %v2550_v7 = vsel %vm2529_vm6, %v2547_v28, %v2549_v61  ;;  %v2552_v62 = vsel %vm2529_vm6, %v2549_v61, %v2551_v36  ;;  %v2560_v35 = vsel %vm2529_vm6, %v2557_v16, %v2559_v20 }
 0x101   : > { %v1450_v5 = vsel %vm1373_vm1, %v1440_v44, %v1449_v53 }
 0x102   : > { %v1416_v50 = vsel %vm1373_vm1, %v1411_v56, %v1415_v38  ;;  %v1420_v31 = vsel %vm1373_vm1, %v1415_v38, %v1419_v47 }
 0x103   : > { %3550 = vmatmul.mubr.msk.bf16.gmra.mrb[20].mxu1 %vm444_vm2, %v4670_v49  ;;  %v2543_v49 = vrot.slane %v4249_v15, 3  ;;  %v1164_v15 = vsel %vm873_vm5, %v1161_v13, %v1163_v46 }
 0x104   : > { %3553 = vmatprep.mubr.msk.bf16.mxu1 %vm444_vm2, %v4685_v45  ;;  %v2542_v45 = vsel %vm2529_vm6, %v2539_v24, %v2541_v30  ;;  %v2561_v24 = vrot.slane %v4624_v18, 3 }
 0x105   : > { %v2544_v48 = vsel %vm2529_vm6, %v2541_v30, %v2543_v49  ;;  %v2546_v3 = vsel %vm2529_vm6, %v2543_v49, %v2545_v51 }
 0x106   : > { %3704 = vmatmul.mubr.msk.bf16.gmra.mrb[4].mxu0 %vm444_vm2, %v2538_v29  ;;  %v2562_v25 = vsel %vm2529_vm6, %v2559_v20, %v2561_v24 }
 0x107   : > { %3707 = vmatprep.mubr.msk.bf16.mxu0 %vm444_vm2, %v2540_v41 }
 0x10b   : > { %3554 = vmatmul.mubr.msk.bf16.gmra.mrb[24].mxu1 %vm444_vm2, %v4689_v58  ;;  %v4994_v58 = vld [vmem:[#allocation2_spill] sm:$0xff] }
 0x10c   : > { %3557 = vmatprep.mubr.msk.bf16.mxu1 %vm444_vm2, %v1162_v39  ;;  %v1412_v52 = vsel %vm1373_vm1, %v4994_v58, %v1411_v56  ;;  %v4884_v58 = vld [vmem:[%s4974_s2] ss:$0 sm:$0xff] }
 0x10e   : > { %3708 = vmatmul.mubr.msk.bf16.gmra.mrb[8].mxu0 %vm444_vm2, %v2542_v45 }
 0x10f   : > { %3711 = vmatprep.mubr.msk.bf16.mxu0 %vm444_vm2, %v2544_v48 }
 0x113   : > { %3558 = vmatmul.mubr.msk.bf16.gmra.mrb[28].mxu1 %vm444_vm2, %v1164_v15 }
 0x114   : > { %3579 = vmatprep.mubr.msk.bf16.mxu1 %vm444_vm2, %v1412_v52 }
 0x116   : > { %3712 = vmatmul.mubr.msk.bf16.gmra.mrb[12].mxu0 %vm444_vm2, %v2546_v3 }
 0x117   : > { %3715 = vmatprep.mubr.msk.bf16.mxu0 %vm444_vm2, %v2548_v17 }
 0x11b   : > { %3580 = vmatmul.mubr.msk.bf16.vlgmr.msra.gmra.mrb[16].mxu1 %vm444_vm2, %v1416_v50 }
 0x11c   : > { %3583 = vmatprep.mubr.msk.bf16.mxu1 %vm444_vm2, %v1420_v31 }
 0x11e   : > { %3716 = vmatmul.mubr.msk.bf16.gmra.mrb[16].mxu0 %vm444_vm2, %v2550_v7 }
 0x11f   : > { %3719 = vmatprep.mubr.msk.bf16.mxu0 %vm444_vm2, %v2552_v62 }
 0x123   : > { %3584 = vmatmul.mubr.msk.bf16.gmra.mrb[20].mxu1 %vm444_vm2, %v1424_v10 }
 0x124   : > { %3587 = vmatprep.mubr.msk.bf16.mxu1 %vm444_vm2, %v1428_v59 }
 0x126   : > { %3720 = vmatmul.mubr.msk.bf16.gmra.mrb[20].mxu0 %vm444_vm2, %v2554_v8 }
 0x127   : > { %3723 = vmatprep.mubr.msk.bf16.mxu0 %vm444_vm2, %v2556_v2 }
 0x12b   : > { %3588 = vmatmul.mubr.msk.bf16.gmra.mrb[24].mxu1 %vm444_vm2, %v1432_v14 }
 0x12c   : > { %3591 = vmatprep.mubr.msk.bf16.mxu1 %vm444_vm2, %v1441_v6 }
 0x12e   : > { %3724 = vmatmul.mubr.msk.bf16.gmra.mrb[24].mxu0 %vm444_vm2, %v2558_v9 }
 0x12f   : > { %3727 = vmatprep.mubr.msk.bf16.mxu0 %vm444_vm2, %v2560_v35 }
 0x133   : > { %3592 = vmatmul.mubr.msk.bf16.gmra.mrb[28].mxu1 %vm444_vm2, %v1450_v5 }
 0x136   : > { %3728 = vmatmul.mubr.msk.bf16.gmra.mrb[28].mxu0 %vm444_vm2, %v2562_v25 }
 0x1ae   : > { %v3531_v29 = vpop.f32.mrb[0].mxu1 }
 0x1af   : > { %v1211_v41 = vpop.f32.mrb[1].mxu1 }
 0x1b0   : > { %v3532_v13 = vpop.f32.mrb[2].mxu1 }
 0x1b1   : > { %v1214_v30 = vpop.f32.mrb[3].mxu1 }
 0x1b6   : > { %v3535_v39 = vpop.f32.mrb[4].mxu1 }
 0x1b7   : > { %v1227_v49 = vpop.f32.mrb[5].mxu1 }
 0x1b8   : > { %v3536_v1 = vpop.f32.mrb[6].mxu1 }
 0x1b9   : > { %v1230_v11 = vpop.f32.mrb[7].mxu1 }
 0x1be   : > { %v4864_v45 = vpop.f32.mrb[8].mxu1 }
 0x1bf   : > { %v4866_v46 = vpop.f32.mrb[9].mxu1 }
 0x1c0   : > { %v4868_v18 = vpop.f32.mrb[10].mxu1 }
 0x1c1   : > { %v4870_v48 = vpop.f32.mrb[11].mxu1 }
 0x1c6   : > { %v4872_v56 = vpop.f32.mrb[12].mxu1 }
 0x1c7   : > { %v4874_v15 = vpop.f32.mrb[13].mxu1 }
 0x1c8   : > { %v4876_v51 = vpop.f32.mrb[14].mxu1 }
 0x1c9   : > { %v4878_v60 = vpop.f32.mrb[15].mxu1 }
 0x1d1   : > { %v3701_v40 = vpop.f32.mrb[0].mxu0 }
 0x1d2   : > { %v3733_v52 = vadd.f32 %v3701_v40, %v3531_v29  ;;  %v2651_v28 = vpop.f32.mrb[1].mxu0 }
 0x1d3   : > { %v3734_v54 = vadd.f32 %v2651_v28, %v1211_v41  ;;  %v3702_v26 = vpop.f32.mrb[2].mxu0 }
 0x1d4   : > { %v2819_v3 = vadd.f32 %v3733_v52, %v4884_v58  ;;  %v3735_v38 = vadd.f32 %v3702_v26, %v3532_v13  ;;  %v2654_v17 = vpop.f32.mrb[3].mxu0 }
 0x1d5   : > { %v2817_v47 = vadd.f32 %v3734_v54, %v4884_v58  ;;  %v3736_v50 = vadd.f32 %v2654_v17, %v1214_v30 }
 0x1d6   : > { %vm2851_vm7 = vcmp.ge.f32.partialorder %v2819_v3, 0.0  ;;  %v2883_v61 = vmul.f32 0.01, %v2819_v3  ;;  %v2820_v22 = vadd.f32 %v3735_v38, %v4884_v58 }
 0x1d7   : > { %vm2849_vm8 = vcmp.ge.f32.partialorder %v2817_v47, 0.0  ;;  %v2881_v37 = vmul.f32 0.01, %v2817_v47  ;;  %v2818_v31 = vadd.f32 %v3736_v50, %v4884_v58 }
 0x1d8   : > { %v2915_v36 = vsel %vm2851_vm7, %v2819_v3, %v2883_v61  ;;  %vm2852_vm9 = vcmp.ge.f32.partialorder %v2820_v22, 0.0  ;;  %v2884_v57 = vmul.f32 0.01, %v2820_v22 }
 0x1d9   : > { %2947 = vst [vmem:[%s4891_s22 + $0x10] sm:$0xff] %v2915_v36  ;;  %v2913_v34 = vsel %vm2849_vm8, %v2817_v47, %v2881_v37  ;;  %vm2850_vm10 = vcmp.ge.f32.partialorder %v2818_v31, 0.0  ;;  %v2882_v7 = vmul.f32 0.01, %v2818_v31  ;;  %v3705_v23 = vpop.f32.mrb[4].mxu0 }
 0x1da   : > { %2945 = vst [vmem:[%s4891_s22] sm:$0xff] %v2913_v34  ;;  %v2916_v62 = vsel %vm2852_vm9, %v2820_v22, %v2884_v57  ;;  %v3737_v55 = vadd.f32 %v3705_v23, %v3535_v39  ;;  %v2667_v10 = vpop.f32.mrb[5].mxu0 }
 0x1db   : > { %2948 = vst [vmem:[%s4891_s22 + $0x18] sm:$0xff] %v2916_v62  ;;  %v2914_v21 = vsel %vm2850_vm10, %v2818_v31, %v2882_v7  ;;  %v3738_v19 = vadd.f32 %v2667_v10, %v1227_v49  ;;  %v3706_v12 = vpop.f32.mrb[6].mxu0 }
 0x1dc   : > { %2946 = vst [vmem:[%s4891_s22 + $0x8] sm:$0xff] %v2914_v21  ;;  %v2823_v59 = vadd.f32 %v3737_v55, %v4884_v58  ;;  %v3739_v4 = vadd.f32 %v3706_v12, %v3536_v1  ;;  %v2670_v43 = vpop.f32.mrb[7].mxu0 }
 0x1dd   : > { %v2821_v0 = vadd.f32 %v3738_v19, %v4884_v58  ;;  %v3740_v8 = vadd.f32 %v2670_v43, %v1230_v11 }
 0x1de   : > { %vm2855_vm11 = vcmp.ge.f32.partialorder %v2823_v59, 0.0  ;;  %v2887_v42 = vmul.f32 0.01, %v2823_v59  ;;  %v2824_v27 = vadd.f32 %v3739_v4, %v4884_v58 }
 0x1df   : > { %vm2853_vm12 = vcmp.ge.f32.partialorder %v2821_v0, 0.0  ;;  %v2885_v32 = vmul.f32 0.01, %v2821_v0  ;;  %v2822_v2 = vadd.f32 %v3740_v8, %v4884_v58 }
 0x1e0   : > { %v2919_v44 = vsel %vm2855_vm11, %v2823_v59, %v2887_v42  ;;  %vm2856_vm13 = vcmp.ge.f32.partialorder %v2824_v27, 0.0  ;;  %v2888_v14 = vmul.f32 0.01, %v2824_v27 }
 0x1e1   : > { %2951 = vst [vmem:[%s4891_s22 + $0x30] sm:$0xff] %v2919_v44  ;;  %v2917_v16 = vsel %vm2853_vm12, %v2821_v0, %v2885_v32  ;;  %vm2854_vm14 = vcmp.ge.f32.partialorder %v2822_v2, 0.0  ;;  %v2886_v63 = vmul.f32 0.01, %v2822_v2  ;;  %v3709_v33 = vpop.f32.mrb[8].mxu0 }
 0x1e2   : > { %2949 = vst [vmem:[%s4891_s22 + $0x20] sm:$0xff] %v2917_v16  ;;  %v2920_v6 = vsel %vm2856_vm13, %v2824_v27, %v2888_v14  ;;  %v3741_v20 = vadd.f32 %v3709_v33, %v4864_v45  ;;  %v2683_v9 = vpop.f32.mrb[9].mxu0 }
 0x1e3   : > { %2952 = vst [vmem:[%s4891_s22 + $0x38] sm:$0xff] %v2920_v6  ;;  %v2918_v53 = vsel %vm2854_vm14, %v2822_v2, %v2886_v63  ;;  %v3742_v35 = vadd.f32 %v2683_v9, %v4866_v46  ;;  %v3710_v5 = vpop.f32.mrb[10].mxu0 }
 0x1e4   : > { %2950 = vst [vmem:[%s4891_s22 + $0x28] sm:$0xff] %v2918_v53  ;;  %v2827_v24 = vadd.f32 %v3741_v20, %v4884_v58  ;;  %v3743_v25 = vadd.f32 %v3710_v5, %v4868_v18  ;;  %v2686_v29 = vpop.f32.mrb[11].mxu0 }
 0x1e5   : > { %v2825_v41 = vadd.f32 %v3742_v35, %v4884_v58  ;;  %v3744_v13 = vadd.f32 %v2686_v29, %v4870_v48 }
 0x1e6   : > { %vm2859_vm15 = vcmp.ge.f32.partialorder %v2827_v24, 0.0  ;;  %v2891_v30 = vmul.f32 0.01, %v2827_v24  ;;  %v2828_v39 = vadd.f32 %v3743_v25, %v4884_v58 }
 0x1e7   : > { %vm2857_vm0 = vcmp.ge.f32.partialorder %v2825_v41, 0.0  ;;  %v2889_v49 = vmul.f32 0.01, %v2825_v41  ;;  %v2826_v1 = vadd.f32 %v3744_v13, %v4884_v58 }
 0x1e8   : > { %v2923_v11 = vsel %vm2859_vm15, %v2827_v24, %v2891_v30  ;;  %vm2860_vm1 = vcmp.ge.f32.partialorder %v2828_v39, 0.0  ;;  %v2892_v45 = vmul.f32 0.01, %v2828_v39 }
 0x1e9   : > { %2955 = vst [vmem:[%s4891_s22 + $0x50] sm:$0xff] %v2923_v11  ;;  %v2921_v46 = vsel %vm2857_vm0, %v2825_v41, %v2889_v49  ;;  %vm2858_vm2 = vcmp.ge.f32.partialorder %v2826_v1, 0.0  ;;  %v2890_v18 = vmul.f32 0.01, %v2826_v1  ;;  %v3713_v40 = vpop.f32.mrb[12].mxu0 }
 0x1ea   : > { %2953 = vst [vmem:[%s4891_s22 + $0x40] sm:$0xff] %v2921_v46  ;;  %v2924_v48 = vsel %vm2860_vm1, %v2828_v39, %v2892_v45  ;;  %v3745_v52 = vadd.f32 %v3713_v40, %v4872_v56  ;;  %v2699_v28 = vpop.f32.mrb[13].mxu0 }
 0x1eb   : > { %2956 = vst [vmem:[%s4891_s22 + $0x58] sm:$0xff] %v2924_v48  ;;  %v2922_v54 = vsel %vm2858_vm2, %v2826_v1, %v2890_v18  ;;  %v3746_v26 = vadd.f32 %v2699_v28, %v4874_v15  ;;  %v3714_v3 = vpop.f32.mrb[14].mxu0 }
 0x1ec   : > { %2954 = vst [vmem:[%s4891_s22 + $0x48] sm:$0xff] %v2922_v54  ;;  %v2831_v38 = vadd.f32 %v3745_v52, %v4884_v58  ;;  %v3747_v17 = vadd.f32 %v3714_v3, %v4876_v51  ;;  %v2702_v47 = vpop.f32.mrb[15].mxu0 }
 0x1ed   : > { %v2829_v50 = vadd.f32 %v3746_v26, %v4884_v58  ;;  %v3748_v61 = vadd.f32 %v2702_v47, %v4878_v60 }
 0x1ee   : > { %v3581_v22 = vpop.f32.mrb[16].mxu1  ;;  %vm2863_vm3 = vcmp.ge.f32.partialorder %v2831_v38, 0.0  ;;  %v2895_v56 = vmul.f32 0.01, %v2831_v38  ;;  %v2832_v37 = vadd.f32 %v3747_v17, %v4884_v58 }
 0x1ef   : > { %v1603_v31 = vpop.f32.mrb[17].mxu1  ;;  %vm2861_vm4 = vcmp.ge.f32.partialorder %v2829_v50, 0.0  ;;  %v2893_v15 = vmul.f32 0.01, %v2829_v50  ;;  %v2830_v36 = vadd.f32 %v3748_v61, %v4884_v58 }
 0x1f0   : > { %v3582_v57 = vpop.f32.mrb[18].mxu1  ;;  %v2927_v51 = vsel %vm2863_vm3, %v2831_v38, %v2895_v56  ;;  %vm2864_vm5 = vcmp.ge.f32.partialorder %v2832_v37, 0.0  ;;  %v2896_v34 = vmul.f32 0.01, %v2832_v37 }
 0x1f1   : > { %v1606_v7 = vpop.f32.mrb[19].mxu1  ;;  %2959 = vst [vmem:[%s4891_s22 + $0x70] sm:$0xff] %v2927_v51  ;;  %v2925_v60 = vsel %vm2861_vm4, %v2829_v50, %v2893_v15  ;;  %vm2862_vm6 = vcmp.ge.f32.partialorder %v2830_v36, 0.0  ;;  %v2894_v23 = vmul.f32 0.01, %v2830_v36  ;;  %v3717_v62 = vpop.f32.mrb[16].mxu0 }
 0x1f2   : > { %2957 = vst [vmem:[%s4891_s22 + $0x60] sm:$0xff] %v2925_v60  ;;  %v2928_v55 = vsel %vm2864_vm5, %v2832_v37, %v2896_v34  ;;  %v3749_v10 = vadd.f32 %v3717_v62, %v3581_v22  ;;  %v2715_v21 = vpop.f32.mrb[17].mxu0 }
 0x1f3   : > { %2960 = vst [vmem:[%s4891_s22 + $0x78] sm:$0xff] %v2928_v55  ;;  %v2926_v19 = vsel %vm2862_vm6, %v2830_v36, %v2894_v23  ;;  %v3750_v12 = vadd.f32 %v2715_v21, %v1603_v31  ;;  %v3718_v59 = vpop.f32.mrb[18].mxu0 }
 0x1f4   : > { %2958 = vst [vmem:[%s4891_s22 + $0x68] sm:$0xff] %v2926_v19  ;;  %v2835_v4 = vadd.f32 %v3749_v10, %v4884_v58  ;;  %v3751_v43 = vadd.f32 %v3718_v59, %v3582_v57  ;;  %v2718_v0 = vpop.f32.mrb[19].mxu0 }
 0x1f5   : > { %v2833_v8 = vadd.f32 %v3750_v12, %v4884_v58  ;;  %v3752_v42 = vadd.f32 %v2718_v0, %v1606_v7 }
 0x1f6   : > { %v3585_v27 = vpop.f32.mrb[20].mxu1  ;;  %vm2867_vm7 = vcmp.ge.f32.partialorder %v2835_v4, 0.0  ;;  %v2899_v32 = vmul.f32 0.01, %v2835_v4  ;;  %v2836_v2 = vadd.f32 %v3751_v43, %v4884_v58 }
 0x1f7   : > { %v1619_v44 = vpop.f32.mrb[21].mxu1  ;;  %vm2865_vm8 = vcmp.ge.f32.partialorder %v2833_v8, 0.0  ;;  %v2897_v14 = vmul.f32 0.01, %v2833_v8  ;;  %v2834_v16 = vadd.f32 %v3752_v42, %v4884_v58 }
 0x1f8   : > { %v3586_v63 = vpop.f32.mrb[22].mxu1  ;;  %v2931_v33 = vsel %vm2867_vm7, %v2835_v4, %v2899_v32  ;;  %vm2868_vm9 = vcmp.ge.f32.partialorder %v2836_v2, 0.0  ;;  %v2900_v6 = vmul.f32 0.01, %v2836_v2 }
 0x1f9   : > { %v1622_v20 = vpop.f32.mrb[23].mxu1  ;;  %2963 = vst [vmem:[%s4891_s22 + $0x90] sm:$0xff] %v2931_v33  ;;  %v2929_v9 = vsel %vm2865_vm8, %v2833_v8, %v2897_v14  ;;  %vm2866_vm10 = vcmp.ge.f32.partialorder %v2834_v16, 0.0  ;;  %v2898_v53 = vmul.f32 0.01, %v2834_v16  ;;  %v3721_v35 = vpop.f32.mrb[20].mxu0 }
 0x1fa   : > { %2961 = vst [vmem:[%s4891_s22 + $0x80] sm:$0xff] %v2929_v9  ;;  %v2932_v5 = vsel %vm2868_vm9, %v2836_v2, %v2900_v6  ;;  %v3753_v24 = vadd.f32 %v3721_v35, %v3585_v27  ;;  %v2731_v25 = vpop.f32.mrb[21].mxu0 }
 0x1fb   : > { %2964 = vst [vmem:[%s4891_s22 + $0x98] sm:$0xff] %v2932_v5  ;;  %v2930_v29 = vsel %vm2866_vm10, %v2834_v16, %v2898_v53  ;;  %v3754_v41 = vadd.f32 %v2731_v25, %v1619_v44  ;;  %v3722_v13 = vpop.f32.mrb[22].mxu0 }
 0x1fc   : > { %2962 = vst [vmem:[%s4891_s22 + $0x88] sm:$0xff] %v2930_v29  ;;  %v2839_v30 = vadd.f32 %v3753_v24, %v4884_v58  ;;  %v3755_v39 = vadd.f32 %v3722_v13, %v3586_v63  ;;  %v2734_v49 = vpop.f32.mrb[23].mxu0 }
 0x1fd   : > { %v2837_v1 = vadd.f32 %v3754_v41, %v4884_v58  ;;  %v3756_v11 = vadd.f32 %v2734_v49, %v1622_v20 }
 0x1fe   : > { %v3589_v45 = vpop.f32.mrb[24].mxu1  ;;  %vm2871_vm11 = vcmp.ge.f32.partialorder %v2839_v30, 0.0  ;;  %v2903_v46 = vmul.f32 0.01, %v2839_v30  ;;  %v2840_v18 = vadd.f32 %v3755_v39, %v4884_v58 }
 0x1ff   : > { %v1635_v40 = vpop.f32.mrb[25].mxu1  ;;  %vm2869_vm12 = vcmp.ge.f32.partialorder %v2837_v1, 0.0  ;;  %v2901_v48 = vmul.f32 0.01, %v2837_v1  ;;  %v2838_v52 = vadd.f32 %v3756_v11, %v4884_v58 }
 0x200   : > { %v3590_v28 = vpop.f32.mrb[26].mxu1  ;;  %v2935_v54 = vsel %vm2871_vm11, %v2839_v30, %v2903_v46  ;;  %vm2872_vm13 = vcmp.ge.f32.partialorder %v2840_v18, 0.0  ;;  %v2904_v26 = vmul.f32 0.01, %v2840_v18 }
 0x201   : > { %v1638_v3 = vpop.f32.mrb[27].mxu1  ;;  %2967 = vst [vmem:[%s4891_s22 + $0xb0] sm:$0xff] %v2935_v54  ;;  %v2933_v38 = vsel %vm2869_vm12, %v2837_v1, %v2901_v48  ;;  %vm2870_vm14 = vcmp.ge.f32.partialorder %v2838_v52, 0.0  ;;  %v2902_v17 = vmul.f32 0.01, %v2838_v52  ;;  %v3725_v47 = vpop.f32.mrb[24].mxu0 }
 0x202   : > { %2965 = vst [vmem:[%s4891_s22 + $0xa0] sm:$0xff] %v2933_v38  ;;  %v2936_v50 = vsel %vm2872_vm13, %v2840_v18, %v2904_v26  ;;  %v3757_v61 = vadd.f32 %v3725_v47, %v3589_v45  ;;  %v2747_v22 = vpop.f32.mrb[25].mxu0 }
 0x203   : > { %2968 = vst [vmem:[%s4891_s22 + $0xb8] sm:$0xff] %v2936_v50  ;;  %v2934_v56 = vsel %vm2870_vm14, %v2838_v52, %v2902_v17  ;;  %v3758_v37 = vadd.f32 %v2747_v22, %v1635_v40  ;;  %v3726_v31 = vpop.f32.mrb[26].mxu0 }
 0x204   : > { %2966 = vst [vmem:[%s4891_s22 + $0xa8] sm:$0xff] %v2934_v56  ;;  %v2843_v15 = vadd.f32 %v3757_v61, %v4884_v58  ;;  %v3759_v36 = vadd.f32 %v3726_v31, %v3590_v28  ;;  %v2750_v57 = vpop.f32.mrb[27].mxu0 }
 0x205   : > { %v2841_v51 = vadd.f32 %v3758_v37, %v4884_v58  ;;  %v3760_v34 = vadd.f32 %v2750_v57, %v1638_v3 }
 0x206   : > { %v3593_v7 = vpop.f32.mrb[28].mxu1  ;;  %vm2875_vm15 = vcmp.ge.f32.partialorder %v2843_v15, 0.0  ;;  %v2907_v60 = vmul.f32 0.01, %v2843_v15  ;;  %v2844_v23 = vadd.f32 %v3759_v36, %v4884_v58 }
 0x207   : > { %v1651_v62 = vpop.f32.mrb[29].mxu1  ;;  %vm2873_vm0 = vcmp.ge.f32.partialorder %v2841_v51, 0.0  ;;  %v2905_v55 = vmul.f32 0.01, %v2841_v51  ;;  %v2842_v10 = vadd.f32 %v3760_v34, %v4884_v58 }
 0x208   : > { %v3594_v21 = vpop.f32.mrb[30].mxu1  ;;  %v2939_v19 = vsel %vm2875_vm15, %v2843_v15, %v2907_v60  ;;  %vm2876_vm1 = vcmp.ge.f32.partialorder %v2844_v23, 0.0  ;;  %v2908_v12 = vmul.f32 0.01, %v2844_v23 }
 0x209   : > { %v1654_v59 = vpop.f32.mrb[31].mxu1  ;;  %2971 = vst [vmem:[%s4891_s22 + $0xd0] sm:$0xff] %v2939_v19  ;;  %v2937_v4 = vsel %vm2873_vm0, %v2841_v51, %v2905_v55  ;;  %vm2874_vm2 = vcmp.ge.f32.partialorder %v2842_v10, 0.0  ;;  %v2906_v43 = vmul.f32 0.01, %v2842_v10  ;;  %v3729_v0 = vpop.f32.mrb[28].mxu0 }
 0x20a   : > { %2969 = vst [vmem:[%s4891_s22 + $0xc0] sm:$0xff] %v2937_v4  ;;  %v2940_v8 = vsel %vm2876_vm1, %v2844_v23, %v2908_v12  ;;  %v3761_v42 = vadd.f32 %v3729_v0, %v3593_v7  ;;  %v2763_v27 = vpop.f32.mrb[29].mxu0 }
 0x20b   : > { %2972 = vst [vmem:[%s4891_s22 + $0xd8] sm:$0xff] %v2940_v8  ;;  %v2938_v32 = vsel %vm2874_vm2, %v2842_v10, %v2906_v43  ;;  %v3762_v2 = vadd.f32 %v2763_v27, %v1651_v62  ;;  %v3730_v44 = vpop.f32.mrb[30].mxu0 }
 0x20c   : > { %2970 = vst [vmem:[%s4891_s22 + $0xc8] sm:$0xff] %v2938_v32  ;;  %v2847_v14 = vadd.f32 %v3761_v42, %v4884_v58  ;;  %v3763_v16 = vadd.f32 %v3730_v44, %v3594_v21  ;;  %v2766_v63 = vpop.f32.mrb[31].mxu0 }
 0x20d   : > { %v2845_v33 = vadd.f32 %v3762_v2, %v4884_v58  ;;  %v3764_v6 = vadd.f32 %v2766_v63, %v1654_v59 }
 0x20e   : > { %vm2879_vm3 = vcmp.ge.f32.partialorder %v2847_v14, 0.0  ;;  %v2911_v20 = vmul.f32 0.01, %v2847_v14  ;;  %v2848_v9 = vadd.f32 %v3763_v16, %v4884_v58 }
 0x20f   : > { %vm2877_vm4 = vcmp.ge.f32.partialorder %v2845_v33, 0.0  ;;  %v2909_v53 = vmul.f32 0.01, %v2845_v33  ;;  %v2846_v35 = vadd.f32 %v3764_v6, %v4884_v58 }
 0x210   : > { %v2943_v5 = vsel %vm2879_vm3, %v2847_v14, %v2911_v20  ;;  %vm2880_vm5 = vcmp.ge.f32.partialorder %v2848_v9, 0.0  ;;  %v2912_v24 = vmul.f32 0.01, %v2848_v9 }
 0x211   : > { %2975 = vst [vmem:[%s4891_s22 + $0xf0] sm:$0xff] %v2943_v5  ;;  %v2941_v25 = vsel %vm2877_vm4, %v2845_v33, %v2909_v53  ;;  %vm2878_vm6 = vcmp.ge.f32.partialorder %v2846_v35, 0.0  ;;  %v2910_v29 = vmul.f32 0.01, %v2846_v35 }
 0x212   : > { %2973 = vst [vmem:[%s4891_s22 + $0xe0] sm:$0xff] %v2941_v25  ;;  %v2944_v41 = vsel %vm2880_vm5, %v2848_v9, %v2912_v24 }
 0x213   : > { %2976 = vst [vmem:[%s4891_s22 + $0xf8] sm:$0xff] %v2944_v41  ;;  %v2942_v13 = vsel %vm2878_vm6, %v2846_v35, %v2910_v29 }
 0x214   : > { %2974 = vst [vmem:[%s4891_s22 + $0xe8] sm:$0xff] %v2942_v13 }
 0x215 PF: > { %s13_s14 = sadd.s32 1, %s4065_s14   ;;  %s4995_s12 = smov %s4061_s13 }
 0x216   : > { %p10_p5 = scmp.ge.s32.totalorder %s13_s14, 5   ;;  %s4996_s13 = smov %s4998_s15 }
 0x218   :  { %12 = sbr.rel (!%p10_p5) target bundleno = 2 (0x2), region = 74 }

// kernel: conv_block_forward.2
= control target key start
LH: loop header
LB: loop body
LE: loop exit
PB: predicated region body
PF: predicated region fallthrough
CT: control target
= control target key end

     0   :  { %s4374_s12 = smov 0   ;;  %s4376_s13 = smov 0   ;;  %s5243_s0 = inlined_call_operand.vmem [shape: bf16[816,16], index: 0, kind: input, shape index: {}]   ;;  %s5244_s1 = inlined_call_operand.vmem [shape: bf16[9,16,128], index: 1, kind: input, shape index: {}]   ;;  %s5245_s2 = inlined_call_operand.vmem [shape: f32[1,128], index: 2, kind: input, shape index: {}]   ;;  %s5246_s3 = inlined_call_operand.vmem [shape: bf16[768,128], index: 3, kind: output, shape index: {}]  }
   0x1   :  { %s4378_s14 = smov 0  }
   0x2 LB: > { %s25_s15 = sadd.s32 1, %s4348_s13  ;;  %p3202_p0 = scmp.ge.s32.totalorder %s4352_s14, 1  ;;  %s4352_s14 = sphi %s4378_s14, %s13_s14   ;;  %s4348_s13 = sphi %s4376_s13, %s5267_s13   ;;  %s4344_s12 = sphi %s4374_s12, %s5266_s12  }
   0x3   : > { %p27_p1 = scmp.ge.s32.totalorder %s25_s15, 3  ;;  %p158_p2 = scmp.lt.s32.totalorder %s4352_s14, 4 }
   0x5   : > { %s5269_s15 = smov (%p27_p1, %s25_s15), 0  ;;  %p159_p3 = pnand %p3202_p0, %p158_p2 }
   0x7   : > { %162 = sbr.rel (%p159_p3) target bundleno = 535 (0x217), region = 32 }
   0xe   : > { %v4300_v0 = vld [vmem:[%s5244_s1 + $0x8] sm:$0xff]   ;;  %s3205_s18 = sshll.u32 %s4344_s12, 8  ;;  %v4401_v1 = vld [vmem:[%s5244_s1 + $0x20] sm:$0xff]   ;;  %vm305_vm0 = vsmask.f32 7424  ;;  %vm444_vm2 = vcmask 130048  }
   0xf   : > { %s205_s21 = sshra.s32 %s3205_s18, 3  ;;  %3712 = vmatprep.subr.bf16.mxu1 %v4300_v0  ;;  %3848 = vmatprep.subr.bf16.mxu0 %v4401_v1  ;;  %v4304_v2 = vld [vmem:[%s5244_s1] sm:$0xff]   ;;  %v4415_v3 = vld [vmem:[%s5244_s1 + $0x28] sm:$0xff]   ;;  %vm1373_vm1 = vsmask.f32 6400  ;;  %v4504_v56 = vld [vmem:[%s5244_s1 + $0x30] sm:$0xff]  }
  0x10   : > { %s3206_s22 = sshll.u32 %s205_s21, 2  ;;  %3713 = vmatpush3.bf16.msra.mxu1 %v4300_v0  ;;  %3849 = vmatpush3.bf16.msra.mxu0 %v4401_v1  ;;  %vm1701_vm3 = vcmask 1045504   ;;  %vm2201_vm4 = vsmask.f32 5376  ;;  %vm873_vm5 = vcmask 1046528   ;;  %vm2529_vm6 = vcmask 1044480  }
  0x11   : > { %s4407_s25 = scalar_lea.vmem %s5243_s0, %s3206_s22  ;;  %3746 = vmatprep.subr.bf16.mxu1 %v4304_v2  ;;  %3882 = vmatprep.subr.bf16.mxu0 %v4415_v3  ;;  %s3203_s17 = sshll.u32 %s4344_s12, 5 }
  0x12   : > { %v4419_v4 = vld [vmem:[%s4407_s25] sm:$0xff]   ;;  %v4422_v5 = vld [vmem:[%s4407_s25 + $0x8] sm:$0xff]   ;;  %v4426_v6 = vld [vmem:[%s4407_s25 + $0x10] sm:$0xff]   ;;  %p195_p4 = scmp.lt.s32.totalorder %s3203_s17, 95 }
  0x13   : > { %v307_v7 = vshrl.u32 %v4419_v4, 16  ;;  %v309_v8 = vshll.u32 %v4419_v4, 16  ;;  %v314_v9 = vshll.u32 %v4422_v5, 16  ;;  %v318_v10 = vshrl.u32 %v4422_v5, 16  ;;  %v4442_v20 = vld [vmem:[%s4407_s25 + $0x18] sm:$0xff]   ;;  %v4445_v24 = vld [vmem:[%s4407_s25 + $0x20] sm:$0xff]  }
  0x14   : > { %v4433_v11 = vshll.u32 %v4426_v6, 16  ;;  %v4436_v12 = vshrl.u32 %v4426_v6, 16  ;;  %v4448_v26 = vshll.u32 %v4442_v20, 16  ;;  %v4451_v27 = vshrl.u32 %v4442_v20, 16  ;;  %v4455_v29 = vld [vmem:[%s4407_s25 + $0x28] sm:$0xff]   ;;  %v4458_v30 = vld [vmem:[%s4407_s25 + $0x30] sm:$0xff]  }
  0x15   : > { %v311_v13 = vrot.slane %v309_v8, 1  ;;  %v316_v14 = vrot.slane %v314_v9, 1  ;;  %v1374_v15 = vrot.slane %v318_v10, 1  ;;  %v1375_v16 = vrot.slane %v314_v9, 2  ;;  %v4474_v39 = vld [vmem:[%s4407_s25 + $0x38] sm:$0xff]   ;;  %v4490_v48 = vld [vmem:[%s4407_s25 + $0x40] sm:$0xff]  }
  0x16   : > { %v1377_v17 = vrot.slane %v4436_v12, 1  ;;  %v1378_v18 = vrot.slane %v4433_v11, 2  ;;  %v324_v19 = vrot.slane %v4433_v11, 1  ;;  %v4463_v33 = vshll.u32 %v4445_v24, 16  ;;  %s5271_s17 = smov (!%p195_p4, %s3203_s17), 95 }
  0x17   : > { %v312_v21 = vor.u32 %v311_v13, %v307_v7  ;;  %v320_v22 = vor.u32 %v318_v10, %v316_v14  ;;  %v1376_v23 = vor.u32 %v1375_v16, %v1374_v15  ;;  %v4466_v34 = vshrl.u32 %v4445_v24, 16  ;;  %v4536_v15 = vld [vmem:[%s4407_s25 + $0x48] sm:$0xff]   ;;  %s3204_s12 = sshll.u32 %s5271_s17, 2 }
  0x18   : > { %v1379_v25 = vor.u32 %v1378_v18, %v1377_v17  ;;  %v328_v28 = vor.u32 %v4436_v12, %v324_v19  ;;  %v1381_v36 = vrot.slane %v4451_v27, 1  ;;  %v1382_v37 = vrot.slane %v4448_v26, 2  ;;  %s5180_s22 = scalar_lea.vmem %s5246_s3, %s3204_s12 }
  0x19   : > { %v317_v31 = vsel %vm305_vm0, %v312_v21, %v316_v14  ;;  %v325_v32 = vsel %vm305_vm0, %v320_v22, %v324_v19  ;;  %v332_v38 = vrot.slane %v4448_v26, 1  ;;  %v1385_v40 = vrot.slane %v4466_v34, 1 }
  0x1a   : > { %3714 = vmatprep.mubr.msk.bf16.mxu1 %vm444_vm2, %v317_v31  ;;  %v1380_v35 = vsel %vm1373_vm1, %v1376_v23, %v1379_v25  ;;  %v1386_v41 = vrot.slane %v4463_v33, 2  ;;  %v340_v42 = vrot.slane %v4463_v33, 1  ;;  %v4482_v43 = vshll.u32 %v4455_v29, 16 }
  0x1b   : > { %3850 = vmatprep.mubr.msk.bf16.mxu0 %vm444_vm2, %v1380_v35  ;;  %3715 = vmatmul.mubr.msk.bf16.vlgmr.msra.gmra.mrb[0].mxu1 %vm444_vm2, %v325_v32  ;;  %v1383_v44 = vor.u32 %v1382_v37, %v1381_v36  ;;  %v333_v45 = vsel %vm305_vm0, %v328_v28, %v332_v38  ;;  %v336_v46 = vor.u32 %v4451_v27, %v332_v38  ;;  %v4487_v47 = vshrl.u32 %v4455_v29, 16  ;;  %v4558_v36 = vld [vmem:[%s5244_s1 + $0x10] sm:$0xff]  }
  0x1c   : > { %3747 = vmatpush3.bf16.msra.mxu1 %v4304_v2  ;;  %3718 = vmatprep.mubr.msk.bf16.mxu1 %vm444_vm2, %v333_v45  ;;  %v1387_v49 = vor.u32 %v1386_v41, %v1385_v40  ;;  %v1390_v50 = vrot.slane %v4482_v43, 2  ;;  %v344_v51 = vor.u32 %v4466_v34, %v340_v42  ;;  %v348_v52 = vrot.slane %v4482_v43, 1  ;;  %v4563_v38 = vld [vmem:[%s4407_s25 + $0x50] sm:$0xff]  }
  0x1d   : > { %v1384_v53 = vsel %vm1373_vm1, %v1379_v25, %v1383_v44  ;;  %v1389_v54 = vrot.slane %v4487_v47, 1  ;;  %v4499_v55 = vshll.u32 %v4458_v30, 16  ;;  %v341_v58 = vsel %vm305_vm0, %v336_v46, %v340_v42  ;;  %3780 = vmatprep.subr.bf16.mxu1 %v4558_v36 }
  0x1e   : > { %3851 = vmatmul.mubr.msk.bf16.vlgmr.msra.gmra.mrb[0].mxu0 %vm444_vm2, %v1384_v53  ;;  %v1388_v57 = vsel %vm1373_vm1, %v1383_v44, %v1387_v49  ;;  %v4510_v59 = vshrl.u32 %v4458_v30, 16  ;;  %v349_v61 = vsel %vm305_vm0, %v344_v51, %v348_v52  ;;  %v4517_v63 = vshll.u32 %v4474_v39, 16 }
  0x1f   : > { %3883 = vmatpush3.bf16.msra.mxu0 %v4415_v3  ;;  %3854 = vmatprep.mubr.msk.bf16.mxu0 %vm444_vm2, %v1388_v57  ;;  %v1391_v60 = vor.u32 %v1390_v50, %v1389_v54  ;;  %v1394_v62 = vrot.slane %v4499_v55, 2  ;;  %v4521_v2 = vshrl.u32 %v4474_v39, 16  ;;  %v4524_v7 = vshll.u32 %v4490_v48, 16  ;;  %v4575_v50 = vld [vmem:[%s4407_s25 + $0x58] sm:$0xff]  }
  0x20   : > { %v1393_v0 = vrot.slane %v4510_v59, 1  ;;  %v4527_v3 = vshrl.u32 %v4490_v48, 16  ;;  %3916 = vmatprep.subr.bf16.mxu0 %v4504_v56  ;;  %v352_v8 = vor.u32 %v4487_v47, %v348_v52  ;;  %v356_v13 = vrot.slane %v4499_v55, 1 }
  0x21   : > { %v1392_v9 = vsel %vm1373_vm1, %v1387_v49, %v1391_v60  ;;  %v1398_v14 = vrot.slane %v4517_v63, 2  ;;  %v1397_v16 = vrot.slane %v4521_v2, 1  ;;  %v364_v17 = vrot.slane %v4517_v63, 1 }
  0x22   : > { %v1395_v10 = vor.u32 %v1394_v62, %v1393_v0  ;;  %v1401_v18 = vrot.slane %v4527_v3, 1  ;;  %v1402_v19 = vrot.slane %v4524_v7, 2  ;;  %v360_v22 = vor.u32 %v4510_v59, %v356_v13  ;;  %v4595_v62 = vld [vmem:[%s4407_s25 + $0x60] sm:$0xff]  }
  0x23   : > { %3719 = vmatmul.mubr.msk.bf16.gmra.mrb[4].mxu1 %vm444_vm2, %v341_v58  ;;  %v357_v23 = vsel %vm305_vm0, %v352_v8, %v356_v13  ;;  %v1399_v25 = vor.u32 %v1398_v14, %v1397_v16  ;;  %v4549_v28 = vshll.u32 %v4536_v15, 16  ;;  %v4552_v31 = vshrl.u32 %v4536_v15, 16 }
  0x24   : > { %3722 = vmatprep.mubr.msk.bf16.mxu1 %vm444_vm2, %v349_v61  ;;  %v1396_v21 = vsel %vm1373_vm1, %v1391_v60, %v1395_v10  ;;  %v365_v32 = vsel %vm305_vm0, %v360_v22, %v364_v17  ;;  %v1403_v35 = vor.u32 %v1402_v19, %v1401_v18  ;;  %v372_v37 = vrot.slane %v4524_v7, 1 }
  0x25   : > { %v1400_v40 = vsel %vm1373_vm1, %v1395_v10, %v1399_v25  ;;  %v368_v41 = vor.u32 %v4521_v2, %v364_v17  ;;  %v1405_v42 = vrot.slane %v4552_v31, 1  ;;  %v1406_v44 = vrot.slane %v4549_v28, 2  ;;  %v4604_v10 = vld [vmem:[%s4407_s25 + $0x68] sm:$0xff]  }
  0x26   : > { %3855 = vmatmul.mubr.msk.bf16.gmra.mrb[4].mxu0 %vm444_vm2, %v1392_v9  ;;  %v1404_v45 = vsel %vm1373_vm1, %v1399_v25, %v1403_v35  ;;  %v376_v46 = vor.u32 %v4527_v3, %v372_v37  ;;  %v380_v49 = vrot.slane %v4549_v28, 1  ;;  %v4579_v51 = vshll.u32 %v4563_v38, 16 }
  0x27   : > { %3858 = vmatprep.mubr.msk.bf16.mxu0 %vm444_vm2, %v1396_v21  ;;  %v373_v52 = vsel %vm305_vm0, %v368_v41, %v372_v37  ;;  %v4583_v53 = vor.u32 %v1406_v44, %v1405_v42  ;;  %v1702_v54 = vrot.slane %v4422_v5, 2  ;;  %v1703_v58 = vrot.slane %v4426_v6, 2  ;;  %v242_v37 = vld [vmem:[%s4407_s25 + $0x84] sm:$0xf]  ;;  %v4632_v42 = vld [vmem:[%s4407_s25 + $0x70] sm:$0xff]   ;;  %v4636_v44 = vld [vmem:[%s4407_s25 + $0x78] sm:$0xff]  }
  0x28   : > { %v381_v57 = vsel %vm305_vm0, %v376_v46, %v380_v49  ;;  %v4589_v60 = vshrl.u32 %v4563_v38, 16  ;;  %v4592_v61 = vshll.u32 %v4575_v50, 16  ;;  %v388_v0 = vrot.slane %v4579_v51, 1  ;;  %v244_v46 = vld [vmem:[%s4407_s25 + $0x8c] sm:$0xf] }
  0x29   : > { %5256 = vst [vmem:[#allocation2_spill] sm:$0xff] %v4583_v53  ;;  %v1408_v8 = vsel %vm1373_vm1, %v1403_v35, %v4583_v53  ;;  %v384_v9 = vor.u32 %v4552_v31, %v380_v49  ;;  %v1704_v13 = vsel %vm1701_vm3, %v1702_v54, %v1703_v58  ;;  %v4610_v17 = vshrl.u32 %v4575_v50, 16 }
  0x2a   : > { %v392_v14 = vor.u32 %v4589_v60, %v388_v0  ;;  %v396_v16 = vrot.slane %v4592_v61, 1  ;;  %v4613_v18 = vshll.u32 %v4595_v62, 16  ;;  %v1705_v21 = vrot.slane %v4442_v20, 2 }
  0x2b   : > { %3723 = vmatmul.mubr.msk.bf16.gmra.mrb[8].mxu1 %vm444_vm2, %v357_v23  ;;  %v389_v19 = vsel %vm305_vm0, %v384_v9, %v388_v0  ;;  %v4620_v22 = vshrl.u32 %v4595_v62, 16  ;;  %v4623_v23 = vshll.u32 %v4604_v10, 16  ;;  %v1709_v35 = vrot.slane %v4455_v29, 2 }
  0x2c   : > { %3726 = vmatprep.mubr.msk.bf16.mxu1 %vm444_vm2, %v365_v32  ;;  %5257 = vst [vmem:[#allocation3_spill] sm:$0xff] %v4613_v18  ;;  %v397_v25 = vsel %vm305_vm0, %v392_v14, %v396_v16  ;;  %v1707_v32 = vrot.slane %v4445_v24, 2  ;;  %v404_v41 = vrot.slane %v4613_v18, 1  ;;  %v4641_v49 = vsel %vm1701_vm3, %v1703_v58, %v1705_v21  ;;  %v4659_v58 = vld [vmem:[%s4407_s25 + $0x88] sm:$0xf]  ;;  %v4664_v14 = vld [vmem:[%s5244_s1 + $0x38] sm:$0xff]  }
  0x2d   : > { %5258 = vst [vmem:[#allocation4_spill] sm:$0xff] %v4623_v23  ;;  %v412_v54 = vrot.slane %v4623_v23, 1  ;;  %v1711_v9 = vrot.slane %v4458_v30, 2  ;;  %v2203_v53 = vrot.slane %v4433_v11, 3  ;;  %v2206_v18 = vrot.slane %v4448_v26, 3 }
  0x2e   : > { %3859 = vmatmul.mubr.msk.bf16.gmra.mrb[8].mxu0 %vm444_vm2, %v1400_v40  ;;  %v400_v40 = vor.u32 %v4610_v17, %v396_v16  ;;  %v4649_v0 = vsel %vm1701_vm3, %v1705_v21, %v1707_v32  ;;  %v4671_v21 = vshrl.u32 %v4632_v42, 16 }
  0x2f   : > { %3862 = vmatprep.mubr.msk.bf16.mxu0 %vm444_vm2, %v1404_v45  ;;  %v241_v45 = vld [vmem:[%s4407_s25 + $0x80] sm:$0xf] }
  0x30   : > { %v405_v16 = vsel %vm305_vm0, %v400_v40, %v404_v41  ;;  %v2205_v40 = vrot.slane %v4451_v27, 2  ;;  %v2210_v27 = vrot.slane %v4463_v33, 3  ;;  %v2214_v33 = vrot.slane %v4482_v43, 3 }
  0x31   : > { %v1713_v43 = vrot.slane %v4474_v39, 2 }
  0x32   : > { %v2207_v26 = vor.u32 %v2206_v18, %v2205_v40  ;;  %v2217_v18 = vrot.slane %v4510_v59, 2 }
  0x33   : > { %3727 = vmatmul.mubr.msk.bf16.gmra.mrb[12].mxu1 %vm444_vm2, %v373_v52  ;;  %v408_v52 = vor.u32 %v4620_v22, %v404_v41 }
  0x34   : > { %3730 = vmatprep.mubr.msk.bf16.mxu1 %vm444_vm2, %v381_v57  ;;  %v4646_v57 = vcombine.low %v241_v45, %v242_v37  ;;  %v2202_v37 = vrot.slane %v4436_v12, 2  ;;  %v2209_v12 = vrot.slane %v4466_v34, 2  ;;  %v2213_v34 = vrot.slane %v4487_v47, 2 }
  0x35   : > { %v413_v41 = vsel %vm305_vm0, %v408_v52, %v412_v54  ;;  %v2218_v47 = vrot.slane %v4499_v55, 3 }
  0x36   : > { %3863 = vmatmul.mubr.msk.bf16.gmra.mrb[12].mxu0 %vm444_vm2, %v1408_v8  ;;  %5259 = vst [vmem:[#allocation5_spill] sm:$0xff] %v4646_v57  ;;  %v4652_v8 = vsel %vm1701_vm3, %v1707_v32, %v1709_v35  ;;  %v4679_v32 = vshll.u32 %v4636_v44, 16  ;;  %v2204_v11 = vor.u32 %v2203_v53, %v2202_v37  ;;  %v2211_v37 = vor.u32 %v2210_v27, %v2209_v12 }
  0x37   : > { %3884 = vmatprep.mubr.msk.bf16.mxu0 %vm444_vm2, %v1704_v13  ;;  %v4656_v13 = vshrl.u32 %v4604_v10, 16  ;;  %v2215_v12 = vor.u32 %v2214_v33, %v2213_v34  ;;  %v4734_v27 = vshrl.u32 %v4636_v44, 16 }
  0x38   : > { %v4720_v40 = vsel %vm2201_vm4, %v2207_v26, %v2211_v37 }
  0x39   : > { %5260 = vst [vmem:[#allocation6_spill] sm:$0xff] %v4656_v13  ;;  %v416_v52 = vor.u32 %v4656_v13, %v412_v54  ;;  %v4712_v54 = vcombine.low %v241_v45, %v241_v45  ;;  %v4715_v13 = vsel %vm2201_vm4, %v2204_v11, %v2207_v26  ;;  %v4727_v45 = vsel %vm2201_vm4, %v2211_v37, %v2215_v12 }
  0x3a   : > { %v2221_v11 = vrot.slane %v4521_v2, 2  ;;  %v2222_v26 = vrot.slane %v4517_v63, 3  ;;  %v1715_v37 = vrot.slane %v4490_v48, 2 }
  0x3b   : > { %3731 = vmatmul.mubr.msk.bf16.gmra.mrb[16].mxu1 %vm444_vm2, %v389_v19  ;;  %v4668_v19 = vshll.u32 %v4632_v42, 16  ;;  %v434_v55 = vshll.u32 %v4712_v54, 16 }
  0x3c   : > { %3734 = vmatprep.mubr.msk.bf16.mxu1 %vm444_vm2, %v397_v25  ;;  %v4674_v25 = vcombine.low %v4659_v58, %v244_v46  ;;  %v4689_v46 = vrot.slane %v4646_v57, 2  ;;  %v2223_v2 = vor.u32 %v2222_v26, %v2221_v11  ;;  %v4755_v11 = vsel %vm1701_vm3, %v1713_v43, %v1715_v37 }
  0x3d   : > { %v420_v53 = vrot.slane %v4668_v19, 1  ;;  %v1721_v26 = vrot.slane %v4575_v50, 2 }
  0x3e   : > { %3885 = vmatmul.mubr.msk.bf16.vlgmr.msra.gmra.mrb[0].mxu0 %vm444_vm2, %v4641_v49  ;;  %v1989_v23 = vrot.slane %v4674_v25, 2 }
  0x3f   : > { %3917 = vmatpush3.bf16.msra.mxu0 %v4504_v56  ;;  %3888 = vmatprep.mubr.msk.bf16.mxu0 %vm444_vm2, %v4649_v0  ;;  %v4697_v56 = vsel %vm1701_vm3, %v1709_v35, %v1711_v9  ;;  %v428_v35 = vrot.slane %v4679_v32, 1  ;;  %v421_v59 = vsel %vm305_vm0, %v416_v52, %v420_v53  ;;  %v4747_v52 = vsel %vm1701_vm3, %v1711_v9, %v1713_v43 }
  0x40   : > { %3950 = vmatprep.subr.bf16.mxu0 %v4664_v14  ;;  %v4704_v57 = vsel %vm1701_vm3, %v4689_v46, %v1989_v23  ;;  %v2230_v9 = vrot.slane %v4549_v28, 3  ;;  %v1719_v43 = vrot.slane %v4563_v38, 2 }
  0x41   : > { %v432_v63 = vor.u32 %v4734_v27, %v428_v35 }
  0x43   : > { %3735 = vmatmul.mubr.msk.bf16.gmra.mrb[20].mxu1 %vm444_vm2, %v405_v16  ;;  %v424_v16 = vor.u32 %v4671_v21, %v420_v53  ;;  %v436_v53 = vrot.slane %v434_v55, 1 }
  0x44   : > { %3738 = vmatprep.mubr.msk.bf16.mxu1 %vm444_vm2, %v413_v41  ;;  %v2219_v41 = vor.u32 %v2218_v47, %v2217_v18  ;;  %v2225_v18 = vrot.slane %v4527_v3, 2  ;;  %v2226_v47 = vrot.slane %v4524_v7, 3  ;;  %v2229_v7 = vrot.slane %v4552_v31, 2 }
  0x45   : > { %v429_v34 = vsel %vm305_vm0, %v424_v16, %v428_v35  ;;  %v437_v35 = vsel %vm305_vm0, %v432_v63, %v436_v53  ;;  %v1727_v63 = vrot.slane %v4632_v42, 2 }
  0x46   : > { %3889 = vmatmul.mubr.msk.bf16.gmra.mrb[4].mxu0 %vm444_vm2, %v4652_v8  ;;  %v4741_v33 = vsel %vm2201_vm4, %v2215_v12, %v2219_v41  ;;  %v4752_v16 = vsel %vm2201_vm4, %v2219_v41, %v2223_v2  ;;  %v2227_v12 = vor.u32 %v2226_v47, %v2225_v18  ;;  %v1717_v41 = vrot.slane %v4536_v15, 2 }
  0x47   : > { %3892 = vmatprep.mubr.msk.bf16.mxu0 %vm444_vm2, %v4697_v56  ;;  %v1725_v47 = vrot.slane %v4604_v10, 2 }
  0x48   : > { %v4758_v3 = vsel %vm2201_vm4, %v2223_v2, %v2227_v12  ;;  %v1718_v31 = vsel %vm1701_vm3, %v1715_v37, %v1717_v41  ;;  %v1720_v28 = vsel %vm1701_vm3, %v1717_v41, %v1719_v43  ;;  %v4326_v2 = vld [vmem:[%s5244_s1 + $0x18] sm:$0xff]   ;;  %v1722_v37 = vsel %vm1701_vm3, %v1719_v43, %v1721_v26 }
  0x49   : > { %v1728_v53 = vsel %vm1701_vm3, %v1725_v47, %v1727_v63 }
  0x4b   : > { %3739 = vmatmul.mubr.msk.bf16.gmra.mrb[24].mxu1 %vm444_vm2, %v421_v59  ;;  %v4769_v59 = vor.u32 %v2230_v9, %v2229_v7  ;;  %v4814_v9 = vcombine.low %v4659_v58, %v4659_v58  ;;  %v4837_v58 = vld [vmem:[%s5244_s1 + $0x40] sm:$0xff]  }
  0x4c   : > { %3742 = vmatprep.mubr.msk.bf16.mxu1 %vm444_vm2, %v429_v34  ;;  %v1723_v34 = vrot.slane %v4595_v62, 2 }
  0x4d   : > { %v4774_v55 = vsel %vm2201_vm4, %v2227_v12, %v4769_v59  ;;  %v1729_v12 = vrot.slane %v4636_v44, 2  ;;  %v1733_v41 = vrot.slane %v4814_v9, 2 }
  0x4e   : > { %3893 = vmatmul.mubr.msk.bf16.gmra.mrb[8].mxu0 %vm444_vm2, %v4747_v52  ;;  %v1724_v18 = vsel %vm1701_vm3, %v1721_v26, %v1723_v34  ;;  %v887_v26 = vrot.slane %v4474_v39, 1 }
  0x4f   : > { %3896 = vmatprep.mubr.msk.bf16.mxu0 %vm444_vm2, %v4755_v11  ;;  %v1730_v7 = vsel %vm1701_vm3, %v1727_v63, %v1729_v12  ;;  %v1734_v43 = vsel %vm1701_vm3, %v4689_v46, %v1733_v41 }
  0x53   : > { %3743 = vmatmul.mubr.msk.bf16.gmra.mrb[28].mxu1 %vm444_vm2, %v437_v35  ;;  %v1732_v35 = vsel %vm1701_vm3, %v1729_v12, %v4689_v46  ;;  %v879_v46 = vrot.slane %v4442_v20, 1 }
  0x54   : > { %3748 = vmatprep.mubr.msk.bf16.mxu1 %vm444_vm2, %v4419_v4 }
  0x56   : > { %3897 = vmatmul.mubr.msk.bf16.gmra.mrb[12].mxu0 %vm444_vm2, %v1718_v31 }
  0x57   : > { %3900 = vmatprep.mubr.msk.bf16.mxu0 %vm444_vm2, %v1720_v28 }
  0x5b   : > { %3749 = vmatmul.mubr.msk.bf16.vlgmr.msra.gmra.mrb[0].mxu1 %vm444_vm2, %v4422_v5 }
  0x5c   : > { %3781 = vmatpush3.bf16.msra.mxu1 %v4558_v36  ;;  %3752 = vmatprep.mubr.msk.bf16.mxu1 %vm444_vm2, %v4426_v6  ;;  %v1726_v36 = vsel %vm1701_vm3, %v1723_v34, %v1725_v47  ;;  %v891_v47 = vrot.slane %v4536_v15, 1 }
  0x5d   : > { %3814 = vmatprep.subr.bf16.mxu1 %v4326_v2 }
  0x5e   : > { %3901 = vmatmul.mubr.msk.bf16.gmra.mrb[16].mxu0 %vm444_vm2, %v1722_v37 }
  0x5f   : > { %3904 = vmatprep.mubr.msk.bf16.mxu0 %vm444_vm2, %v1724_v18 }
  0x63   : > { %3753 = vmatmul.mubr.msk.bf16.gmra.mrb[4].mxu1 %vm444_vm2, %v4442_v20 }
  0x64   : > { %3756 = vmatprep.mubr.msk.bf16.mxu1 %vm444_vm2, %v4445_v24 }
  0x66   : > { %3905 = vmatmul.mubr.msk.bf16.gmra.mrb[20].mxu0 %vm444_vm2, %v1726_v36 }
  0x67   : > { %3908 = vmatprep.mubr.msk.bf16.mxu0 %vm444_vm2, %v1728_v53 }
  0x6b   : > { %3757 = vmatmul.mubr.msk.bf16.gmra.mrb[8].mxu1 %vm444_vm2, %v4455_v29 }
  0x6c   : > { %3760 = vmatprep.mubr.msk.bf16.mxu1 %vm444_vm2, %v4458_v30 }
  0x6e   : > { %3909 = vmatmul.mubr.msk.bf16.gmra.mrb[24].mxu0 %vm444_vm2, %v1730_v7 }
  0x6f   : > { %3912 = vmatprep.mubr.msk.bf16.mxu0 %vm444_vm2, %v1732_v35 }
  0x73   : > { %3761 = vmatmul.mubr.msk.bf16.gmra.mrb[12].mxu1 %vm444_vm2, %v4474_v39 }
  0x74   : > { %3764 = vmatprep.mubr.msk.bf16.mxu1 %vm444_vm2, %v4490_v48 }
  0x76   : > { %3913 = vmatmul.mubr.msk.bf16.gmra.mrb[28].mxu0 %vm444_vm2, %v1734_v43  ;;  %v899_v43 = vrot.slane %v4604_v10, 1 }
  0x77   : > { %3918 = vmatprep.mubr.msk.bf16.mxu0 %vm444_vm2, %v4641_v49  ;;  %v874_v49 = vrot.slane %v4419_v4, 1 }
  0x7b   : > { %3765 = vmatmul.mubr.msk.bf16.gmra.mrb[16].mxu1 %vm444_vm2, %v4536_v15 }
  0x7c   : > { %3768 = vmatprep.mubr.msk.bf16.mxu1 %vm444_vm2, %v4563_v38 }
  0x7e   : > { %3919 = vmatmul.mubr.msk.bf16.vlgmr.msra.gmra.mrb[0].mxu0 %vm444_vm2, %v4649_v0  ;;  %v875_v0 = vrot.slane %v4422_v5, 1 }
  0x7f   : > { %3951 = vmatpush3.bf16.msra.mxu0 %v4664_v14  ;;  %3922 = vmatprep.mubr.msk.bf16.mxu0 %vm444_vm2, %v4652_v8  ;;  %v877_v14 = vrot.slane %v4426_v6, 1 }
  0x80   : > { %3984 = vmatprep.subr.bf16.mxu0 %v4837_v58  ;;  %v876_v8 = vsel %vm873_vm5, %v874_v49, %v875_v0 }
  0x81   : > { %v4871_v4 = vsel %vm873_vm5, %v875_v0, %v877_v14  ;;  %v4874_v5 = vsel %vm873_vm5, %v877_v14, %v879_v46  ;;  %v901_v0 = vrot.slane %v4632_v42, 1  ;;  %v2234_v14 = vrot.slane %v4579_v51, 3 }
  0x83   : > { %3769 = vmatmul.mubr.msk.bf16.gmra.mrb[20].mxu1 %vm444_vm2, %v4575_v50 }
  0x84   : > { %3772 = vmatprep.mubr.msk.bf16.mxu1 %vm444_vm2, %v4595_v62 }
  0x86   : > { %3923 = vmatmul.mubr.msk.bf16.gmra.mrb[4].mxu0 %vm444_vm2, %v4697_v56  ;;  %v881_v56 = vrot.slane %v4445_v24, 1 }
  0x87   : > { %3926 = vmatprep.mubr.msk.bf16.mxu0 %vm444_vm2, %v4747_v52  ;;  %v883_v52 = vrot.slane %v4455_v29, 1 }
  0x8b   : > { %3773 = vmatmul.mubr.msk.bf16.gmra.mrb[24].mxu1 %vm444_vm2, %v4604_v10 }
  0x8c   : > { %3776 = vmatprep.mubr.msk.bf16.mxu1 %vm444_vm2, %v4632_v42 }
  0x8e   : > { %3927 = vmatmul.mubr.msk.bf16.gmra.mrb[8].mxu0 %vm444_vm2, %v4755_v11  ;;  %v4886_v11 = vsel %vm873_vm5, %v879_v46, %v881_v56  ;;  %v2238_v46 = vrot.slane %v4592_v61, 3 }
  0x8f   : > { %3930 = vmatprep.mubr.msk.bf16.mxu0 %vm444_vm2, %v1718_v31  ;;  %v4889_v31 = vsel %vm873_vm5, %v881_v56, %v883_v52 }
  0x93   : > { %3777 = vmatmul.mubr.msk.bf16.gmra.mrb[28].mxu1 %vm444_vm2, %v4636_v44 }
  0x94   : > { %3782 = vmatprep.mubr.msk.bf16.mxu1 %vm444_vm2, %v876_v8  ;;  %v905_v8 = vrot.slane %v4712_v54, 1 }
  0x96   : > { %3931 = vmatmul.mubr.msk.bf16.gmra.mrb[12].mxu0 %vm444_vm2, %v1720_v28  ;;  %v885_v28 = vrot.slane %v4458_v30, 1 }
  0x97   : > { %3934 = vmatprep.mubr.msk.bf16.mxu0 %vm444_vm2, %v1722_v37  ;;  %v889_v37 = vrot.slane %v4490_v48, 1 }
  0x98   : > { %v4900_v34 = vsel %vm873_vm5, %v883_v52, %v885_v28 }
  0x99   : > { %v4918_v63 = vsel %vm873_vm5, %v887_v26, %v889_v37 }
  0x9b   : > { %3783 = vmatmul.mubr.msk.bf16.vlgmr.msra.gmra.mrb[0].mxu1 %vm444_vm2, %v4871_v4 }
  0x9c   : > { %3815 = vmatpush3.bf16.msra.mxu1 %v4326_v2  ;;  %3786 = vmatprep.mubr.msk.bf16.mxu1 %vm444_vm2, %v4874_v5  ;;  %v4903_v2 = vsel %vm873_vm5, %v885_v28, %v887_v26  ;;  %v2241_v26 = vrot.slane %v4620_v22, 2 }
  0x9d   : > { %4018 = vmatprep.subr.bf16.mxu1 %v4401_v1 }
  0x9e   : > { %3935 = vmatmul.mubr.msk.bf16.gmra.mrb[16].mxu0 %vm444_vm2, %v1724_v18  ;;  %v4911_v18 = vld [vmem:[%s4407_s25 + $0x90] ss:$0 sps:$4 sm:$0xff]  }
  0x9f   : > { %3938 = vmatprep.mubr.msk.bf16.mxu0 %vm444_vm2, %v1726_v36  ;;  %v1991_v36 = vrot.slane %v4911_v18, 2 }
  0xa1   : > { %v1992_v12 = vsel %vm1701_vm3, %v1989_v23, %v1991_v36  ;;  %v897_v23 = vrot.slane %v4595_v62, 1 }
  0xa3   : > { %3787 = vmatmul.mubr.msk.bf16.gmra.mrb[4].mxu1 %vm444_vm2, %v4886_v11  ;;  %v4957_v49 = vsel %vm873_vm5, %v897_v23, %v899_v43 }
  0xa4   : > { %3790 = vmatprep.mubr.msk.bf16.mxu1 %vm444_vm2, %v4889_v31 }
  0xa6   : > { %3939 = vmatmul.mubr.msk.bf16.gmra.mrb[20].mxu0 %vm444_vm2, %v1728_v53  ;;  %v4922_v53 = vsel %vm873_vm5, %v889_v37, %v891_v47  ;;  %v5261_v37 = vld [vmem:[#allocation3_spill] sm:$0xff] }
  0xa7   : > { %3942 = vmatprep.mubr.msk.bf16.mxu0 %vm444_vm2, %v1730_v7  ;;  %v895_v7 = vrot.slane %v4575_v50, 1 }
  0xab   : > { %3791 = vmatmul.mubr.msk.bf16.gmra.mrb[8].mxu1 %vm444_vm2, %v4900_v34 }
  0xac   : > { %3794 = vmatprep.mubr.msk.bf16.mxu1 %vm444_vm2, %v4903_v2 }
  0xae   : > { %3943 = vmatmul.mubr.msk.bf16.gmra.mrb[24].mxu0 %vm444_vm2, %v1732_v35 }
  0xaf   : > { %3946 = vmatprep.mubr.msk.bf16.mxu0 %vm444_vm2, %v4704_v57  ;;  %v893_v57 = vrot.slane %v4563_v38, 1 }
  0xb1   : > { %v4937_v35 = vsel %vm873_vm5, %v891_v47, %v893_v57  ;;  %v4940_v41 = vsel %vm873_vm5, %v893_v57, %v895_v7 }
  0xb3   : > { %3795 = vmatmul.mubr.msk.bf16.gmra.mrb[12].mxu1 %vm444_vm2, %v4918_v63 }
  0xb4   : > { %3798 = vmatprep.mubr.msk.bf16.mxu1 %vm444_vm2, %v4922_v53 }
  0xb6   : > { %3947 = vmatmul.mubr.msk.bf16.gmra.mrb[28].mxu0 %vm444_vm2, %v1992_v12  ;;  %v5263_v12 = vld [vmem:[#allocation4_spill] sm:$0xff] }
  0xb7   : > { %3952 = vmatprep.mubr.msk.bf16.mxu0 %vm444_vm2, %v4715_v13  ;;  %v4954_v13 = vsel %vm873_vm5, %v895_v7, %v897_v23  ;;  %v2246_v57 = vrot.slane %v5263_v12, 3 }
  0xbb   : > { %3799 = vmatmul.mubr.msk.bf16.gmra.mrb[16].mxu1 %vm444_vm2, %v4937_v35 }
  0xbc   : > { %3802 = vmatprep.mubr.msk.bf16.mxu1 %vm444_vm2, %v4940_v41 }
  0xbe   : > { %3953 = vmatmul.mubr.msk.bf16.vlgmr.msra.gmra.mrb[0].mxu0 %vm444_vm2, %v4720_v40  ;;  %v4965_v40 = vrot.slane %v4636_v44, 1 }
  0xbf   : > { %3985 = vmatpush3.bf16.msra.mxu0 %v4837_v58  ;;  %3956 = vmatprep.mubr.msk.bf16.mxu0 %vm444_vm2, %v4727_v45  ;;  %v4972_v45 = vsel %vm873_vm5, %v899_v43, %v901_v0  ;;  %v2250_v43 = vrot.slane %v4668_v19, 3 }
  0xc0   : > { %v4976_v58 = vsel %vm873_vm5, %v901_v0, %v4965_v40  ;;  %v906_v56 = vsel %vm873_vm5, %v4965_v40, %v905_v8  ;;  %v2253_v8 = vrot.slane %v4734_v27, 2 }
  0xc3   : > { %3803 = vmatmul.mubr.msk.bf16.gmra.mrb[20].mxu1 %vm444_vm2, %v4954_v13 }
  0xc4   : > { %3806 = vmatprep.mubr.msk.bf16.mxu1 %vm444_vm2, %v4957_v49 }
  0xc6   : > { %3957 = vmatmul.mubr.msk.bf16.gmra.mrb[4].mxu0 %vm444_vm2, %v4741_v33  ;;  %v2233_v33 = vrot.slane %v4589_v60, 2 }
  0xc7   : > { %3960 = vmatprep.mubr.msk.bf16.mxu0 %vm444_vm2, %v4752_v16  ;;  %v2237_v16 = vrot.slane %v4610_v17, 2 }
  0xc8   : > { %v2235_v52 = vor.u32 %v2234_v14, %v2233_v33  ;;  %v2254_v33 = vrot.slane %v4679_v32, 3 }
  0xc9   : > { %v2239_v28 = vor.u32 %v2238_v46, %v2237_v16  ;;  %v2262_v46 = vshrl.u32 %v4674_v25, 16 }
  0xca   : > { %v2236_v54 = vsel %vm2201_vm4, %v4769_v59, %v2235_v52 }
  0xcb   : > { %3807 = vmatmul.mubr.msk.bf16.gmra.mrb[24].mxu1 %vm444_vm2, %v4972_v45  ;;  %v2240_v47 = vsel %vm2201_vm4, %v2235_v52, %v2239_v28 }
  0xcc   : > { %3810 = vmatprep.mubr.msk.bf16.mxu1 %vm444_vm2, %v4976_v58 }
  0xce   : > { %3961 = vmatmul.mubr.msk.bf16.gmra.mrb[8].mxu0 %vm444_vm2, %v4758_v3  ;;  %v2242_v3 = vrot.slane %v5261_v37, 3 }
  0xcf   : > { %3964 = vmatprep.mubr.msk.bf16.mxu0 %vm444_vm2, %v4774_v55  ;;  %v5262_v55 = vld [vmem:[#allocation6_spill] sm:$0xff] }
  0xd0   : > { %v2245_v36 = vrot.slane %v5262_v55, 2  ;;  %v2243_v7 = vor.u32 %v2242_v3, %v2241_v26  ;;  %v2264_v3 = vrot.slane %v2262_v46, 2  ;;  %v1163_v46 = vrot.slane %v4814_v9, 1 }
  0xd2   : > { %v2247_v23 = vor.u32 %v2246_v57, %v2245_v36  ;;  %v2244_v59 = vsel %vm2201_vm4, %v2239_v28, %v2243_v7  ;;  %v2271_v36 = vshrl.u32 %v4911_v18, 16  ;;  %v2274_v57 = vshll.u32 %v4911_v18, 16 }
  0xd3   : > { %3811 = vmatmul.mubr.msk.bf16.gmra.mrb[28].mxu1 %vm444_vm2, %v906_v56  ;;  %v2265_v56 = vshll.u32 %v4674_v25, 16 }
  0xd4   : > { %3816 = vmatprep.mubr.msk.bf16.mxu1 %vm444_vm2, %v4871_v4  ;;  %v2249_v4 = vrot.slane %v4671_v21, 2  ;;  %v2248_v0 = vsel %vm2201_vm4, %v2243_v7, %v2247_v23 }
  0xd6   : > { %3965 = vmatmul.mubr.msk.bf16.gmra.mrb[12].mxu0 %vm444_vm2, %v2236_v54 }
  0xd7   : > { %3968 = vmatprep.mubr.msk.bf16.mxu0 %vm444_vm2, %v2240_v47  ;;  %v2267_v47 = vrot.slane %v2265_v56, 3 }
  0xdb   : > { %3817 = vmatmul.mubr.msk.bf16.vlgmr.msra.gmra.mrb[0].mxu1 %vm444_vm2, %v4874_v5  ;;  %v5264_v5 = vld [vmem:[#allocation5_spill] sm:$0xff] }
  0xdc   : > { %4019 = vmatpush3.bf16.msra.mxu1 %v4401_v1  ;;  %3820 = vmatprep.mubr.msk.bf16.mxu1 %vm444_vm2, %v4886_v11  ;;  %v2251_v1 = vor.u32 %v2250_v43, %v2249_v4  ;;  %v1434_v14 = vshrl.u32 %v5264_v5, 16  ;;  %v1437_v16 = vshll.u32 %v5264_v5, 16  ;;  %v2255_v11 = vor.u32 %v2254_v33, %v2253_v8 }
  0xdd   : > { %v2531_v8 = vrot.slane %v4442_v20, 3  ;;  %v2533_v33 = vrot.slane %v4445_v24, 3  ;;  %v2539_v24 = vrot.slane %v4474_v39, 3 }
  0xde   : > { %3969 = vmatmul.mubr.msk.bf16.gmra.mrb[16].mxu0 %vm444_vm2, %v2244_v59  ;;  %v2252_v52 = vsel %vm2201_vm4, %v2247_v23, %v2251_v1  ;;  %v2257_v28 = vrot.slane %v1434_v14, 2  ;;  %v2258_v54 = vrot.slane %v1437_v16, 3  ;;  %v2256_v26 = vsel %vm2201_vm4, %v2251_v1, %v2255_v11 }
  0xdf   : > { %3972 = vmatprep.mubr.msk.bf16.mxu0 %vm444_vm2, %v2248_v0  ;;  %v2273_v23 = vrot.slane %v2271_v36, 2  ;;  %v2276_v59 = vrot.slane %v2274_v57, 3  ;;  %v2530_v0 = vrot.slane %v4426_v6, 3  ;;  %v2535_v6 = vrot.slane %v4455_v29, 3 }
  0xe0   : > { %v2534_v20 = vsel %vm2529_vm6, %v2531_v8, %v2533_v33  ;;  %v1409_v1 = vrot.slane %v4589_v60, 1  ;;  %v1413_v60 = vrot.slane %v4610_v17, 1  ;;  %v2551_v36 = vrot.slane %v4604_v10, 3 }
  0xe1   : > { %v2277_v43 = vor.u32 %v2276_v59, %v2273_v23  ;;  %v1425_v57 = vrot.slane %v4671_v21, 1  ;;  %v2553_v21 = vrot.slane %v4632_v42, 3 }
  0xe3   : > { %3821 = vmatmul.mubr.msk.bf16.gmra.mrb[4].mxu1 %vm444_vm2, %v4889_v31  ;;  %v2259_v31 = vor.u32 %v2258_v54, %v2257_v28  ;;  %v2547_v28 = vrot.slane %v4575_v50, 3  ;;  %v1417_v54 = vrot.slane %v4620_v22, 1  ;;  %v1421_v22 = vrot.slane %v5262_v55, 1 }
  0xe4   : > { %3824 = vmatprep.mubr.msk.bf16.mxu1 %vm444_vm2, %v4900_v34  ;;  %v2268_v34 = vor.u32 %v2267_v47, %v2264_v3 }
  0xe5   : > { %v2260_v7 = vsel %vm2201_vm4, %v2255_v11, %v2259_v31  ;;  %v1410_v11 = vrot.slane %v4579_v51, 2  ;;  %v2545_v51 = vrot.slane %v4563_v38, 3 }
  0xe6   : > { %3973 = vmatmul.mubr.msk.bf16.gmra.mrb[20].mxu0 %vm444_vm2, %v2252_v52  ;;  %v2269_v4 = vsel %vm2201_vm4, %v2259_v31, %v2268_v34 }
  0xe7   : > { %3976 = vmatprep.mubr.msk.bf16.mxu0 %vm444_vm2, %v2256_v26  ;;  %v1411_v56 = vor.u32 %v1410_v11, %v1409_v1  ;;  %v1418_v26 = vrot.slane %v5261_v37, 2  ;;  %v2548_v17 = vsel %vm2529_vm6, %v2545_v51, %v2547_v28  ;;  %v1422_v37 = vrot.slane %v5263_v12, 2 }
  0xe8   : > { %v1430_v12 = vrot.slane %v4679_v32, 2  ;;  %v1446_v32 = vshll.u32 %v4814_v9, 16 }
  0xe9   : > { %v1419_v47 = vor.u32 %v1418_v26, %v1417_v54  ;;  %v1423_v23 = vor.u32 %v1422_v37, %v1421_v22 }
  0xeb   : > { %3825 = vmatmul.mubr.msk.bf16.gmra.mrb[8].mxu1 %vm444_vm2, %v4903_v2  ;;  %v2278_v2 = vsel %vm2201_vm4, %v2268_v34, %v2277_v43  ;;  %v1426_v34 = vrot.slane %v4668_v19, 2  ;;  %v1424_v10 = vsel %vm1373_vm1, %v1419_v47, %v1423_v23  ;;  %v1429_v19 = vrot.slane %v4734_v27, 1 }
  0xec   : > { %3828 = vmatprep.mubr.msk.bf16.mxu1 %vm444_vm2, %v4918_v63  ;;  %v2532_v63 = vsel %vm2529_vm6, %v2530_v0, %v2531_v8  ;;  %v1436_v43 = vrot.slane %v1434_v14, 1  ;;  %v1439_v0 = vrot.slane %v1437_v16, 2  ;;  %v2554_v8 = vsel %vm2529_vm6, %v2551_v36, %v2553_v21 }
  0xed   : > { %v1427_v55 = vor.u32 %v1426_v34, %v1425_v57  ;;  %v1431_v42 = vor.u32 %v1430_v12, %v1429_v19  ;;  %v1443_v27 = vshrl.u32 %v4814_v9, 16  ;;  %v2557_v16 = vrot.slane %v5264_v5, 3 }
  0xee   : > { %3977 = vmatmul.mubr.msk.bf16.gmra.mrb[24].mxu0 %vm444_vm2, %v2260_v7 }
  0xef   : > { %3980 = vmatprep.mubr.msk.bf16.mxu0 %vm444_vm2, %v2269_v4  ;;  %v1428_v59 = vsel %vm1373_vm1, %v1423_v23, %v1427_v55  ;;  %v2555_v4 = vrot.slane %v4636_v44, 3  ;;  %v1440_v44 = vor.u32 %v1439_v0, %v1436_v43  ;;  %v1432_v14 = vsel %vm1373_vm1, %v1427_v55, %v1431_v42 }
  0xf1   : > { %v2558_v9 = vsel %vm2529_vm6, %v2555_v4, %v2557_v16 }
  0xf3   : > { %3829 = vmatmul.mubr.msk.bf16.gmra.mrb[12].mxu1 %vm444_vm2, %v4922_v53  ;;  %v2536_v53 = vsel %vm2529_vm6, %v2533_v33, %v2535_v6  ;;  %v1448_v33 = vrot.slane %v1446_v32, 2 }
  0xf4   : > { %3832 = vmatprep.mubr.msk.bf16.mxu1 %vm444_vm2, %v4937_v35  ;;  %v2537_v35 = vrot.slane %v4458_v30, 3  ;;  %v2541_v30 = vrot.slane %v4490_v48, 3 }
  0xf6   : > { %3981 = vmatmul.mubr.msk.bf16.gmra.mrb[28].mxu0 %vm444_vm2, %v2278_v2  ;;  %v2538_v29 = vsel %vm2529_vm6, %v2535_v6, %v2537_v35  ;;  %v2556_v2 = vsel %vm2529_vm6, %v2553_v21, %v2555_v4  ;;  %v1441_v6 = vsel %vm1373_vm1, %v1431_v42, %v1440_v44 }
  0xf7   : > { %3986 = vmatprep.mubr.msk.bf16.mxu0 %vm444_vm2, %v2532_v63  ;;  %v1445_v63 = vrot.slane %v1443_v27, 1 }
  0xfb   : > { %3833 = vmatmul.mubr.msk.bf16.gmra.mrb[16].mxu1 %vm444_vm2, %v4940_v41  ;;  %v2540_v41 = vsel %vm2529_vm6, %v2537_v35, %v2539_v24 }
  0xfc   : > { %3836 = vmatprep.mubr.msk.bf16.mxu1 %vm444_vm2, %v4954_v13  ;;  %v1161_v13 = vrot.slane %v5264_v5, 1 }
  0xfe   : > { %3987 = vmatmul.mubr.msk.bf16.vlgmr.msra.gmra.mrb[0].mxu0 %vm444_vm2, %v2534_v20  ;;  %v1162_v39 = vsel %vm873_vm5, %v4965_v40, %v1161_v13  ;;  %v1414_v40 = vrot.slane %v4592_v61, 2  ;;  %v2549_v61 = vrot.slane %v4595_v62, 3  ;;  %v2559_v20 = vrot.slane %v4674_v25, 3 }
  0xff   : > { %3990 = vmatprep.mubr.msk.bf16.mxu0 %vm444_vm2, %v2536_v53  ;;  %v1449_v53 = vor.u32 %v1448_v33, %v1445_v63 }
 0x100   : > { %v1415_v38 = vor.u32 %v1414_v40, %v1413_v60  ;;  %v2550_v7 = vsel %vm2529_vm6, %v2547_v28, %v2549_v61  ;;  %v2552_v62 = vsel %vm2529_vm6, %v2549_v61, %v2551_v36  ;;  %v2560_v35 = vsel %vm2529_vm6, %v2557_v16, %v2559_v20 }
 0x101   : > { %v1450_v5 = vsel %vm1373_vm1, %v1440_v44, %v1449_v53 }
 0x102   : > { %v1416_v50 = vsel %vm1373_vm1, %v1411_v56, %v1415_v38  ;;  %v1420_v31 = vsel %vm1373_vm1, %v1415_v38, %v1419_v47 }
 0x103   : > { %3837 = vmatmul.mubr.msk.bf16.gmra.mrb[20].mxu1 %vm444_vm2, %v4957_v49  ;;  %v2543_v49 = vrot.slane %v4536_v15, 3  ;;  %v1164_v15 = vsel %vm873_vm5, %v1161_v13, %v1163_v46 }
 0x104   : > { %3840 = vmatprep.mubr.msk.bf16.mxu1 %vm444_vm2, %v4972_v45  ;;  %v2542_v45 = vsel %vm2529_vm6, %v2539_v24, %v2541_v30  ;;  %v2561_v24 = vrot.slane %v4911_v18, 3 }
 0x105   : > { %v2544_v48 = vsel %vm2529_vm6, %v2541_v30, %v2543_v49  ;;  %v2546_v3 = vsel %vm2529_vm6, %v2543_v49, %v2545_v51 }
 0x106   : > { %3991 = vmatmul.mubr.msk.bf16.gmra.mrb[4].mxu0 %vm444_vm2, %v2538_v29  ;;  %v2562_v25 = vsel %vm2529_vm6, %v2559_v20, %v2561_v24 }
 0x107   : > { %3994 = vmatprep.mubr.msk.bf16.mxu0 %vm444_vm2, %v2540_v41 }
 0x10b   : > { %3841 = vmatmul.mubr.msk.bf16.gmra.mrb[24].mxu1 %vm444_vm2, %v4976_v58  ;;  %v5265_v58 = vld [vmem:[#allocation2_spill] sm:$0xff] }
 0x10c   : > { %3844 = vmatprep.mubr.msk.bf16.mxu1 %vm444_vm2, %v1162_v39  ;;  %v1412_v52 = vsel %vm1373_vm1, %v5265_v58, %v1411_v56  ;;  %v5171_v58 = vld [vmem:[%s5245_s2] ss:$0 sm:$0xff] }
 0x10e   : > { %3995 = vmatmul.mubr.msk.bf16.gmra.mrb[8].mxu0 %vm444_vm2, %v2542_v45 }
 0x10f   : > { %3998 = vmatprep.mubr.msk.bf16.mxu0 %vm444_vm2, %v2544_v48 }
 0x113   : > { %3845 = vmatmul.mubr.msk.bf16.gmra.mrb[28].mxu1 %vm444_vm2, %v1164_v15 }
 0x114   : > { %3866 = vmatprep.mubr.msk.bf16.mxu1 %vm444_vm2, %v1412_v52 }
 0x116   : > { %3999 = vmatmul.mubr.msk.bf16.gmra.mrb[12].mxu0 %vm444_vm2, %v2546_v3 }
 0x117   : > { %4002 = vmatprep.mubr.msk.bf16.mxu0 %vm444_vm2, %v2548_v17 }
 0x11b   : > { %3867 = vmatmul.mubr.msk.bf16.vlgmr.msra.gmra.mrb[16].mxu1 %vm444_vm2, %v1416_v50 }
 0x11c   : > { %3870 = vmatprep.mubr.msk.bf16.mxu1 %vm444_vm2, %v1420_v31 }
 0x11e   : > { %4003 = vmatmul.mubr.msk.bf16.gmra.mrb[16].mxu0 %vm444_vm2, %v2550_v7 }
 0x11f   : > { %4006 = vmatprep.mubr.msk.bf16.mxu0 %vm444_vm2, %v2552_v62 }
 0x123   : > { %3871 = vmatmul.mubr.msk.bf16.gmra.mrb[20].mxu1 %vm444_vm2, %v1424_v10 }
 0x124   : > { %3874 = vmatprep.mubr.msk.bf16.mxu1 %vm444_vm2, %v1428_v59 }
 0x126   : > { %4007 = vmatmul.mubr.msk.bf16.gmra.mrb[20].mxu0 %vm444_vm2, %v2554_v8 }
 0x127   : > { %4010 = vmatprep.mubr.msk.bf16.mxu0 %vm444_vm2, %v2556_v2 }
 0x12b   : > { %3875 = vmatmul.mubr.msk.bf16.gmra.mrb[24].mxu1 %vm444_vm2, %v1432_v14 }
 0x12c   : > { %3878 = vmatprep.mubr.msk.bf16.mxu1 %vm444_vm2, %v1441_v6 }
 0x12e   : > { %4011 = vmatmul.mubr.msk.bf16.gmra.mrb[24].mxu0 %vm444_vm2, %v2558_v9 }
 0x12f   : > { %4014 = vmatprep.mubr.msk.bf16.mxu0 %vm444_vm2, %v2560_v35 }
 0x133   : > { %3879 = vmatmul.mubr.msk.bf16.gmra.mrb[28].mxu1 %vm444_vm2, %v1450_v5 }
 0x136   : > { %4015 = vmatmul.mubr.msk.bf16.gmra.mrb[28].mxu0 %vm444_vm2, %v2562_v25 }
 0x1ae   : > { %v3818_v29 = vpop.f32.mrb[0].mxu1 }
 0x1af   : > { %v1211_v41 = vpop.f32.mrb[1].mxu1 }
 0x1b0   : > { %v3819_v13 = vpop.f32.mrb[2].mxu1 }
 0x1b1   : > { %v1214_v30 = vpop.f32.mrb[3].mxu1 }
 0x1b6   : > { %v3822_v39 = vpop.f32.mrb[4].mxu1 }
 0x1b7   : > { %v1227_v49 = vpop.f32.mrb[5].mxu1 }
 0x1b8   : > { %v3823_v1 = vpop.f32.mrb[6].mxu1 }
 0x1b9   : > { %v1230_v11 = vpop.f32.mrb[7].mxu1 }
 0x1be   : > { %v5151_v45 = vpop.f32.mrb[8].mxu1 }
 0x1bf   : > { %v5153_v46 = vpop.f32.mrb[9].mxu1 }
 0x1c0   : > { %v5155_v18 = vpop.f32.mrb[10].mxu1 }
 0x1c1   : > { %v5157_v48 = vpop.f32.mrb[11].mxu1 }
 0x1c6   : > { %v5159_v56 = vpop.f32.mrb[12].mxu1 }
 0x1c7   : > { %v5161_v15 = vpop.f32.mrb[13].mxu1 }
 0x1c8   : > { %v5163_v51 = vpop.f32.mrb[14].mxu1 }
 0x1c9   : > { %v5165_v60 = vpop.f32.mrb[15].mxu1 }
 0x1d1   : > { %v3988_v40 = vpop.f32.mrb[0].mxu0 }
 0x1d2   : > { %v4020_v52 = vadd.f32 %v3988_v40, %v3818_v29  ;;  %v2651_v28 = vpop.f32.mrb[1].mxu0 }
 0x1d3   : > { %v4021_v54 = vadd.f32 %v2651_v28, %v1211_v41  ;;  %v3989_v26 = vpop.f32.mrb[2].mxu0 }
 0x1d4   : > { %v2819_v3 = vadd.f32 %v4020_v52, %v5171_v58  ;;  %v4022_v38 = vadd.f32 %v3989_v26, %v3819_v13  ;;  %v2654_v17 = vpop.f32.mrb[3].mxu0 }
 0x1d5   : > { %v2817_v47 = vadd.f32 %v4021_v54, %v5171_v58  ;;  %v4023_v50 = vadd.f32 %v2654_v17, %v1214_v30 }
 0x1d6   : > { %v2883_v61 = vmul.f32 0.01, %v2819_v3  ;;  %v2820_v22 = vadd.f32 %v4022_v38, %v5171_v58  ;;  %vm2851_vm7 = vcmp.ge.f32.partialorder %v2819_v3, 0.0 }
 0x1d7   : > { %v2881_v37 = vmul.f32 0.01, %v2817_v47  ;;  %v2818_v31 = vadd.f32 %v4023_v50, %v5171_v58  ;;  %vm2849_vm8 = vcmp.ge.f32.partialorder %v2817_v47, 0.0 }
 0x1d8   : > { %vm2852_vm9 = vcmp.ge.f32.partialorder %v2820_v22, 0.0  ;;  %v2884_v36 = vmul.f32 0.01, %v2820_v22  ;;  %v2915_v7 = vsel %vm2851_vm7, %v2819_v3, %v2883_v61 }
 0x1d9   : > { %vm2850_vm10 = vcmp.ge.f32.partialorder %v2818_v31, 0.0  ;;  %v2882_v57 = vmul.f32 0.01, %v2818_v31  ;;  %v3992_v34 = vpop.f32.mrb[4].mxu0  ;;  %v2913_v10 = vsel %vm2849_vm8, %v2817_v47, %v2881_v37 }
 0x1da   : > { %v2916_v23 = vsel %vm2852_vm9, %v2820_v22, %v2884_v36  ;;  %v4024_v62 = vadd.f32 %v3992_v34, %v3822_v39  ;;  %v2667_v55 = vpop.f32.mrb[5].mxu0 }
 0x1db   : > { %v3472_v21 = vpack.c.bf16 %v2916_v23, %v2915_v7  ;;  %v2914_v19 = vsel %vm2850_vm10, %v2818_v31, %v2882_v57  ;;  %v4025_v12 = vadd.f32 %v2667_v55, %v1227_v49  ;;  %v3993_v59 = vpop.f32.mrb[6].mxu0 }
 0x1dc   : > { %v3467_v4 = vpack.c.bf16 %v2914_v19, %v2913_v10  ;;  %v2823_v43 = vadd.f32 %v4024_v62, %v5171_v58  ;;  %v4026_v0 = vadd.f32 %v3993_v59, %v3823_v1  ;;  %v2670_v8 = vpop.f32.mrb[7].mxu0 }
 0x1dd   : > { %3544 = vst [vmem:[%s5180_s22 + $0x8] sm:$0xff] %v3472_v21   ;;  %v2821_v42 = vadd.f32 %v4025_v12, %v5171_v58  ;;  %v4027_v27 = vadd.f32 %v2670_v8, %v1230_v11 }
 0x1de   : > { %3468 = vst [vmem:[%s5180_s22] sm:$0xff] %v3467_v4   ;;  %v2887_v32 = vmul.f32 0.01, %v2823_v43  ;;  %v2824_v2 = vadd.f32 %v4026_v0, %v5171_v58  ;;  %vm2855_vm11 = vcmp.ge.f32.partialorder %v2823_v43, 0.0 }
 0x1df   : > { %v2885_v44 = vmul.f32 0.01, %v2821_v42  ;;  %v2822_v14 = vadd.f32 %v4027_v27, %v5171_v58  ;;  %vm2853_vm12 = vcmp.ge.f32.partialorder %v2821_v42, 0.0 }
 0x1e0   : > { %vm2856_vm13 = vcmp.ge.f32.partialorder %v2824_v2, 0.0  ;;  %v2888_v16 = vmul.f32 0.01, %v2824_v2  ;;  %v2919_v6 = vsel %vm2855_vm11, %v2823_v43, %v2887_v32 }
 0x1e1   : > { %vm2854_vm14 = vcmp.ge.f32.partialorder %v2822_v14, 0.0  ;;  %v2886_v63 = vmul.f32 0.01, %v2822_v14  ;;  %v3996_v33 = vpop.f32.mrb[8].mxu0  ;;  %v2917_v35 = vsel %vm2853_vm12, %v2821_v42, %v2885_v44 }
 0x1e2   : > { %v2920_v20 = vsel %vm2856_vm13, %v2824_v2, %v2888_v16  ;;  %v4028_v9 = vadd.f32 %v3996_v33, %v5151_v45  ;;  %v2683_v53 = vpop.f32.mrb[9].mxu0 }
 0x1e3   : > { %v3482_v5 = vpack.c.bf16 %v2920_v20, %v2919_v6  ;;  %v2918_v24 = vsel %vm2854_vm14, %v2822_v14, %v2886_v63  ;;  %v4029_v25 = vadd.f32 %v2683_v53, %v5153_v46  ;;  %v3997_v29 = vpop.f32.mrb[10].mxu0 }
 0x1e4   : > { %v3477_v41 = vpack.c.bf16 %v2918_v24, %v2917_v35  ;;  %v2827_v13 = vadd.f32 %v4028_v9, %v5171_v58  ;;  %v4030_v30 = vadd.f32 %v3997_v29, %v5155_v18  ;;  %v2686_v39 = vpop.f32.mrb[11].mxu0 }
 0x1e5   : > { %3546 = vst [vmem:[%s5180_s22 + $0x18] sm:$0xff] %v3482_v5   ;;  %v2825_v49 = vadd.f32 %v4029_v25, %v5171_v58  ;;  %v4031_v1 = vadd.f32 %v2686_v39, %v5157_v48 }
 0x1e6   : > { %3545 = vst [vmem:[%s5180_s22 + $0x10] sm:$0xff] %v3477_v41   ;;  %v2891_v11 = vmul.f32 0.01, %v2827_v13  ;;  %v2828_v45 = vadd.f32 %v4030_v30, %v5171_v58  ;;  %vm2859_vm15 = vcmp.ge.f32.partialorder %v2827_v13, 0.0 }
 0x1e7   : > { %v2889_v40 = vmul.f32 0.01, %v2825_v49  ;;  %v2826_v46 = vadd.f32 %v4031_v1, %v5171_v58  ;;  %vm2857_vm0 = vcmp.ge.f32.partialorder %v2825_v49, 0.0 }
 0x1e8   : > { %vm2860_vm1 = vcmp.ge.f32.partialorder %v2828_v45, 0.0  ;;  %v2892_v52 = vmul.f32 0.01, %v2828_v45  ;;  %v2923_v54 = vsel %vm2859_vm15, %v2827_v13, %v2891_v11 }
 0x1e9   : > { %vm2858_vm2 = vcmp.ge.f32.partialorder %v2826_v46, 0.0  ;;  %v2890_v18 = vmul.f32 0.01, %v2826_v46  ;;  %v4000_v28 = vpop.f32.mrb[12].mxu0  ;;  %v2921_v38 = vsel %vm2857_vm0, %v2825_v49, %v2889_v40 }
 0x1ea   : > { %v2924_v26 = vsel %vm2860_vm1, %v2828_v45, %v2892_v52  ;;  %v4032_v48 = vadd.f32 %v4000_v28, %v5159_v56  ;;  %v2699_v3 = vpop.f32.mrb[13].mxu0 }
 0x1eb   : > { %v3492_v17 = vpack.c.bf16 %v2924_v26, %v2923_v54  ;;  %v2922_v47 = vsel %vm2858_vm2, %v2826_v46, %v2890_v18  ;;  %v4033_v50 = vadd.f32 %v2699_v3, %v5161_v15  ;;  %v4001_v61 = vpop.f32.mrb[14].mxu0 }
 0x1ec   : > { %v3487_v22 = vpack.c.bf16 %v2922_v47, %v2921_v38  ;;  %v2831_v37 = vadd.f32 %v4032_v48, %v5171_v58  ;;  %v4034_v31 = vadd.f32 %v4001_v61, %v5163_v51  ;;  %v2702_v36 = vpop.f32.mrb[15].mxu0 }
 0x1ed   : > { %3548 = vst [vmem:[%s5180_s22 + $0x28] sm:$0xff] %v3492_v17   ;;  %v2829_v57 = vadd.f32 %v4033_v50, %v5171_v58  ;;  %v4035_v34 = vadd.f32 %v2702_v36, %v5165_v60 }
 0x1ee   : > { %v3868_v7 = vpop.f32.mrb[16].mxu1  ;;  %3547 = vst [vmem:[%s5180_s22 + $0x20] sm:$0xff] %v3487_v22   ;;  %v2895_v56 = vmul.f32 0.01, %v2831_v37  ;;  %v2832_v23 = vadd.f32 %v4034_v31, %v5171_v58  ;;  %vm2863_vm3 = vcmp.ge.f32.partialorder %v2831_v37, 0.0 }
 0x1ef   : > { %v1603_v62 = vpop.f32.mrb[17].mxu1  ;;  %v2893_v15 = vmul.f32 0.01, %v2829_v57  ;;  %v2830_v55 = vadd.f32 %v4035_v34, %v5171_v58  ;;  %vm2861_vm4 = vcmp.ge.f32.partialorder %v2829_v57, 0.0 }
 0x1f0   : > { %v3869_v10 = vpop.f32.mrb[18].mxu1  ;;  %vm2864_vm5 = vcmp.ge.f32.partialorder %v2832_v23, 0.0  ;;  %v2896_v51 = vmul.f32 0.01, %v2832_v23  ;;  %v2927_v60 = vsel %vm2863_vm3, %v2831_v37, %v2895_v56 }
 0x1f1   : > { %v1606_v21 = vpop.f32.mrb[19].mxu1  ;;  %vm2862_vm6 = vcmp.ge.f32.partialorder %v2830_v55, 0.0  ;;  %v2894_v19 = vmul.f32 0.01, %v2830_v55  ;;  %v4004_v12 = vpop.f32.mrb[16].mxu0  ;;  %v2925_v0 = vsel %vm2861_vm4, %v2829_v57, %v2893_v15 }
 0x1f2   : > { %v2928_v59 = vsel %vm2864_vm5, %v2832_v23, %v2896_v51  ;;  %v4036_v4 = vadd.f32 %v4004_v12, %v3868_v7  ;;  %v2715_v43 = vpop.f32.mrb[17].mxu0 }
 0x1f3   : > { %v3502_v8 = vpack.c.bf16 %v2928_v59, %v2927_v60  ;;  %v2926_v42 = vsel %vm2862_vm6, %v2830_v55, %v2894_v19  ;;  %v4037_v27 = vadd.f32 %v2715_v43, %v1603_v62  ;;  %v4005_v32 = vpop.f32.mrb[18].mxu0 }
 0x1f4   : > { %v3497_v2 = vpack.c.bf16 %v2926_v42, %v2925_v0  ;;  %v2835_v44 = vadd.f32 %v4036_v4, %v5171_v58  ;;  %v4038_v14 = vadd.f32 %v4005_v32, %v3869_v10  ;;  %v2718_v16 = vpop.f32.mrb[19].mxu0 }
 0x1f5   : > { %3550 = vst [vmem:[%s5180_s22 + $0x38] sm:$0xff] %v3502_v8   ;;  %v2833_v63 = vadd.f32 %v4037_v27, %v5171_v58  ;;  %v4039_v33 = vadd.f32 %v2718_v16, %v1606_v21 }
 0x1f6   : > { %v3872_v6 = vpop.f32.mrb[20].mxu1  ;;  %3549 = vst [vmem:[%s5180_s22 + $0x30] sm:$0xff] %v3497_v2   ;;  %v2899_v20 = vmul.f32 0.01, %v2835_v44  ;;  %v2836_v9 = vadd.f32 %v4038_v14, %v5171_v58  ;;  %vm2867_vm7 = vcmp.ge.f32.partialorder %v2835_v44, 0.0 }
 0x1f7   : > { %v1619_v53 = vpop.f32.mrb[21].mxu1  ;;  %v2897_v35 = vmul.f32 0.01, %v2833_v63  ;;  %v2834_v5 = vadd.f32 %v4039_v33, %v5171_v58  ;;  %vm2865_vm8 = vcmp.ge.f32.partialorder %v2833_v63, 0.0 }
 0x1f8   : > { %v3873_v24 = vpop.f32.mrb[22].mxu1  ;;  %vm2868_vm9 = vcmp.ge.f32.partialorder %v2836_v9, 0.0  ;;  %v2900_v25 = vmul.f32 0.01, %v2836_v9  ;;  %v2931_v30 = vsel %vm2867_vm7, %v2835_v44, %v2899_v20 }
 0x1f9   : > { %v1622_v29 = vpop.f32.mrb[23].mxu1  ;;  %vm2866_vm10 = vcmp.ge.f32.partialorder %v2834_v5, 0.0  ;;  %v2898_v41 = vmul.f32 0.01, %v2834_v5  ;;  %v4008_v13 = vpop.f32.mrb[20].mxu0  ;;  %v2929_v11 = vsel %vm2865_vm8, %v2833_v63, %v2897_v35 }
 0x1fa   : > { %v2932_v39 = vsel %vm2868_vm9, %v2836_v9, %v2900_v25  ;;  %v4040_v49 = vadd.f32 %v4008_v13, %v3872_v6  ;;  %v2731_v1 = vpop.f32.mrb[21].mxu0 }
 0x1fb   : > { %v3512_v45 = vpack.c.bf16 %v2932_v39, %v2931_v30  ;;  %v2930_v40 = vsel %vm2866_vm10, %v2834_v5, %v2898_v41  ;;  %v4041_v46 = vadd.f32 %v2731_v1, %v1619_v53  ;;  %v4009_v52 = vpop.f32.mrb[22].mxu0 }
 0x1fc   : > { %v3507_v18 = vpack.c.bf16 %v2930_v40, %v2929_v11  ;;  %v2839_v28 = vadd.f32 %v4040_v49, %v5171_v58  ;;  %v4042_v54 = vadd.f32 %v4009_v52, %v3873_v24  ;;  %v2734_v26 = vpop.f32.mrb[23].mxu0 }
 0x1fd   : > { %3552 = vst [vmem:[%s5180_s22 + $0x48] sm:$0xff] %v3512_v45   ;;  %v2837_v48 = vadd.f32 %v4041_v46, %v5171_v58  ;;  %v4043_v3 = vadd.f32 %v2734_v26, %v1622_v29 }
 0x1fe   : > { %v3876_v38 = vpop.f32.mrb[24].mxu1  ;;  %3551 = vst [vmem:[%s5180_s22 + $0x40] sm:$0xff] %v3507_v18   ;;  %v2903_v17 = vmul.f32 0.01, %v2839_v28  ;;  %v2840_v47 = vadd.f32 %v4042_v54, %v5171_v58  ;;  %vm2871_vm11 = vcmp.ge.f32.partialorder %v2839_v28, 0.0 }
 0x1ff   : > { %v1635_v50 = vpop.f32.mrb[25].mxu1  ;;  %v2901_v61 = vmul.f32 0.01, %v2837_v48  ;;  %v2838_v22 = vadd.f32 %v4043_v3, %v5171_v58  ;;  %vm2869_vm12 = vcmp.ge.f32.partialorder %v2837_v48, 0.0 }
 0x200   : > { %v3877_v37 = vpop.f32.mrb[26].mxu1  ;;  %vm2872_vm13 = vcmp.ge.f32.partialorder %v2840_v47, 0.0  ;;  %v2904_v31 = vmul.f32 0.01, %v2840_v47  ;;  %v2935_v7 = vsel %vm2871_vm11, %v2839_v28, %v2903_v17 }
 0x201   : > { %v1638_v36 = vpop.f32.mrb[27].mxu1  ;;  %vm2870_vm14 = vcmp.ge.f32.partialorder %v2838_v22, 0.0  ;;  %v2902_v57 = vmul.f32 0.01, %v2838_v22  ;;  %v4012_v34 = vpop.f32.mrb[24].mxu0  ;;  %v2933_v15 = vsel %vm2869_vm12, %v2837_v48, %v2901_v61 }
 0x202   : > { %v2936_v56 = vsel %vm2872_vm13, %v2840_v47, %v2904_v31  ;;  %v4044_v23 = vadd.f32 %v4012_v34, %v3876_v38  ;;  %v2747_v62 = vpop.f32.mrb[25].mxu0 }
 0x203   : > { %v3522_v55 = vpack.c.bf16 %v2936_v56, %v2935_v7  ;;  %v2934_v10 = vsel %vm2870_vm14, %v2838_v22, %v2902_v57  ;;  %v4045_v51 = vadd.f32 %v2747_v62, %v1635_v50  ;;  %v4013_v21 = vpop.f32.mrb[26].mxu0 }
 0x204   : > { %v3517_v19 = vpack.c.bf16 %v2934_v10, %v2933_v15  ;;  %v2843_v12 = vadd.f32 %v4044_v23, %v5171_v58  ;;  %v4046_v60 = vadd.f32 %v4013_v21, %v3877_v37  ;;  %v2750_v59 = vpop.f32.mrb[27].mxu0 }
 0x205   : > { %3554 = vst [vmem:[%s5180_s22 + $0x58] sm:$0xff] %v3522_v55   ;;  %v2841_v4 = vadd.f32 %v4045_v51, %v5171_v58  ;;  %v4047_v43 = vadd.f32 %v2750_v59, %v1638_v36 }
 0x206   : > { %v3880_v0 = vpop.f32.mrb[28].mxu1  ;;  %3553 = vst [vmem:[%s5180_s22 + $0x50] sm:$0xff] %v3517_v19   ;;  %v2907_v8 = vmul.f32 0.01, %v2843_v12  ;;  %v2844_v42 = vadd.f32 %v4046_v60, %v5171_v58  ;;  %vm2875_vm15 = vcmp.ge.f32.partialorder %v2843_v12, 0.0 }
 0x207   : > { %v1651_v27 = vpop.f32.mrb[29].mxu1  ;;  %v2905_v32 = vmul.f32 0.01, %v2841_v4  ;;  %v2842_v2 = vadd.f32 %v4047_v43, %v5171_v58  ;;  %vm2873_vm0 = vcmp.ge.f32.partialorder %v2841_v4, 0.0 }
 0x208   : > { %v3881_v44 = vpop.f32.mrb[30].mxu1  ;;  %vm2876_vm1 = vcmp.ge.f32.partialorder %v2844_v42, 0.0  ;;  %v2908_v14 = vmul.f32 0.01, %v2844_v42  ;;  %v2939_v6 = vsel %vm2875_vm15, %v2843_v12, %v2907_v8 }
 0x209   : > { %v1654_v16 = vpop.f32.mrb[31].mxu1  ;;  %vm2874_vm2 = vcmp.ge.f32.partialorder %v2842_v2, 0.0  ;;  %v2906_v63 = vmul.f32 0.01, %v2842_v2  ;;  %v4016_v33 = vpop.f32.mrb[28].mxu0  ;;  %v2937_v35 = vsel %vm2873_vm0, %v2841_v4, %v2905_v32 }
 0x20a   : > { %v2940_v20 = vsel %vm2876_vm1, %v2844_v42, %v2908_v14  ;;  %v4048_v9 = vadd.f32 %v4016_v33, %v3880_v0  ;;  %v2763_v53 = vpop.f32.mrb[29].mxu0 }
 0x20b   : > { %v3532_v5 = vpack.c.bf16 %v2940_v20, %v2939_v6  ;;  %v2938_v24 = vsel %vm2874_vm2, %v2842_v2, %v2906_v63  ;;  %v4049_v25 = vadd.f32 %v2763_v53, %v1651_v27  ;;  %v4017_v29 = vpop.f32.mrb[30].mxu0 }
 0x20c   : > { %v3527_v41 = vpack.c.bf16 %v2938_v24, %v2937_v35  ;;  %v2847_v13 = vadd.f32 %v4048_v9, %v5171_v58  ;;  %v4050_v30 = vadd.f32 %v4017_v29, %v3881_v44  ;;  %v2766_v39 = vpop.f32.mrb[31].mxu0 }
 0x20d   : > { %3556 = vst [vmem:[%s5180_s22 + $0x68] sm:$0xff] %v3532_v5   ;;  %v2845_v49 = vadd.f32 %v4049_v25, %v5171_v58  ;;  %v4051_v1 = vadd.f32 %v2766_v39, %v1654_v16 }
 0x20e   : > { %3555 = vst [vmem:[%s5180_s22 + $0x60] sm:$0xff] %v3527_v41   ;;  %v2911_v11 = vmul.f32 0.01, %v2847_v13  ;;  %v2848_v45 = vadd.f32 %v4050_v30, %v5171_v58  ;;  %vm2879_vm3 = vcmp.ge.f32.partialorder %v2847_v13, 0.0 }
 0x20f   : > { %v2909_v40 = vmul.f32 0.01, %v2845_v49  ;;  %v2846_v46 = vadd.f32 %v4051_v1, %v5171_v58  ;;  %vm2877_vm4 = vcmp.ge.f32.partialorder %v2845_v49, 0.0 }
 0x210   : > { %vm2880_vm5 = vcmp.ge.f32.partialorder %v2848_v45, 0.0  ;;  %v2912_v52 = vmul.f32 0.01, %v2848_v45  ;;  %v2943_v28 = vsel %vm2879_vm3, %v2847_v13, %v2911_v11 }
 0x211   : > { %vm2878_vm6 = vcmp.ge.f32.partialorder %v2846_v46, 0.0  ;;  %v2910_v18 = vmul.f32 0.01, %v2846_v46  ;;  %v2941_v26 = vsel %vm2877_vm4, %v2845_v49, %v2909_v40 }
 0x212   : > { %v2944_v54 = vsel %vm2880_vm5, %v2848_v45, %v2912_v52 }
 0x213   : > { %v3542_v48 = vpack.c.bf16 %v2944_v54, %v2943_v28  ;;  %v2942_v3 = vsel %vm2878_vm6, %v2846_v46, %v2910_v18 }
 0x214   : > { %v3537_v38 = vpack.c.bf16 %v2942_v3, %v2941_v26 }
 0x215   : > { %3558 = vst [vmem:[%s5180_s22 + $0x78] sm:$0xff] %v3542_v48  }
 0x216   : > { %3557 = vst [vmem:[%s5180_s22 + $0x70] sm:$0xff] %v3537_v38  }
 0x217 PF: > { %s13_s14 = sadd.s32 1, %s4352_s14   ;;  %s5266_s12 = smov %s4348_s13 }
 0x218   : > { %p10_p5 = scmp.ge.s32.totalorder %s13_s14, 5   ;;  %s5267_s13 = smov %s5269_s15 }
 0x21a   :  { %12 = sbr.rel (!%p10_p5) target bundleno = 2 (0x2), region = 74 }

</bundles_post_ra>
